<compile_context>
chip_gen: v6e
topology: v6e:2x2x1
jax: 0.10.0
libtpu: 0.0.40
codegen_flags: <defaults>
</compile_context>

<pallas_src>
import jax
import jax.numpy as jnp
from jax.experimental import pallas as pl
from jax.experimental.pallas import tpu as pltpu

BN_EPS = 1e-5


# ----------------------------- Pallas kernels -----------------------------

def _conv_pad_stats_kernel(x_ref, w_ref, b_ref, ypad_ref, psum_ref, psumsq_ref, conv_sc):
    """Fused: 3x3 valid conv (+bias) -> ReflectionPad2d(1) -> partial BN stats.

    x_ref:    (1, H*W, Cin)  bf16   flattened NHWC image
    w_ref:    (9, Cin, Cout) bf16   3x3 weights, k = di*3 + dj
    b_ref:    (1, Cout)      f32
    ypad_ref: (1, H, W, Cout) f32   padded conv output (stage activation)
    psum_ref / psumsq_ref: (1, 1, Cout) f32  per-image partial sums of the padded output
    conv_sc:  (H*W - 2*W - 2, Cout) f32 VMEM scratch holding all valid conv rows
    """
    _, H, W, Cout = ypad_ref.shape
    Ho, Wo = H - 2, W - 2
    L = conv_sc.shape[0]                                   # = H*W - 2*W - 2

    # --- 3x3 VALID conv as 9 shifted-slab matmuls (bf16 x bf16 -> f32 on the MXU) ---
    acc = jnp.zeros((L, Cout), jnp.float32)
    for k in range(9):
        di, dj = divmod(k, 3)
        shift = di * W + dj
        tap = x_ref[0, shift:shift + L, :]                 # (L, Cin) bf16
        acc = acc + jnp.dot(tap, w_ref[k], preferred_element_type=jnp.float32)
    conv_sc[...] = acc + b_ref[...]                        # + bias, f32

    # --- scatter valid conv rows into the interior of the padded output block ---
    def _scatter_row(r, carry):
        start = r * W
        if W % 8 == 0:
            start = pl.multiple_of(start, 8)
        ypad_ref[0, 1 + r, 1:W - 1, :] = conv_sc[pl.ds(start, Wo), :]
        return carry

    jax.lax.fori_loop(0, Ho, _scatter_row, 0)

    # --- ReflectionPad2d(1): borders are copies of already-written rows / columns ---
    ypad_ref[0, 0:1, 1:W - 1, :] = ypad_ref[0, 2:3, 1:W - 1, :]
    ypad_ref[0, H - 1:H, 1:W - 1, :] = ypad_ref[0, H - 3:H - 2, 1:W - 1, :]
    ypad_ref[0, :, 0:1, :] = ypad_ref[0, :, 2:3, :]
    ypad_ref[0, :, W - 1:W, :] = ypad_ref[0, :, W - 3:W - 2, :]

    # --- per-image partial BatchNorm statistics of the padded activation (one pass) ---
    def _stat_row(i, carry):
        s, q = carry
        row = ypad_ref[0, i]                               # (W, Cout) f32
        s = s + jnp.sum(row, axis=0, keepdims=True)
        q = q + jnp.sum(row * row, axis=0, keepdims=True)
        return s, q

    zero = jnp.zeros((1, Cout), jnp.float32)
    s_tot, q_tot = jax.lax.fori_loop(0, H, _stat_row, (zero, zero))
    psum_ref[0] = s_tot
    psumsq_ref[0] = q_tot


def _bn_relu_kernel(x_ref, scale_ref, shift_ref, o_ref):
    """BatchNorm affine + ReLU on a lane-dense (rows, W*C) tile.  scale/shift: (1, W*C)."""
    y = x_ref[...] * scale_ref[...] + shift_ref[...]
    o_ref[...] = jnp.maximum(y, 0.0).astype(o_ref.dtype)


# ----------------------------- wrappers -----------------------------

def _pick_row_tile(m_rows: int, row_bytes: int, budget_bytes: int = 2 << 20) -> int:
    """Largest row tile (multiple of 8) whose block fits a conservative per-block VMEM
    budget.  2 MiB per block (x2 double-buffering, + output) stays well inside the
    default scoped-VMEM limit on v5e/v6e (32/128 MiB) and v7x (32/64 MiB)."""
    t = budget_bytes // max(row_bytes, 1)
    if t >= m_rows:
        return m_rows
    return max(8, (t // 8) * 8)


def _conv_pad_stats(x_flat, w9, b_row, N, H, W):
    Cin = x_flat.shape[-1]
    Cout = w9.shape[-1]
    L = H * W - 2 * W - 2
    return pl.pallas_call(
        _conv_pad_stats_kernel,
        out_shape=(
            jax.ShapeDtypeStruct((N, H, W, Cout), jnp.float32),
            jax.ShapeDtypeStruct((N, 1, Cout), jnp.float32),
            jax.ShapeDtypeStruct((N, 1, Cout), jnp.float32),
        ),
        grid=(N,),
        in_specs=[
            pl.BlockSpec((1, H * W, Cin), lambda n: (n, 0, 0)),
            pl.BlockSpec((9, Cin, Cout), lambda n: (0, 0, 0)),
            pl.BlockSpec((1, Cout), lambda n: (0, 0)),
        ],
        out_specs=(
            pl.BlockSpec((1, H, W, Cout), lambda n: (n, 0, 0, 0)),
            pl.BlockSpec((1, 1, Cout), lambda n: (n, 0, 0)),
            pl.BlockSpec((1, 1, Cout), lambda n: (n, 0, 0)),
        ),
        scratch_shapes=[pltpu.VMEM((L, Cout), jnp.float32)],
        compiler_params=pltpu.CompilerParams(dimension_semantics=("parallel",)),
    )(x_flat, w9, b_row)


def _stage(x_nhwc, w_hwio, bias, gamma, beta, out_dtype):
    """Conv3x3(valid) -> ReflectionPad(1) -> BatchNorm(train) -> ReLU.  x: NHWC."""
    N, H, W, Cin = x_nhwc.shape
    Cout = w_hwio.shape[-1]
    assert H >= 4 and W >= 4, "3x3 valid conv + ReflectionPad(1) needs H, W >= 4"

    # bf16 MXU operands + halved activation DMA traffic; accumulation stays f32.
    x_flat = x_nhwc.reshape(N, H * W, Cin).astype(jnp.bfloat16)
    w9 = w_hwio.reshape(9, Cin, Cout).astype(jnp.bfloat16)
    b_row = bias.reshape(1, Cout).astype(jnp.float32)

    y_pad, psum, psumsq = _conv_pad_stats(x_flat, w9, b_row, N, H, W)

    # Finalize BatchNorm(training) statistics -- C-length vectors, negligible XLA glue.
    count = float(N * H * W)
    mean = jnp.sum(psum[:, 0, :], axis=0) / count
    var = jnp.sum(psumsq[:, 0, :], axis=0) / count - mean * mean
    inv = jax.lax.rsqrt(var + BN_EPS)
    scale = gamma * inv
    shift = beta - mean * scale

    # Lane-dense (N*H, W*C) view for the affine+ReLU kernel (W*C lanes instead of C).
    wc = W * Cout
    y2d = y_pad.reshape(N * H, wc)
    scale_row = jnp.tile(scale, (W,)).reshape(1, wc)
    shift_row = jnp.tile(shift, (W,)).reshape(1, wc)

    tm = _pick_row_tile(N * H, wc * 4)
    out2d = pl.pallas_call(
        _bn_relu_kernel,
        out_shape=jax.ShapeDtypeStruct((N * H, wc), out_dtype),
        grid=(pl.cdiv(N * H, tm),),
        in_specs=[
            pl.BlockSpec((tm, wc), lambda i: (i, 0)),
            pl.BlockSpec((1, wc), lambda i: (0, 0)),
            pl.BlockSpec((1, wc), lambda i: (0, 0)),
        ],
        out_specs=pl.BlockSpec((tm, wc), lambda i: (i, 0)),
        compiler_params=pltpu.CompilerParams(dimension_semantics=("parallel",)),
    )(y2d, scale_row, shift_row)
    return out2d.reshape(N, H, W, Cout)


def downblock_forward(params, x_nchw):
    """Equivalent of DownBlock.forward(x).  Input/output are NCHW (PyTorch layout)."""
    x = jnp.transpose(x_nchw, (0, 2, 3, 1))                                   # NHWC
    # Stage 1 emits bf16 so the stage-2 conv reads bf16 directly (no extra cast pass).
    y = _stage(x, params["w1"], params["b1"], params["g1"], params["be1"], jnp.bfloat16)
    y = _stage(y, params["w2"], params["b2"], params["g2"], params["be2"], jnp.float32)
    return jnp.transpose(y, (0, 3, 1, 2))                                     # NCHW


# ----------------------------- pure-JAX reference (correctness check) -----------------------------

def _ref_forward(params, x_nchw):
    x = jnp.transpose(x_nchw, (0, 2, 3, 1))

    def stage(x, w, b, g, be, out_dtype):
        y = jax.lax.conv_general_dilated(
            x.astype(jnp.bfloat16), w.astype(jnp.bfloat16), (1, 1), "VALID",
            dimension_numbers=("NHWC", "HWIO", "NHWC"),
            preferred_element_type=jnp.float32) + b
        y = jnp.pad(y, ((0, 0), (1, 1), (1, 1), (0, 0)), mode="reflect")
        m = jnp.mean(y, axis=(0, 1, 2), keepdims=True)
        v = jnp.mean(jnp.square(y), axis=(0, 1, 2), keepdims=True) - m * m
        y = (y - m) * jax.lax.rsqrt(v + BN_EPS) * g + be
        return jnp.maximum(y, 0.0).astype(out_dtype)

    y = stage(x, params["w1"], params["b1"], params["g1"], params["be1"], jnp.bfloat16)
    y = stage(y, params["w2"], params["b2"], params["g2"], params["be2"], jnp.float32)
    return jnp.transpose(y, (0, 3, 1, 2))


# ----------------------------- main -----------------------------

if __name__ == "__main__":
    key = jax.random.PRNGKey(0)
    keys = jax.random.split(key, 9)

    in_channels, out_channels = 8, 4
    N, H, W = 2, 16, 16

    # Deterministic synthetic parameters (shapes follow DownBlock.__init__, weights in HWIO).
    params = {
        "w1": 0.1 * jax.random.normal(keys[0], (3, 3, in_channels, out_channels), jnp.float32),
        "b1": 0.1 * jax.random.normal(keys[1], (out_channels,), jnp.float32),
        "g1": 1.0 + 0.1 * jax.random.normal(keys[2], (out_channels,), jnp.float32),
        "be1": 0.1 * jax.random.normal(keys[3], (out_channels,), jnp.float32),
        "w2": 0.1 * jax.random.normal(keys[4], (3, 3, out_channels, out_channels), jnp.float32),
        "b2": 0.1 * jax.random.normal(keys[5], (out_channels,), jnp.float32),
        "g2": 1.0 + 0.1 * jax.random.normal(keys[6], (out_channels,), jnp.float32),
        "be2": 0.1 * jax.random.normal(keys[7], (out_channels,), jnp.float32),
    }

    x = jax.random.normal(keys[8], (N, in_channels, H, W), jnp.float32)       # NCHW

    out = jax.block_until_ready(jax.jit(downblock_forward)(params, x))
    ref = jax.block_until_ready(jax.jit(_ref_forward)(params, x))

    assert out.shape == (N, out_channels, H, W), out.shape
    max_diff = float(jnp.max(jnp.abs(out - ref)))
    if not bool(jnp.allclose(out, ref, atol=1e-2, rtol=1e-2)):
        raise AssertionError(f"Pallas output mismatch vs reference, max |diff| = {max_diff}")

    print("KERNEL_OK")
</pallas_src>

<mosaic_0001>
module attributes {stable_mosaic.version = 11 : i64} {
  func.func @_conv_pad_stats_kernel(%arg0: i32, %arg1: memref<1x256x8xbf16, #tpu.memory_space<vmem>>, %arg2: memref<9x8x4xbf16, #tpu.memory_space<vmem>>, %arg3: memref<1x4xf32, #tpu.memory_space<vmem>>, %arg4: memref<1x16x16x4xf32, #tpu.memory_space<vmem>>, %arg5: memref<1x1x4xf32, #tpu.memory_space<vmem>>, %arg6: memref<1x1x4xf32, #tpu.memory_space<vmem>>, %arg7: memref<222x4xf32, #tpu.memory_space<vmem>>) attributes {dimension_semantics = [#tpu.dimension_semantics<parallel>], iteration_bounds = array<i64: 2>, scalar_prefetch = 0 : i64, scratch_operands = 1 : i64, tpu.core_type = #tpu.core_type<tc>, window_params = [{transform_indices = @transform_0, window_bounds = array<i64: 1, 256, 8>}, {pipeline_mode = #tpu.pipeline_mode<synchronous>, transform_indices = @transform_1, window_bounds = array<i64: 9, 8, 4>}, {pipeline_mode = #tpu.pipeline_mode<synchronous>, transform_indices = @transform_2, window_bounds = array<i64: 1, 4>}, {transform_indices = @transform_3, window_bounds = array<i64: 1, 16, 16, 4>}, {transform_indices = @transform_4, window_bounds = array<i64: 1, 1, 4>}, {transform_indices = @transform_5, window_bounds = array<i64: 1, 1, 4>}]} {
    %cst = arith.constant 0.000000e+00 : f32
    %0 = vector.broadcast %cst : f32 to vector<222x4xf32>
    %c0 = arith.constant 0 : index
    %c0_0 = arith.constant 0 : index
    %c0_1 = arith.constant 0 : index
    %1 = vector.load %arg1[%c0, %c0_0, %c0_1] : memref<1x256x8xbf16, #tpu.memory_space<vmem>>, vector<1x222x8xbf16>
    %2 = vector.shape_cast %1 : vector<1x222x8xbf16> to vector<222x8xbf16>
    %c0_2 = arith.constant 0 : index
    %c0_3 = arith.constant 0 : index
    %c0_4 = arith.constant 0 : index
    %3 = vector.load %arg2[%c0_2, %c0_3, %c0_4] : memref<9x8x4xbf16, #tpu.memory_space<vmem>>, vector<1x8x4xbf16>
    %4 = vector.shape_cast %3 : vector<1x8x4xbf16> to vector<8x4xbf16>
    %cst_5 = arith.constant dense<0.000000e+00> : vector<222x4xf32>
    %5 = tpu.matmul %2, %4, %cst_5 {dimension_numbers = #tpu.dot_dimension_numbers<[1], [0], [0], [1], [0, 0, 1, 1], [], []>} : vector<222x8xbf16>, vector<8x4xbf16>, vector<222x4xf32> -> vector<222x4xf32>
    %6 = arith.addf %0, %5 : vector<222x4xf32>
    %c0_6 = arith.constant 0 : index
    %c1 = arith.constant 1 : index
    %c0_7 = arith.constant 0 : index
    %7 = vector.load %arg1[%c0_6, %c1, %c0_7] : memref<1x256x8xbf16, #tpu.memory_space<vmem>>, vector<1x222x8xbf16>
    %8 = vector.shape_cast %7 : vector<1x222x8xbf16> to vector<222x8xbf16>
    %c1_8 = arith.constant 1 : index
    %c0_9 = arith.constant 0 : index
    %c0_10 = arith.constant 0 : index
    %9 = vector.load %arg2[%c1_8, %c0_9, %c0_10] : memref<9x8x4xbf16, #tpu.memory_space<vmem>>, vector<1x8x4xbf16>
    %10 = vector.shape_cast %9 : vector<1x8x4xbf16> to vector<8x4xbf16>
    %cst_11 = arith.constant dense<0.000000e+00> : vector<222x4xf32>
    %11 = tpu.matmul %8, %10, %cst_11 {dimension_numbers = #tpu.dot_dimension_numbers<[1], [0], [0], [1], [0, 0, 1, 1], [], []>} : vector<222x8xbf16>, vector<8x4xbf16>, vector<222x4xf32> -> vector<222x4xf32>
    %12 = arith.addf %6, %11 : vector<222x4xf32>
    %c0_12 = arith.constant 0 : index
    %c2 = arith.constant 2 : index
    %c0_13 = arith.constant 0 : index
    %13 = vector.load %arg1[%c0_12, %c2, %c0_13] : memref<1x256x8xbf16, #tpu.memory_space<vmem>>, vector<1x222x8xbf16>
    %14 = vector.shape_cast %13 : vector<1x222x8xbf16> to vector<222x8xbf16>
    %c2_14 = arith.constant 2 : index
    %c0_15 = arith.constant 0 : index
    %c0_16 = arith.constant 0 : index
    %15 = vector.load %arg2[%c2_14, %c0_15, %c0_16] : memref<9x8x4xbf16, #tpu.memory_space<vmem>>, vector<1x8x4xbf16>
    %16 = vector.shape_cast %15 : vector<1x8x4xbf16> to vector<8x4xbf16>
    %cst_17 = arith.constant dense<0.000000e+00> : vector<222x4xf32>
    %17 = tpu.matmul %14, %16, %cst_17 {dimension_numbers = #tpu.dot_dimension_numbers<[1], [0], [0], [1], [0, 0, 1, 1], [], []>} : vector<222x8xbf16>, vector<8x4xbf16>, vector<222x4xf32> -> vector<222x4xf32>
    %18 = arith.addf %12, %17 : vector<222x4xf32>
    %c0_18 = arith.constant 0 : index
    %c16 = arith.constant 16 : index
    %c0_19 = arith.constant 0 : index
    %19 = vector.load %arg1[%c0_18, %c16, %c0_19] : memref<1x256x8xbf16, #tpu.memory_space<vmem>>, vector<1x222x8xbf16>
    %20 = vector.shape_cast %19 : vector<1x222x8xbf16> to vector<222x8xbf16>
    %c3 = arith.constant 3 : index
    %c0_20 = arith.constant 0 : index
    %c0_21 = arith.constant 0 : index
    %21 = vector.load %arg2[%c3, %c0_20, %c0_21] : memref<9x8x4xbf16, #tpu.memory_space<vmem>>, vector<1x8x4xbf16>
    %22 = vector.shape_cast %21 : vector<1x8x4xbf16> to vector<8x4xbf16>
    %cst_22 = arith.constant dense<0.000000e+00> : vector<222x4xf32>
    %23 = tpu.matmul %20, %22, %cst_22 {dimension_numbers = #tpu.dot_dimension_numbers<[1], [0], [0], [1], [0, 0, 1, 1], [], []>} : vector<222x8xbf16>, vector<8x4xbf16>, vector<222x4xf32> -> vector<222x4xf32>
    %24 = arith.addf %18, %23 : vector<222x4xf32>
    %c0_23 = arith.constant 0 : index
    %c17 = arith.constant 17 : index
    %c0_24 = arith.constant 0 : index
    %25 = vector.load %arg1[%c0_23, %c17, %c0_24] : memref<1x256x8xbf16, #tpu.memory_space<vmem>>, vector<1x222x8xbf16>
    %26 = vector.shape_cast %25 : vector<1x222x8xbf16> to vector<222x8xbf16>
    %c4 = arith.constant 4 : index
    %c0_25 = arith.constant 0 : index
    %c0_26 = arith.constant 0 : index
    %27 = vector.load %arg2[%c4, %c0_25, %c0_26] : memref<9x8x4xbf16, #tpu.memory_space<vmem>>, vector<1x8x4xbf16>
    %28 = vector.shape_cast %27 : vector<1x8x4xbf16> to vector<8x4xbf16>
    %cst_27 = arith.constant dense<0.000000e+00> : vector<222x4xf32>
    %29 = tpu.matmul %26, %28, %cst_27 {dimension_numbers = #tpu.dot_dimension_numbers<[1], [0], [0], [1], [0, 0, 1, 1], [], []>} : vector<222x8xbf16>, vector<8x4xbf16>, vector<222x4xf32> -> vector<222x4xf32>
    %30 = arith.addf %24, %29 : vector<222x4xf32>
    %c0_28 = arith.constant 0 : index
    %c18 = arith.constant 18 : index
    %c0_29 = arith.constant 0 : index
    %31 = vector.load %arg1[%c0_28, %c18, %c0_29] : memref<1x256x8xbf16, #tpu.memory_space<vmem>>, vector<1x222x8xbf16>
    %32 = vector.shape_cast %31 : vector<1x222x8xbf16> to vector<222x8xbf16>
    %c5 = arith.constant 5 : index
    %c0_30 = arith.constant 0 : index
    %c0_31 = arith.constant 0 : index
    %33 = vector.load %arg2[%c5, %c0_30, %c0_31] : memref<9x8x4xbf16, #tpu.memory_space<vmem>>, vector<1x8x4xbf16>
    %34 = vector.shape_cast %33 : vector<1x8x4xbf16> to vector<8x4xbf16>
    %cst_32 = arith.constant dense<0.000000e+00> : vector<222x4xf32>
    %35 = tpu.matmul %32, %34, %cst_32 {dimension_numbers = #tpu.dot_dimension_numbers<[1], [0], [0], [1], [0, 0, 1, 1], [], []>} : vector<222x8xbf16>, vector<8x4xbf16>, vector<222x4xf32> -> vector<222x4xf32>
    %36 = arith.addf %30, %35 : vector<222x4xf32>
    %c0_33 = arith.constant 0 : index
    %c32 = arith.constant 32 : index
    %c0_34 = arith.constant 0 : index
    %37 = vector.load %arg1[%c0_33, %c32, %c0_34] : memref<1x256x8xbf16, #tpu.memory_space<vmem>>, vector<1x222x8xbf16>
    %38 = vector.shape_cast %37 : vector<1x222x8xbf16> to vector<222x8xbf16>
    %c6 = arith.constant 6 : index
    %c0_35 = arith.constant 0 : index
    %c0_36 = arith.constant 0 : index
    %39 = vector.load %arg2[%c6, %c0_35, %c0_36] : memref<9x8x4xbf16, #tpu.memory_space<vmem>>, vector<1x8x4xbf16>
    %40 = vector.shape_cast %39 : vector<1x8x4xbf16> to vector<8x4xbf16>
    %cst_37 = arith.constant dense<0.000000e+00> : vector<222x4xf32>
    %41 = tpu.matmul %38, %40, %cst_37 {dimension_numbers = #tpu.dot_dimension_numbers<[1], [0], [0], [1], [0, 0, 1, 1], [], []>} : vector<222x8xbf16>, vector<8x4xbf16>, vector<222x4xf32> -> vector<222x4xf32>
    %42 = arith.addf %36, %41 : vector<222x4xf32>
    %c0_38 = arith.constant 0 : index
    %c33 = arith.constant 33 : index
    %c0_39 = arith.constant 0 : index
    %43 = vector.load %arg1[%c0_38, %c33, %c0_39] : memref<1x256x8xbf16, #tpu.memory_space<vmem>>, vector<1x222x8xbf16>
    %44 = vector.shape_cast %43 : vector<1x222x8xbf16> to vector<222x8xbf16>
    %c7 = arith.constant 7 : index
    %c0_40 = arith.constant 0 : index
    %c0_41 = arith.constant 0 : index
    %45 = vector.load %arg2[%c7, %c0_40, %c0_41] : memref<9x8x4xbf16, #tpu.memory_space<vmem>>, vector<1x8x4xbf16>
    %46 = vector.shape_cast %45 : vector<1x8x4xbf16> to vector<8x4xbf16>
    %cst_42 = arith.constant dense<0.000000e+00> : vector<222x4xf32>
    %47 = tpu.matmul %44, %46, %cst_42 {dimension_numbers = #tpu.dot_dimension_numbers<[1], [0], [0], [1], [0, 0, 1, 1], [], []>} : vector<222x8xbf16>, vector<8x4xbf16>, vector<222x4xf32> -> vector<222x4xf32>
    %48 = arith.addf %42, %47 : vector<222x4xf32>
    %c0_43 = arith.constant 0 : index
    %c34 = arith.constant 34 : index
    %c0_44 = arith.constant 0 : index
    %49 = vector.load %arg1[%c0_43, %c34, %c0_44] : memref<1x256x8xbf16, #tpu.memory_space<vmem>>, vector<1x222x8xbf16>
    %50 = vector.shape_cast %49 : vector<1x222x8xbf16> to vector<222x8xbf16>
    %c8 = arith.constant 8 : index
    %c0_45 = arith.constant 0 : index
    %c0_46 = arith.constant 0 : index
    %51 = vector.load %arg2[%c8, %c0_45, %c0_46] : memref<9x8x4xbf16, #tpu.memory_space<vmem>>, vector<1x8x4xbf16>
    %52 = vector.shape_cast %51 : vector<1x8x4xbf16> to vector<8x4xbf16>
    %cst_47 = arith.constant dense<0.000000e+00> : vector<222x4xf32>
    %53 = tpu.matmul %50, %52, %cst_47 {dimension_numbers = #tpu.dot_dimension_numbers<[1], [0], [0], [1], [0, 0, 1, 1], [], []>} : vector<222x8xbf16>, vector<8x4xbf16>, vector<222x4xf32> -> vector<222x4xf32>
    %54 = arith.addf %48, %53 : vector<222x4xf32>
    %c0_48 = arith.constant 0 : index
    %c0_49 = arith.constant 0 : index
    %55 = vector.load %arg3[%c0_48, %c0_49] : memref<1x4xf32, #tpu.memory_space<vmem>>, vector<1x4xf32>
    %56 = vector.broadcast %55 : vector<1x4xf32> to vector<222x4xf32>
    %57 = arith.addf %54, %56 : vector<222x4xf32>
    %c0_50 = arith.constant 0 : index
    %c0_51 = arith.constant 0 : index
    %58 = vector.load %arg7[%c0_50, %c0_51] : memref<222x4xf32, #tpu.memory_space<vmem>>, vector<222x4xf32>
    tpu.vector_store %arg7[%c0_50, %c0_51], %57 {strides = array<i32>} : memref<222x4xf32, #tpu.memory_space<vmem>>, vector<222x4xf32>,
    %c0_i32 = arith.constant 0 : i32
    %c14_i32 = arith.constant 14 : i32
    %59 = arith.addi %c0_i32, %c14_i32 : i32
    %c1_i32 = arith.constant 1 : i32
    scf.for %arg8 = %c0_i32 to %59 step %c1_i32  : i32 {
      %c16_i32_93 = arith.constant 16 : i32
      %89 = arith.muli %arg8, %c16_i32_93 : i32
      %90 = tpu.assume_multiple %89, 8 : i32
      %91 = arith.index_cast %90 : i32 to index
      %c0_94 = arith.constant 0 : index
      %92 = vector.load %arg7[%91, %c0_94] : memref<222x4xf32, #tpu.memory_space<vmem>>, vector<14x4xf32>
      %c1_i32_95 = arith.constant 1 : i32
      %93 = arith.addi %c1_i32_95, %arg8 : i32
      %c0_96 = arith.constant 0 : index
      %94 = arith.index_cast %93 : i32 to index
      %c1_97 = arith.constant 1 : index
      %c0_98 = arith.constant 0 : index
      %95 = vector.load %arg4[%c0_96, %94, %c1_97, %c0_98] : memref<1x16x16x4xf32, #tpu.memory_space<vmem>>, vector<1x1x14x4xf32>
      %96 = vector.shape_cast %95 : vector<1x1x14x4xf32> to vector<14x4xf32>
      %97 = vector.shape_cast %92 : vector<14x4xf32> to vector<1x1x14x4xf32>
      tpu.vector_store %arg4[%c0_96, %94, %c1_97, %c0_98], %97 {strides = array<i32>} : memref<1x16x16x4xf32, #tpu.memory_space<vmem>>, vector<1x1x14x4xf32>,
    }
    %c14_i32_52 = arith.constant 14 : i32
    %c0_53 = arith.constant 0 : index
    %c2_54 = arith.constant 2 : index
    %c1_55 = arith.constant 1 : index
    %c0_56 = arith.constant 0 : index
    %60 = vector.load %arg4[%c0_53, %c2_54, %c1_55, %c0_56] : memref<1x16x16x4xf32, #tpu.memory_space<vmem>>, vector<1x1x14x4xf32>
    %61 = vector.shape_cast %60 : vector<1x1x14x4xf32> to vector<1x14x4xf32>
    %c0_57 = arith.constant 0 : index
    %c0_58 = arith.constant 0 : index
    %c1_59 = arith.constant 1 : index
    %c0_60 = arith.constant 0 : index
    %62 = vector.load %arg4[%c0_57, %c0_58, %c1_59, %c0_60] : memref<1x16x16x4xf32, #tpu.memory_space<vmem>>, vector<1x1x14x4xf32>
    %63 = vector.shape_cast %62 : vector<1x1x14x4xf32> to vector<1x14x4xf32>
    %64 = vector.shape_cast %61 : vector<1x14x4xf32> to vector<1x1x14x4xf32>
    tpu.vector_store %arg4[%c0_57, %c0_58, %c1_59, %c0_60], %64 {strides = array<i32>} : memref<1x16x16x4xf32, #tpu.memory_space<vmem>>, vector<1x1x14x4xf32>,
    %c0_61 = arith.constant 0 : index
    %c13 = arith.constant 13 : index
    %c1_62 = arith.constant 1 : index
    %c0_63 = arith.constant 0 : index
    %65 = vector.load %arg4[%c0_61, %c13, %c1_62, %c0_63] : memref<1x16x16x4xf32, #tpu.memory_space<vmem>>, vector<1x1x14x4xf32>
    %66 = vector.shape_cast %65 : vector<1x1x14x4xf32> to vector<1x14x4xf32>
    %c0_64 = arith.constant 0 : index
    %c15 = arith.constant 15 : index
    %c1_65 = arith.constant 1 : index
    %c0_66 = arith.constant 0 : index
    %67 = vector.load %arg4[%c0_64, %c15, %c1_65, %c0_66] : memref<1x16x16x4xf32, #tpu.memory_space<vmem>>, vector<1x1x14x4xf32>
    %68 = vector.shape_cast %67 : vector<1x1x14x4xf32> to vector<1x14x4xf32>
    %69 = vector.shape_cast %66 : vector<1x14x4xf32> to vector<1x1x14x4xf32>
    tpu.vector_store %arg4[%c0_64, %c15, %c1_65, %c0_66], %69 {strides = array<i32>} : memref<1x16x16x4xf32, #tpu.memory_space<vmem>>, vector<1x1x14x4xf32>,
    %c0_67 = arith.constant 0 : index
    %c0_68 = arith.constant 0 : index
    %c2_69 = arith.constant 2 : index
    %c0_70 = arith.constant 0 : index
    %70 = vector.load %arg4[%c0_67, %c0_68, %c2_69, %c0_70] : memref<1x16x16x4xf32, #tpu.memory_space<vmem>>, vector<1x16x1x4xf32>
    %71 = vector.shape_cast %70 : vector<1x16x1x4xf32> to vector<16x1x4xf32>
    %c0_71 = arith.constant 0 : index
    %c0_72 = arith.constant 0 : index
    %c0_73 = arith.constant 0 : index
    %c0_74 = arith.constant 0 : index
    %72 = vector.load %arg4[%c0_71, %c0_72, %c0_73, %c0_74] : memref<1x16x16x4xf32, #tpu.memory_space<vmem>>, vector<1x16x1x4xf32>
    %73 = vector.shape_cast %72 : vector<1x16x1x4xf32> to vector<16x1x4xf32>
    %74 = vector.shape_cast %71 : vector<16x1x4xf32> to vector<1x16x1x4xf32>
    tpu.vector_store %arg4[%c0_71, %c0_72, %c0_73, %c0_74], %74 {strides = array<i32>} : memref<1x16x16x4xf32, #tpu.memory_space<vmem>>, vector<1x16x1x4xf32>,
    %c0_75 = arith.constant 0 : index
    %c0_76 = arith.constant 0 : index
    %c13_77 = arith.constant 13 : index
    %c0_78 = arith.constant 0 : index
    %75 = vector.load %arg4[%c0_75, %c0_76, %c13_77, %c0_78] : memref<1x16x16x4xf32, #tpu.memory_space<vmem>>, vector<1x16x1x4xf32>
    %76 = vector.shape_cast %75 : vector<1x16x1x4xf32> to vector<16x1x4xf32>
    %c0_79 = arith.constant 0 : index
    %c0_80 = arith.constant 0 : index
    %c15_81 = arith.constant 15 : index
    %c0_82 = arith.constant 0 : index
    %77 = vector.load %arg4[%c0_79, %c0_80, %c15_81, %c0_82] : memref<1x16x16x4xf32, #tpu.memory_space<vmem>>, vector<1x16x1x4xf32>
    %78 = vector.shape_cast %77 : vector<1x16x1x4xf32> to vector<16x1x4xf32>
    %79 = vector.shape_cast %76 : vector<16x1x4xf32> to vector<1x16x1x4xf32>
    tpu.vector_store %arg4[%c0_79, %c0_80, %c15_81, %c0_82], %79 {strides = array<i32>} : memref<1x16x16x4xf32, #tpu.memory_space<vmem>>, vector<1x16x1x4xf32>,
    %cst_83 = arith.constant 0.000000e+00 : f32
    %80 = vector.broadcast %cst_83 : f32 to vector<1x4xf32>
    %c0_i32_84 = arith.constant 0 : i32
    %c16_i32 = arith.constant 16 : i32
    %81 = arith.addi %c0_i32_84, %c16_i32 : i32
    %c1_i32_85 = arith.constant 1 : i32
    %82:2 = scf.for %arg8 = %c0_i32_84 to %81 step %c1_i32_85 iter_args(%arg9 = %80, %arg10 = %80) -> (vector<1x4xf32>, vector<1x4xf32>)  : i32 {
      %c0_93 = arith.constant 0 : index
      %89 = arith.index_cast %arg8 : i32 to index
      %c0_94 = arith.constant 0 : index
      %c0_95 = arith.constant 0 : index
      %90 = vector.load %arg4[%c0_93, %89, %c0_94, %c0_95] : memref<1x16x16x4xf32, #tpu.memory_space<vmem>>, vector<1x1x16x4xf32>
      %91 = vector.shape_cast %90 : vector<1x1x16x4xf32> to vector<16x4xf32>
      %cst_96 = arith.constant dense<0.000000e+00> : vector<4xf32>
      %92 = vector.multi_reduction <add>, %91, %cst_96 [0] : vector<16x4xf32> to vector<4xf32>
      %93 = vector.shape_cast %92 : vector<4xf32> to vector<1x4xf32>
      %94 = arith.addf %arg9, %93 : vector<1x4xf32>
      %95 = arith.mulf %91, %91 : vector<16x4xf32>
      %cst_97 = arith.constant dense<0.000000e+00> : vector<4xf32>
      %96 = vector.multi_reduction <add>, %95, %cst_97 [0] : vector<16x4xf32> to vector<4xf32>
      %97 = vector.shape_cast %96 : vector<4xf32> to vector<1x4xf32>
      %98 = arith.addf %arg10, %97 : vector<1x4xf32>
      scf.yield %94, %98 : vector<1x4xf32>, vector<1x4xf32>
    }
    %c16_i32_86 = arith.constant 16 : i32
    %c0_87 = arith.constant 0 : index
    %c0_88 = arith.constant 0 : index
    %c0_89 = arith.constant 0 : index
    %83 = vector.load %arg5[%c0_87, %c0_88, %c0_89] : memref<1x1x4xf32, #tpu.memory_space<vmem>>, vector<1x1x4xf32>
    %84 = vector.shape_cast %83 : vector<1x1x4xf32> to vector<1x4xf32>
    %85 = vector.shape_cast %82#0 : vector<1x4xf32> to vector<1x1x4xf32>
    tpu.vector_store %arg5[%c0_87, %c0_88, %c0_89], %85 {strides = array<i32>} : memref<1x1x4xf32, #tpu.memory_space<vmem>>, vector<1x1x4xf32>,
    %c0_90 = arith.constant 0 : index
    %c0_91 = arith.constant 0 : index
    %c0_92 = arith.constant 0 : index
    %86 = vector.load %arg6[%c0_90, %c0_91, %c0_92] : memref<1x1x4xf32, #tpu.memory_space<vmem>>, vector<1x1x4xf32>
    %87 = vector.shape_cast %86 : vector<1x1x4xf32> to vector<1x4xf32>
    %88 = vector.shape_cast %82#1 : vector<1x4xf32> to vector<1x1x4xf32>
    tpu.vector_store %arg6[%c0_90, %c0_91, %c0_92], %88 {strides = array<i32>} : memref<1x1x4xf32, #tpu.memory_space<vmem>>, vector<1x1x4xf32>,
    return
  }
  func.func @transform_0(%arg0: i32) -> (i32, i32, i32) {
    %c0_i32 = arith.constant 0 : i32
    %c0_i32_0 = arith.constant 0 : i32
    %c0_i32_1 = arith.constant 0 : i32
    return %arg0, %c0_i32, %c0_i32_0 : i32, i32, i32
  }
  func.func @transform_1(%arg0: i32) -> (i32, i32, i32) {
    %c0_i32 = arith.constant 0 : i32
    %c0_i32_0 = arith.constant 0 : i32
    %c0_i32_1 = arith.constant 0 : i32
    %c0_i32_2 = arith.constant 0 : i32
    return %c0_i32, %c0_i32_0, %c0_i32_1 : i32, i32, i32
  }
  func.func @transform_2(%arg0: i32) -> (i32, i32) {
    %c0_i32 = arith.constant 0 : i32
    %c0_i32_0 = arith.constant 0 : i32
    %c0_i32_1 = arith.constant 0 : i32
    return %c0_i32, %c0_i32_0 : i32, i32
  }
  func.func @transform_3(%arg0: i32) -> (i32, i32, i32, i32) {
    %c0_i32 = arith.constant 0 : i32
    %c0_i32_0 = arith.constant 0 : i32
    %c0_i32_1 = arith.constant 0 : i32
    %c0_i32_2 = arith.constant 0 : i32
    return %arg0, %c0_i32, %c0_i32_0, %c0_i32_1 : i32, i32, i32, i32
  }
  func.func @transform_4(%arg0: i32) -> (i32, i32, i32) {
    %c0_i32 = arith.constant 0 : i32
    %c0_i32_0 = arith.constant 0 : i32
    %c0_i32_1 = arith.constant 0 : i32
    return %arg0, %c0_i32, %c0_i32_0 : i32, i32, i32
  }
  func.func @transform_5(%arg0: i32) -> (i32, i32, i32) {
    %c0_i32 = arith.constant 0 : i32
    %c0_i32_0 = arith.constant 0 : i32
    %c0_i32_1 = arith.constant 0 : i32
    return %arg0, %c0_i32, %c0_i32_0 : i32, i32, i32
  }
}

module attributes {stable_mosaic.version = 11 : i64} {
  func.func @_bn_relu_kernel(%arg0: i32, %arg1: memref<32x64xf32, #tpu.memory_space<vmem>>, %arg2: memref<1x64xf32, #tpu.memory_space<vmem>>, %arg3: memref<1x64xf32, #tpu.memory_space<vmem>>, %arg4: memref<32x64xbf16, #tpu.memory_space<vmem>>) attributes {dimension_semantics = [#tpu.dimension_semantics<parallel>], iteration_bounds = array<i64: 1>, scalar_prefetch = 0 : i64, scratch_operands = 0 : i64, tpu.core_type = #tpu.core_type<tc>, window_params = [{transform_indices = @transform_0, window_bounds = array<i64: 32, 64>}, {pipeline_mode = #tpu.pipeline_mode<synchronous>, transform_indices = @transform_1, window_bounds = array<i64: 1, 64>}, {pipeline_mode = #tpu.pipeline_mode<synchronous>, transform_indices = @transform_2, window_bounds = array<i64: 1, 64>}, {transform_indices = @transform_3, window_bounds = array<i64: 32, 64>}]} {
    %c0 = arith.constant 0 : index
    %c0_0 = arith.constant 0 : index
    %0 = vector.load %arg1[%c0, %c0_0] : memref<32x64xf32, #tpu.memory_space<vmem>>, vector<32x64xf32>
    %c0_1 = arith.constant 0 : index
    %c0_2 = arith.constant 0 : index
    %1 = vector.load %arg2[%c0_1, %c0_2] : memref<1x64xf32, #tpu.memory_space<vmem>>, vector<1x64xf32>
    %2 = vector.broadcast %1 : vector<1x64xf32> to vector<32x64xf32>
    %3 = arith.mulf %0, %2 : vector<32x64xf32>
    %c0_3 = arith.constant 0 : index
    %c0_4 = arith.constant 0 : index
    %4 = vector.load %arg3[%c0_3, %c0_4] : memref<1x64xf32, #tpu.memory_space<vmem>>, vector<1x64xf32>
    %5 = vector.broadcast %4 : vector<1x64xf32> to vector<32x64xf32>
    %6 = arith.addf %3, %5 : vector<32x64xf32>
    %cst = arith.constant 0.000000e+00 : f32
    %7 = vector.broadcast %cst : f32 to vector<32x64xf32>
    %8 = arith.maximumf %6, %7 : vector<32x64xf32>
    %9 = arith.truncf %8 : vector<32x64xf32> to vector<32x64xbf16>
    %c0_5 = arith.constant 0 : index
    %c0_6 = arith.constant 0 : index
    %10 = vector.load %arg4[%c0_5, %c0_6] : memref<32x64xbf16, #tpu.memory_space<vmem>>, vector<32x64xbf16>
    tpu.vector_store %arg4[%c0_5, %c0_6], %9 {strides = array<i32>} : memref<32x64xbf16, #tpu.memory_space<vmem>>, vector<32x64xbf16>,
    return
  }
  func.func @transform_0(%arg0: i32) -> (i32, i32) {
    %c0_i32 = arith.constant 0 : i32
    %c0_i32_0 = arith.constant 0 : i32
    return %arg0, %c0_i32 : i32, i32
  }
  func.func @transform_1(%arg0: i32) -> (i32, i32) {
    %c0_i32 = arith.constant 0 : i32
    %c0_i32_0 = arith.constant 0 : i32
    %c0_i32_1 = arith.constant 0 : i32
    return %c0_i32, %c0_i32_0 : i32, i32
  }
  func.func @transform_2(%arg0: i32) -> (i32, i32) {
    %c0_i32 = arith.constant 0 : i32
    %c0_i32_0 = arith.constant 0 : i32
    %c0_i32_1 = arith.constant 0 : i32
    return %c0_i32, %c0_i32_0 : i32, i32
  }
  func.func @transform_3(%arg0: i32) -> (i32, i32) {
    %c0_i32 = arith.constant 0 : i32
    %c0_i32_0 = arith.constant 0 : i32
    return %arg0, %c0_i32 : i32, i32
  }
}

module attributes {stable_mosaic.version = 11 : i64} {
  func.func @_conv_pad_stats_kernel(%arg0: i32, %arg1: memref<1x256x4xbf16, #tpu.memory_space<vmem>>, %arg2: memref<9x4x4xbf16, #tpu.memory_space<vmem>>, %arg3: memref<1x4xf32, #tpu.memory_space<vmem>>, %arg4: memref<1x16x16x4xf32, #tpu.memory_space<vmem>>, %arg5: memref<1x1x4xf32, #tpu.memory_space<vmem>>, %arg6: memref<1x1x4xf32, #tpu.memory_space<vmem>>, %arg7: memref<222x4xf32, #tpu.memory_space<vmem>>) attributes {dimension_semantics = [#tpu.dimension_semantics<parallel>], iteration_bounds = array<i64: 2>, scalar_prefetch = 0 : i64, scratch_operands = 1 : i64, tpu.core_type = #tpu.core_type<tc>, window_params = [{transform_indices = @transform_0, window_bounds = array<i64: 1, 256, 4>}, {pipeline_mode = #tpu.pipeline_mode<synchronous>, transform_indices = @transform_1, window_bounds = array<i64: 9, 4, 4>}, {pipeline_mode = #tpu.pipeline_mode<synchronous>, transform_indices = @transform_2, window_bounds = array<i64: 1, 4>}, {transform_indices = @transform_3, window_bounds = array<i64: 1, 16, 16, 4>}, {transform_indices = @transform_4, window_bounds = array<i64: 1, 1, 4>}, {transform_indices = @transform_5, window_bounds = array<i64: 1, 1, 4>}]} {
    %cst = arith.constant 0.000000e+00 : f32
    %0 = vector.broadcast %cst : f32 to vector<222x4xf32>
    %c0 = arith.constant 0 : index
    %c0_0 = arith.constant 0 : index
    %c0_1 = arith.constant 0 : index
    %1 = vector.load %arg1[%c0, %c0_0, %c0_1] : memref<1x256x4xbf16, #tpu.memory_space<vmem>>, vector<1x222x4xbf16>
    %2 = vector.shape_cast %1 : vector<1x222x4xbf16> to vector<222x4xbf16>
    %c0_2 = arith.constant 0 : index
    %c0_3 = arith.constant 0 : index
    %c0_4 = arith.constant 0 : index
    %3 = vector.load %arg2[%c0_2, %c0_3, %c0_4] : memref<9x4x4xbf16, #tpu.memory_space<vmem>>, vector<1x4x4xbf16>
    %4 = vector.shape_cast %3 : vector<1x4x4xbf16> to vector<4x4xbf16>
    %cst_5 = arith.constant dense<0.000000e+00> : vector<222x4xf32>
    %5 = tpu.matmul %2, %4, %cst_5 {dimension_numbers = #tpu.dot_dimension_numbers<[1], [0], [0], [1], [0, 0, 1, 1], [], []>} : vector<222x4xbf16>, vector<4x4xbf16>, vector<222x4xf32> -> vector<222x4xf32>
    %6 = arith.addf %0, %5 : vector<222x4xf32>
    %c0_6 = arith.constant 0 : index
    %c1 = arith.constant 1 : index
    %c0_7 = arith.constant 0 : index
    %7 = vector.load %arg1[%c0_6, %c1, %c0_7] : memref<1x256x4xbf16, #tpu.memory_space<vmem>>, vector<1x222x4xbf16>
    %8 = vector.shape_cast %7 : vector<1x222x4xbf16> to vector<222x4xbf16>
    %c1_8 = arith.constant 1 : index
    %c0_9 = arith.constant 0 : index
    %c0_10 = arith.constant 0 : index
    %9 = vector.load %arg2[%c1_8, %c0_9, %c0_10] : memref<9x4x4xbf16, #tpu.memory_space<vmem>>, vector<1x4x4xbf16>
    %10 = vector.shape_cast %9 : vector<1x4x4xbf16> to vector<4x4xbf16>
    %cst_11 = arith.constant dense<0.000000e+00> : vector<222x4xf32>
    %11 = tpu.matmul %8, %10, %cst_11 {dimension_numbers = #tpu.dot_dimension_numbers<[1], [0], [0], [1], [0, 0, 1, 1], [], []>} : vector<222x4xbf16>, vector<4x4xbf16>, vector<222x4xf32> -> vector<222x4xf32>
    %12 = arith.addf %6, %11 : vector<222x4xf32>
    %c0_12 = arith.constant 0 : index
    %c2 = arith.constant 2 : index
    %c0_13 = arith.constant 0 : index
    %13 = vector.load %arg1[%c0_12, %c2, %c0_13] : memref<1x256x4xbf16, #tpu.memory_space<vmem>>, vector<1x222x4xbf16>
    %14 = vector.shape_cast %13 : vector<1x222x4xbf16> to vector<222x4xbf16>
    %c2_14 = arith.constant 2 : index
    %c0_15 = arith.constant 0 : index
    %c0_16 = arith.constant 0 : index
    %15 = vector.load %arg2[%c2_14, %c0_15, %c0_16] : memref<9x4x4xbf16, #tpu.memory_space<vmem>>, vector<1x4x4xbf16>
    %16 = vector.shape_cast %15 : vector<1x4x4xbf16> to vector<4x4xbf16>
    %cst_17 = arith.constant dense<0.000000e+00> : vector<222x4xf32>
    %17 = tpu.matmul %14, %16, %cst_17 {dimension_numbers = #tpu.dot_dimension_numbers<[1], [0], [0], [1], [0, 0, 1, 1], [], []>} : vector<222x4xbf16>, vector<4x4xbf16>, vector<222x4xf32> -> vector<222x4xf32>
    %18 = arith.addf %12, %17 : vector<222x4xf32>
    %c0_18 = arith.constant 0 : index
    %c16 = arith.constant 16 : index
    %c0_19 = arith.constant 0 : index
    %19 = vector.load %arg1[%c0_18, %c16, %c0_19] : memref<1x256x4xbf16, #tpu.memory_space<vmem>>, vector<1x222x4xbf16>
    %20 = vector.shape_cast %19 : vector<1x222x4xbf16> to vector<222x4xbf16>
    %c3 = arith.constant 3 : index
    %c0_20 = arith.constant 0 : index
    %c0_21 = arith.constant 0 : index
    %21 = vector.load %arg2[%c3, %c0_20, %c0_21] : memref<9x4x4xbf16, #tpu.memory_space<vmem>>, vector<1x4x4xbf16>
    %22 = vector.shape_cast %21 : vector<1x4x4xbf16> to vector<4x4xbf16>
    %cst_22 = arith.constant dense<0.000000e+00> : vector<222x4xf32>
    %23 = tpu.matmul %20, %22, %cst_22 {dimension_numbers = #tpu.dot_dimension_numbers<[1], [0], [0], [1], [0, 0, 1, 1], [], []>} : vector<222x4xbf16>, vector<4x4xbf16>, vector<222x4xf32> -> vector<222x4xf32>
    %24 = arith.addf %18, %23 : vector<222x4xf32>
    %c0_23 = arith.constant 0 : index
    %c17 = arith.constant 17 : index
    %c0_24 = arith.constant 0 : index
    %25 = vector.load %arg1[%c0_23, %c17, %c0_24] : memref<1x256x4xbf16, #tpu.memory_space<vmem>>, vector<1x222x4xbf16>
    %26 = vector.shape_cast %25 : vector<1x222x4xbf16> to vector<222x4xbf16>
    %c4 = arith.constant 4 : index
    %c0_25 = arith.constant 0 : index
    %c0_26 = arith.constant 0 : index
    %27 = vector.load %arg2[%c4, %c0_25, %c0_26] : memref<9x4x4xbf16, #tpu.memory_space<vmem>>, vector<1x4x4xbf16>
    %28 = vector.shape_cast %27 : vector<1x4x4xbf16> to vector<4x4xbf16>
    %cst_27 = arith.constant dense<0.000000e+00> : vector<222x4xf32>
    %29 = tpu.matmul %26, %28, %cst_27 {dimension_numbers = #tpu.dot_dimension_numbers<[1], [0], [0], [1], [0, 0, 1, 1], [], []>} : vector<222x4xbf16>, vector<4x4xbf16>, vector<222x4xf32> -> vector<222x4xf32>
    %30 = arith.addf %24, %29 : vector<222x4xf32>
    %c0_28 = arith.constant 0 : index
    %c18 = arith.constant 18 : index
    %c0_29 = arith.constant 0 : index
    %31 = vector.load %arg1[%c0_28, %c18, %c0_29] : memref<1x256x4xbf16, #tpu.memory_space<vmem>>, vector<1x222x4xbf16>
    %32 = vector.shape_cast %31 : vector<1x222x4xbf16> to vector<222x4xbf16>
    %c5 = arith.constant 5 : index
    %c0_30 = arith.constant 0 : index
    %c0_31 = arith.constant 0 : index
    %33 = vector.load %arg2[%c5, %c0_30, %c0_31] : memref<9x4x4xbf16, #tpu.memory_space<vmem>>, vector<1x4x4xbf16>
    %34 = vector.shape_cast %33 : vector<1x4x4xbf16> to vector<4x4xbf16>
    %cst_32 = arith.constant dense<0.000000e+00> : vector<222x4xf32>
    %35 = tpu.matmul %32, %34, %cst_32 {dimension_numbers = #tpu.dot_dimension_numbers<[1], [0], [0], [1], [0, 0, 1, 1], [], []>} : vector<222x4xbf16>, vector<4x4xbf16>, vector<222x4xf32> -> vector<222x4xf32>
    %36 = arith.addf %30, %35 : vector<222x4xf32>
    %c0_33 = arith.constant 0 : index
    %c32 = arith.constant 32 : index
    %c0_34 = arith.constant 0 : index
    %37 = vector.load %arg1[%c0_33, %c32, %c0_34] : memref<1x256x4xbf16, #tpu.memory_space<vmem>>, vector<1x222x4xbf16>
    %38 = vector.shape_cast %37 : vector<1x222x4xbf16> to vector<222x4xbf16>
    %c6 = arith.constant 6 : index
    %c0_35 = arith.constant 0 : index
    %c0_36 = arith.constant 0 : index
    %39 = vector.load %arg2[%c6, %c0_35, %c0_36] : memref<9x4x4xbf16, #tpu.memory_space<vmem>>, vector<1x4x4xbf16>
    %40 = vector.shape_cast %39 : vector<1x4x4xbf16> to vector<4x4xbf16>
    %cst_37 = arith.constant dense<0.000000e+00> : vector<222x4xf32>
    %41 = tpu.matmul %38, %40, %cst_37 {dimension_numbers = #tpu.dot_dimension_numbers<[1], [0], [0], [1], [0, 0, 1, 1], [], []>} : vector<222x4xbf16>, vector<4x4xbf16>, vector<222x4xf32> -> vector<222x4xf32>
    %42 = arith.addf %36, %41 : vector<222x4xf32>
    %c0_38 = arith.constant 0 : index
    %c33 = arith.constant 33 : index
    %c0_39 = arith.constant 0 : index
    %43 = vector.load %arg1[%c0_38, %c33, %c0_39] : memref<1x256x4xbf16, #tpu.memory_space<vmem>>, vector<1x222x4xbf16>
    %44 = vector.shape_cast %43 : vector<1x222x4xbf16> to vector<222x4xbf16>
    %c7 = arith.constant 7 : index
    %c0_40 = arith.constant 0 : index
    %c0_41 = arith.constant 0 : index
    %45 = vector.load %arg2[%c7, %c0_40, %c0_41] : memref<9x4x4xbf16, #tpu.memory_space<vmem>>, vector<1x4x4xbf16>
    %46 = vector.shape_cast %45 : vector<1x4x4xbf16> to vector<4x4xbf16>
    %cst_42 = arith.constant dense<0.000000e+00> : vector<222x4xf32>
    %47 = tpu.matmul %44, %46, %cst_42 {dimension_numbers = #tpu.dot_dimension_numbers<[1], [0], [0], [1], [0, 0, 1, 1], [], []>} : vector<222x4xbf16>, vector<4x4xbf16>, vector<222x4xf32> -> vector<222x4xf32>
    %48 = arith.addf %42, %47 : vector<222x4xf32>
    %c0_43 = arith.constant 0 : index
    %c34 = arith.constant 34 : index
    %c0_44 = arith.constant 0 : index
    %49 = vector.load %arg1[%c0_43, %c34, %c0_44] : memref<1x256x4xbf16, #tpu.memory_space<vmem>>, vector<1x222x4xbf16>
    %50 = vector.shape_cast %49 : vector<1x222x4xbf16> to vector<222x4xbf16>
    %c8 = arith.constant 8 : index
    %c0_45 = arith.constant 0 : index
    %c0_46 = arith.constant 0 : index
    %51 = vector.load %arg2[%c8, %c0_45, %c0_46] : memref<9x4x4xbf16, #tpu.memory_space<vmem>>, vector<1x4x4xbf16>
    %52 = vector.shape_cast %51 : vector<1x4x4xbf16> to vector<4x4xbf16>
    %cst_47 = arith.constant dense<0.000000e+00> : vector<222x4xf32>
    %53 = tpu.matmul %50, %52, %cst_47 {dimension_numbers = #tpu.dot_dimension_numbers<[1], [0], [0], [1], [0, 0, 1, 1], [], []>} : vector<222x4xbf16>, vector<4x4xbf16>, vector<222x4xf32> -> vector<222x4xf32>
    %54 = arith.addf %48, %53 : vector<222x4xf32>
    %c0_48 = arith.constant 0 : index
    %c0_49 = arith.constant 0 : index
    %55 = vector.load %arg3[%c0_48, %c0_49] : memref<1x4xf32, #tpu.memory_space<vmem>>, vector<1x4xf32>
    %56 = vector.broadcast %55 : vector<1x4xf32> to vector<222x4xf32>
    %57 = arith.addf %54, %56 : vector<222x4xf32>
    %c0_50 = arith.constant 0 : index
    %c0_51 = arith.constant 0 : index
    %58 = vector.load %arg7[%c0_50, %c0_51] : memref<222x4xf32, #tpu.memory_space<vmem>>, vector<222x4xf32>
    tpu.vector_store %arg7[%c0_50, %c0_51], %57 {strides = array<i32>} : memref<222x4xf32, #tpu.memory_space<vmem>>, vector<222x4xf32>,
    %c0_i32 = arith.constant 0 : i32
    %c14_i32 = arith.constant 14 : i32
    %59 = arith.addi %c0_i32, %c14_i32 : i32
    %c1_i32 = arith.constant 1 : i32
    scf.for %arg8 = %c0_i32 to %59 step %c1_i32  : i32 {
      %c16_i32_93 = arith.constant 16 : i32
      %89 = arith.muli %arg8, %c16_i32_93 : i32
      %90 = tpu.assume_multiple %89, 8 : i32
      %91 = arith.index_cast %90 : i32 to index
      %c0_94 = arith.constant 0 : index
      %92 = vector.load %arg7[%91, %c0_94] : memref<222x4xf32, #tpu.memory_space<vmem>>, vector<14x4xf32>
      %c1_i32_95 = arith.constant 1 : i32
      %93 = arith.addi %c1_i32_95, %arg8 : i32
      %c0_96 = arith.constant 0 : index
      %94 = arith.index_cast %93 : i32 to index
      %c1_97 = arith.constant 1 : index
      %c0_98 = arith.constant 0 : index
      %95 = vector.load %arg4[%c0_96, %94, %c1_97, %c0_98] : memref<1x16x16x4xf32, #tpu.memory_space<vmem>>, vector<1x1x14x4xf32>
      %96 = vector.shape_cast %95 : vector<1x1x14x4xf32> to vector<14x4xf32>
      %97 = vector.shape_cast %92 : vector<14x4xf32> to vector<1x1x14x4xf32>
      tpu.vector_store %arg4[%c0_96, %94, %c1_97, %c0_98], %97 {strides = array<i32>} : memref<1x16x16x4xf32, #tpu.memory_space<vmem>>, vector<1x1x14x4xf32>,
    }
    %c14_i32_52 = arith.constant 14 : i32
    %c0_53 = arith.constant 0 : index
    %c2_54 = arith.constant 2 : index
    %c1_55 = arith.constant 1 : index
    %c0_56 = arith.constant 0 : index
    %60 = vector.load %arg4[%c0_53, %c2_54, %c1_55, %c0_56] : memref<1x16x16x4xf32, #tpu.memory_space<vmem>>, vector<1x1x14x4xf32>
    %61 = vector.shape_cast %60 : vector<1x1x14x4xf32> to vector<1x14x4xf32>
    %c0_57 = arith.constant 0 : index
    %c0_58 = arith.constant 0 : index
    %c1_59 = arith.constant 1 : index
    %c0_60 = arith.constant 0 : index
    %62 = vector.load %arg4[%c0_57, %c0_58, %c1_59, %c0_60] : memref<1x16x16x4xf32, #tpu.memory_space<vmem>>, vector<1x1x14x4xf32>
    %63 = vector.shape_cast %62 : vector<1x1x14x4xf32> to vector<1x14x4xf32>
    %64 = vector.shape_cast %61 : vector<1x14x4xf32> to vector<1x1x14x4xf32>
    tpu.vector_store %arg4[%c0_57, %c0_58, %c1_59, %c0_60], %64 {strides = array<i32>} : memref<1x16x16x4xf32, #tpu.memory_space<vmem>>, vector<1x1x14x4xf32>,
    %c0_61 = arith.constant 0 : index
    %c13 = arith.constant 13 : index
    %c1_62 = arith.constant 1 : index
    %c0_63 = arith.constant 0 : index
    %65 = vector.load %arg4[%c0_61, %c13, %c1_62, %c0_63] : memref<1x16x16x4xf32, #tpu.memory_space<vmem>>, vector<1x1x14x4xf32>
    %66 = vector.shape_cast %65 : vector<1x1x14x4xf32> to vector<1x14x4xf32>
    %c0_64 = arith.constant 0 : index
    %c15 = arith.constant 15 : index
    %c1_65 = arith.constant 1 : index
    %c0_66 = arith.constant 0 : index
    %67 = vector.load %arg4[%c0_64, %c15, %c1_65, %c0_66] : memref<1x16x16x4xf32, #tpu.memory_space<vmem>>, vector<1x1x14x4xf32>
    %68 = vector.shape_cast %67 : vector<1x1x14x4xf32> to vector<1x14x4xf32>
    %69 = vector.shape_cast %66 : vector<1x14x4xf32> to vector<1x1x14x4xf32>
    tpu.vector_store %arg4[%c0_64, %c15, %c1_65, %c0_66], %69 {strides = array<i32>} : memref<1x16x16x4xf32, #tpu.memory_space<vmem>>, vector<1x1x14x4xf32>,
    %c0_67 = arith.constant 0 : index
    %c0_68 = arith.constant 0 : index
    %c2_69 = arith.constant 2 : index
    %c0_70 = arith.constant 0 : index
    %70 = vector.load %arg4[%c0_67, %c0_68, %c2_69, %c0_70] : memref<1x16x16x4xf32, #tpu.memory_space<vmem>>, vector<1x16x1x4xf32>
    %71 = vector.shape_cast %70 : vector<1x16x1x4xf32> to vector<16x1x4xf32>
    %c0_71 = arith.constant 0 : index
    %c0_72 = arith.constant 0 : index
    %c0_73 = arith.constant 0 : index
    %c0_74 = arith.constant 0 : index
    %72 = vector.load %arg4[%c0_71, %c0_72, %c0_73, %c0_74] : memref<1x16x16x4xf32, #tpu.memory_space<vmem>>, vector<1x16x1x4xf32>
    %73 = vector.shape_cast %72 : vector<1x16x1x4xf32> to vector<16x1x4xf32>
    %74 = vector.shape_cast %71 : vector<16x1x4xf32> to vector<1x16x1x4xf32>
    tpu.vector_store %arg4[%c0_71, %c0_72, %c0_73, %c0_74], %74 {strides = array<i32>} : memref<1x16x16x4xf32, #tpu.memory_space<vmem>>, vector<1x16x1x4xf32>,
    %c0_75 = arith.constant 0 : index
    %c0_76 = arith.constant 0 : index
    %c13_77 = arith.constant 13 : index
    %c0_78 = arith.constant 0 : index
    %75 = vector.load %arg4[%c0_75, %c0_76, %c13_77, %c0_78] : memref<1x16x16x4xf32, #tpu.memory_space<vmem>>, vector<1x16x1x4xf32>
    %76 = vector.shape_cast %75 : vector<1x16x1x4xf32> to vector<16x1x4xf32>
    %c0_79 = arith.constant 0 : index
    %c0_80 = arith.constant 0 : index
    %c15_81 = arith.constant 15 : index
    %c0_82 = arith.constant 0 : index
    %77 = vector.load %arg4[%c0_79, %c0_80, %c15_81, %c0_82] : memref<1x16x16x4xf32, #tpu.memory_space<vmem>>, vector<1x16x1x4xf32>
    %78 = vector.shape_cast %77 : vector<1x16x1x4xf32> to vector<16x1x4xf32>
    %79 = vector.shape_cast %76 : vector<16x1x4xf32> to vector<1x16x1x4xf32>
    tpu.vector_store %arg4[%c0_79, %c0_80, %c15_81, %c0_82], %79 {strides = array<i32>} : memref<1x16x16x4xf32, #tpu.memory_space<vmem>>, vector<1x16x1x4xf32>,
    %cst_83 = arith.constant 0.000000e+00 : f32
    %80 = vector.broadcast %cst_83 : f32 to vector<1x4xf32>
    %c0_i32_84 = arith.constant 0 : i32
    %c16_i32 = arith.constant 16 : i32
    %81 = arith.addi %c0_i32_84, %c16_i32 : i32
    %c1_i32_85 = arith.constant 1 : i32
    %82:2 = scf.for %arg8 = %c0_i32_84 to %81 step %c1_i32_85 iter_args(%arg9 = %80, %arg10 = %80) -> (vector<1x4xf32>, vector<1x4xf32>)  : i32 {
      %c0_93 = arith.constant 0 : index
      %89 = arith.index_cast %arg8 : i32 to index
      %c0_94 = arith.constant 0 : index
      %c0_95 = arith.constant 0 : index
      %90 = vector.load %arg4[%c0_93, %89, %c0_94, %c0_95] : memref<1x16x16x4xf32, #tpu.memory_space<vmem>>, vector<1x1x16x4xf32>
      %91 = vector.shape_cast %90 : vector<1x1x16x4xf32> to vector<16x4xf32>
      %cst_96 = arith.constant dense<0.000000e+00> : vector<4xf32>
      %92 = vector.multi_reduction <add>, %91, %cst_96 [0] : vector<16x4xf32> to vector<4xf32>
      %93 = vector.shape_cast %92 : vector<4xf32> to vector<1x4xf32>
      %94 = arith.addf %arg9, %93 : vector<1x4xf32>
      %95 = arith.mulf %91, %91 : vector<16x4xf32>
      %cst_97 = arith.constant dense<0.000000e+00> : vector<4xf32>
      %96 = vector.multi_reduction <add>, %95, %cst_97 [0] : vector<16x4xf32> to vector<4xf32>
      %97 = vector.shape_cast %96 : vector<4xf32> to vector<1x4xf32>
      %98 = arith.addf %arg10, %97 : vector<1x4xf32>
      scf.yield %94, %98 : vector<1x4xf32>, vector<1x4xf32>
    }
    %c16_i32_86 = arith.constant 16 : i32
    %c0_87 = arith.constant 0 : index
    %c0_88 = arith.constant 0 : index
    %c0_89 = arith.constant 0 : index
    %83 = vector.load %arg5[%c0_87, %c0_88, %c0_89] : memref<1x1x4xf32, #tpu.memory_space<vmem>>, vector<1x1x4xf32>
    %84 = vector.shape_cast %83 : vector<1x1x4xf32> to vector<1x4xf32>
    %85 = vector.shape_cast %82#0 : vector<1x4xf32> to vector<1x1x4xf32>
    tpu.vector_store %arg5[%c0_87, %c0_88, %c0_89], %85 {strides = array<i32>} : memref<1x1x4xf32, #tpu.memory_space<vmem>>, vector<1x1x4xf32>,
    %c0_90 = arith.constant 0 : index
    %c0_91 = arith.constant 0 : index
    %c0_92 = arith.constant 0 : index
    %86 = vector.load %arg6[%c0_90, %c0_91, %c0_92] : memref<1x1x4xf32, #tpu.memory_space<vmem>>, vector<1x1x4xf32>
    %87 = vector.shape_cast %86 : vector<1x1x4xf32> to vector<1x4xf32>
    %88 = vector.shape_cast %82#1 : vector<1x4xf32> to vector<1x1x4xf32>
    tpu.vector_store %arg6[%c0_90, %c0_91, %c0_92], %88 {strides = array<i32>} : memref<1x1x4xf32, #tpu.memory_space<vmem>>, vector<1x1x4xf32>,
    return
  }
  func.func @transform_0(%arg0: i32) -> (i32, i32, i32) {
    %c0_i32 = arith.constant 0 : i32
    %c0_i32_0 = arith.constant 0 : i32
    %c0_i32_1 = arith.constant 0 : i32
    return %arg0, %c0_i32, %c0_i32_0 : i32, i32, i32
  }
  func.func @transform_1(%arg0: i32) -> (i32, i32, i32) {
    %c0_i32 = arith.constant 0 : i32
    %c0_i32_0 = arith.constant 0 : i32
    %c0_i32_1 = arith.constant 0 : i32
    %c0_i32_2 = arith.constant 0 : i32
    return %c0_i32, %c0_i32_0, %c0_i32_1 : i32, i32, i32
  }
  func.func @transform_2(%arg0: i32) -> (i32, i32) {
    %c0_i32 = arith.constant 0 : i32
    %c0_i32_0 = arith.constant 0 : i32
    %c0_i32_1 = arith.constant 0 : i32
    return %c0_i32, %c0_i32_0 : i32, i32
  }
  func.func @transform_3(%arg0: i32) -> (i32, i32, i32, i32) {
    %c0_i32 = arith.constant 0 : i32
    %c0_i32_0 = arith.constant 0 : i32
    %c0_i32_1 = arith.constant 0 : i32
    %c0_i32_2 = arith.constant 0 : i32
    return %arg0, %c0_i32, %c0_i32_0, %c0_i32_1 : i32, i32, i32, i32
  }
  func.func @transform_4(%arg0: i32) -> (i32, i32, i32) {
    %c0_i32 = arith.constant 0 : i32
    %c0_i32_0 = arith.constant 0 : i32
    %c0_i32_1 = arith.constant 0 : i32
    return %arg0, %c0_i32, %c0_i32_0 : i32, i32, i32
  }
  func.func @transform_5(%arg0: i32) -> (i32, i32, i32) {
    %c0_i32 = arith.constant 0 : i32
    %c0_i32_0 = arith.constant 0 : i32
    %c0_i32_1 = arith.constant 0 : i32
    return %arg0, %c0_i32, %c0_i32_0 : i32, i32, i32
  }
}

module attributes {stable_mosaic.version = 11 : i64} {
  func.func @_bn_relu_kernel(%arg0: i32, %arg1: memref<32x64xf32, #tpu.memory_space<vmem>>, %arg2: memref<1x64xf32, #tpu.memory_space<vmem>>, %arg3: memref<1x64xf32, #tpu.memory_space<vmem>>, %arg4: memref<32x64xf32, #tpu.memory_space<vmem>>) attributes {dimension_semantics = [#tpu.dimension_semantics<parallel>], iteration_bounds = array<i64: 1>, scalar_prefetch = 0 : i64, scratch_operands = 0 : i64, tpu.core_type = #tpu.core_type<tc>, window_params = [{transform_indices = @transform_0, window_bounds = array<i64: 32, 64>}, {pipeline_mode = #tpu.pipeline_mode<synchronous>, transform_indices = @transform_1, window_bounds = array<i64: 1, 64>}, {pipeline_mode = #tpu.pipeline_mode<synchronous>, transform_indices = @transform_2, window_bounds = array<i64: 1, 64>}, {transform_indices = @transform_3, window_bounds = array<i64: 32, 64>}]} {
    %c0 = arith.constant 0 : index
    %c0_0 = arith.constant 0 : index
    %0 = vector.load %arg1[%c0, %c0_0] : memref<32x64xf32, #tpu.memory_space<vmem>>, vector<32x64xf32>
    %c0_1 = arith.constant 0 : index
    %c0_2 = arith.constant 0 : index
    %1 = vector.load %arg2[%c0_1, %c0_2] : memref<1x64xf32, #tpu.memory_space<vmem>>, vector<1x64xf32>
    %2 = vector.broadcast %1 : vector<1x64xf32> to vector<32x64xf32>
    %3 = arith.mulf %0, %2 : vector<32x64xf32>
    %c0_3 = arith.constant 0 : index
    %c0_4 = arith.constant 0 : index
    %4 = vector.load %arg3[%c0_3, %c0_4] : memref<1x64xf32, #tpu.memory_space<vmem>>, vector<1x64xf32>
    %5 = vector.broadcast %4 : vector<1x64xf32> to vector<32x64xf32>
    %6 = arith.addf %3, %5 : vector<32x64xf32>
    %cst = arith.constant 0.000000e+00 : f32
    %7 = vector.broadcast %cst : f32 to vector<32x64xf32>
    %8 = arith.maximumf %6, %7 : vector<32x64xf32>
    %c0_5 = arith.constant 0 : index
    %c0_6 = arith.constant 0 : index
    %9 = vector.load %arg4[%c0_5, %c0_6] : memref<32x64xf32, #tpu.memory_space<vmem>>, vector<32x64xf32>
    tpu.vector_store %arg4[%c0_5, %c0_6], %8 {strides = array<i32>} : memref<32x64xf32, #tpu.memory_space<vmem>>, vector<32x64xf32>,
    return
  }
  func.func @transform_0(%arg0: i32) -> (i32, i32) {
    %c0_i32 = arith.constant 0 : i32
    %c0_i32_0 = arith.constant 0 : i32
    return %arg0, %c0_i32 : i32, i32
  }
  func.func @transform_1(%arg0: i32) -> (i32, i32) {
    %c0_i32 = arith.constant 0 : i32
    %c0_i32_0 = arith.constant 0 : i32
    %c0_i32_1 = arith.constant 0 : i32
    return %c0_i32, %c0_i32_0 : i32, i32
  }
  func.func @transform_2(%arg0: i32) -> (i32, i32) {
    %c0_i32 = arith.constant 0 : i32
    %c0_i32_0 = arith.constant 0 : i32
    %c0_i32_1 = arith.constant 0 : i32
    return %c0_i32, %c0_i32_0 : i32, i32
  }
  func.func @transform_3(%arg0: i32) -> (i32, i32) {
    %c0_i32 = arith.constant 0 : i32
    %c0_i32_0 = arith.constant 0 : i32
    return %arg0, %c0_i32 : i32, i32
  }
}

</mosaic_0001>

<bundles_post_ra>
// kernel: tile.23
= control target key start
LH: loop header
LB: loop body
LE: loop exit
PB: predicated region body
PF: predicated region fallthrough
CT: control target
= control target key end

     0   :  { %s28_s0 = inlined_call_operand.vmem [shape: f32[4], index: 0, kind: input, shape index: {}]   ;;  %s29_s1 = inlined_call_operand.vmem [shape: f32[16,4], index: 1, kind: output, shape index: {}]  }
   0x1   :  { %v4_v0 = vld [vmem:[%s28_s0] ss:$0 sm:$0xff] }
   0x2   :  { %5 = vst [vmem:[%s29_s1] sm:$0xff] %v4_v0  ;;  %8 = vst [vmem:[%s29_s1 + $0x8] sm:$0xff] %v4_v0 }

// kernel: tile.24
= control target key start
LH: loop header
LB: loop body
LE: loop exit
PB: predicated region body
PF: predicated region fallthrough
CT: control target
= control target key end

     0   :  { %s133_s10 = smov 60   ;;  %s134_s11 = smov 52   ;;  %vm3_vm0 = vcmask 31744   ;;  %vm9_vm1 = vcmask 523744   ;;  %vm15_vm2 = vcmask 490944   ;;  %vm21_vm3 = vcmask 458144   ;;  %s209_s0 = inlined_call_operand.vmem [shape: f32[16,4], index: 0, kind: input, shape index: {}]   ;;  %s210_s1 = inlined_call_operand.vmem [shape: f32[1,64], index: 1, kind: output, shape index: {}]  }
   0x1   :  { %v103_v0 = vld [vmem:[%s209_s0 + $0xf] sm:$0x1]   ;;  %v105_v1 = vld [vmem:[%s209_s0 + $0xd] sm:$0x1]   ;;  %v104_v2 = vld [vmem:[%s209_s0 + $0xe] sm:$0x1]  }
   0x2   :  { %7 = vrot.lane.b32.xlu0 %v103_v0, %s133_s10  ;;  %19 = vrot.lane.b32.xlu1 %v105_v1, %s134_s11  ;;  %v106_v3 = vld [vmem:[%s209_s0 + $0xc] sm:$0x1]   ;;  %s135_s16 = smov 56   ;;  %s136_s17 = smov 48   ;;  %v107_v4 = vld [vmem:[%s209_s0 + $0xb] sm:$0x1]  }
   0x3   :  { %v108_v5 = vld [vmem:[%s209_s0 + $0xa] sm:$0x1]   ;;  %v2_v6 = vld [vmem:[%s209_s0] sm:$0x1]   ;;  %s137_s24 = smov 44   ;;  %s138_s25 = smov 40  }
   0x4   :  { %4 = vst.msk [vmem:[#allocation0] sm:$0x1] %vm3_vm0, %v2_v6   ;;  %v109_v7 = vld [vmem:[%s209_s0 + $0x9] sm:$0x1]   ;;  %v110_v8 = vld [vmem:[%s209_s0 + $0x8] sm:$0x1]  }
   0x5   :  { %s139_s30 = smov 36   ;;  %s140_s2 = smov 32   ;;  %v111_v9 = vld [vmem:[%s209_s0 + $0x7] sm:$0x1]   ;;  %v112_v10 = vld [vmem:[%s209_s0 + $0x6] sm:$0x1]  }
   0x6   :  { %13 = vrot.lane.b32.xlu0 %v104_v2, %s135_s16  ;;  %25 = vrot.lane.b32.xlu1 %v106_v3, %s136_s17  ;;  %s141_s7 = smov 28   ;;  %s142_s8 = smov 24   ;;  %v113_v11 = vld [vmem:[%s209_s0 + $0x5] sm:$0x1]   ;;  %v114_v12 = vld [vmem:[%s209_s0 + $0x4] sm:$0x1]  }
   0x7   :  { %s143_s13 = smov 20   ;;  %s144_s14 = smov 16   ;;  %v115_v13 = vld [vmem:[%s209_s0 + $0x3] sm:$0x1]   ;;  %v116_v14 = vld [vmem:[%s209_s0 + $0x2] sm:$0x1]  }
   0x8   :  { %s145_s19 = smov 12   ;;  %s146_s20 = smov 8   ;;  %v117_v15 = vld [vmem:[%s209_s0 + $0x1] sm:$0x1]   ;;  %vm27_vm4 = vcmask 425344   ;;  %vm33_vm5 = vcmask 392544  }
   0x9   :  { %s147_s0 = smov 4   ;;  %vm39_vm6 = vcmask 359744   ;;  %vm45_vm7 = vcmask 326944   ;;  %vm51_vm8 = vcmask 294144   ;;  %vm57_vm9 = vcmask 261344  }
   0xa   :  { %31 = vrot.lane.b32.xlu0 %v107_v4, %s137_s24  ;;  %37 = vrot.lane.b32.xlu1 %v108_v5, %s138_s25  ;;  %vm63_vm10 = vcmask 228544   ;;  %vm69_vm11 = vcmask 195744   ;;  %vm75_vm12 = vcmask 162944   ;;  %vm81_vm13 = vcmask 130144  }
   0xb   :  { %vm87_vm14 = vcmask 97344   ;;  %vm93_vm15 = vcmask 64544  }
   0xe   :  { %43 = vrot.lane.b32.xlu0 %v109_v7, %s139_s30  ;;  %49 = vrot.lane.b32.xlu1 %v110_v8, %s140_s2 }
  0x12   :  { %55 = vrot.lane.b32.xlu0 %v111_v9, %s141_s7  ;;  %61 = vrot.lane.b32.xlu1 %v112_v10, %s142_s8 }
  0x16   :  { %67 = vrot.lane.b32.xlu0 %v113_v11, %s143_s13  ;;  %73 = vrot.lane.b32.xlu1 %v114_v12, %s144_s14 }
  0x1a   :  { %79 = vrot.lane.b32.xlu0 %v115_v13, %s145_s19  ;;  %85 = vrot.lane.b32.xlu1 %v116_v14, %s146_s20 }
  0x1e   :  { %91 = vrot.lane.b32.xlu0 %v117_v15, %s147_s0 }
  0x74   :  { %v8_v16 = vpop.permute.xlu0 %7   ;;  %v20_v17 = vpop.permute.xlu1 %19  }
  0x75   :  { %10 = vst.msk [vmem:[#allocation0] sm:$0x1] %vm9_vm1, %v8_v16  }
  0x78   :  { %v14_v18 = vpop.permute.xlu0 %13   ;;  %v26_v19 = vpop.permute.xlu1 %25  }
  0x79   :  { %16 = vst.msk [vmem:[#allocation0] sm:$0x1] %vm15_vm2, %v14_v18  }
  0x7a   :  { %22 = vst.msk [vmem:[#allocation0] sm:$0x1] %vm21_vm3, %v20_v17  }
  0x7b   :  { %28 = vst.msk [vmem:[#allocation0] sm:$0x1] %vm27_vm4, %v26_v19  }
  0x7c   :  { %v32_v20 = vpop.permute.xlu0 %31   ;;  %v38_v21 = vpop.permute.xlu1 %37  }
  0x7d   :  { %34 = vst.msk [vmem:[#allocation0] sm:$0x1] %vm33_vm5, %v32_v20  }
  0x7e   :  { %40 = vst.msk [vmem:[#allocation0] sm:$0x1] %vm39_vm6, %v38_v21  }
  0x80   :  { %v44_v22 = vpop.permute.xlu0 %43   ;;  %v50_v23 = vpop.permute.xlu1 %49  }
  0x81   :  { %46 = vst.msk [vmem:[#allocation0] sm:$0x1] %vm45_vm7, %v44_v22  }
  0x82   :  { %52 = vst.msk [vmem:[#allocation0] sm:$0x1] %vm51_vm8, %v50_v23  }
  0x84   :  { %v56_v24 = vpop.permute.xlu0 %55   ;;  %v62_v25 = vpop.permute.xlu1 %61  }
  0x85   :  { %58 = vst.msk [vmem:[#allocation0] sm:$0x1] %vm57_vm9, %v56_v24  }
  0x86   :  { %64 = vst.msk [vmem:[#allocation0] sm:$0x1] %vm63_vm10, %v62_v25  }
  0x88   :  { %v68_v26 = vpop.permute.xlu0 %67   ;;  %v74_v27 = vpop.permute.xlu1 %73  }
  0x89   :  { %70 = vst.msk [vmem:[#allocation0] sm:$0x1] %vm69_vm11, %v68_v26  }
  0x8a   :  { %76 = vst.msk [vmem:[#allocation0] sm:$0x1] %vm75_vm12, %v74_v27  }
  0x8c   :  { %v80_v28 = vpop.permute.xlu0 %79   ;;  %v86_v29 = vpop.permute.xlu1 %85  }
  0x8d   :  { %82 = vst.msk [vmem:[#allocation0] sm:$0x1] %vm81_vm13, %v80_v28  }
  0x8e   :  { %88 = vst.msk [vmem:[#allocation0] sm:$0x1] %vm87_vm14, %v86_v29  }
  0x90   :  { %v92_v30 = vpop.permute.xlu0 %91  }
  0x91   :  { %94 = vst.msk [vmem:[#allocation0] sm:$0x1] %vm93_vm15, %v92_v30  }
  0x98   :  { %v99_v31 = vld [vmem:[#allocation0] sm:$0x1] }
  0x99   :  { %102 = vst [vmem:[%s210_s1] sm:$0x1] %v99_v31 }

// kernel: downblock_forward.5
= control target key start
LH: loop header
LB: loop body
LE: loop exit
PB: predicated region body
PF: predicated region fallthrough
CT: control target
= control target key end

     0   :  { %vm60_vm0 = vcmask 519168   ;;  %s129_s0 = inlined_call_operand.vmem [shape: f32[32,64], index: 0, kind: input, shape index: {}]   ;;  %s130_s1 = inlined_call_operand.vmem [shape: f32[1,64], index: 1, kind: input, shape index: {}]   ;;  %s131_s2 = inlined_call_operand.vmem [shape: f32[1,64], index: 2, kind: input, shape index: {}]   ;;  %s132_s3 = inlined_call_operand.vmem [shape: bf16[32,64], index: 3, kind: output, shape index: {}]  }
   0x1   :  { %v14_v0 = vld [vmem:[%s129_s0] sm:$0xff]  ;;  %v15_v4 = vld [vmem:[%s129_s0 + $0x8] sm:$0xff]  ;;  %v16_v5 = vld [vmem:[%s129_s0 + $0x10] sm:$0xff] }
   0x2   :  { %v69_v1 = vld [vmem:[%s130_s1] ss:$0 sm:$0xff]  ;;  %v17_v6 = vld [vmem:[%s129_s0 + $0x18] sm:$0xff] }
   0x3   :  { %v70_v2 = vld [vmem:[%s131_s2] ss:$0 sm:$0xff]  ;;  %v25_v3 = vmul.f32 %v69_v1, %v14_v0  ;;  %v26_v7 = vmul.f32 %v69_v1, %v15_v4  ;;  %v27_v8 = vmul.f32 %v69_v1, %v16_v5  ;;  %v28_v9 = vmul.f32 %v69_v1, %v17_v6 }
   0x5   :  { %v36_v10 = vadd.f32 %v70_v2, %v25_v3  ;;  %v37_v11 = vadd.f32 %v70_v2, %v26_v7  ;;  %v38_v12 = vadd.f32 %v70_v2, %v27_v8  ;;  %v39_v13 = vadd.f32 %v70_v2, %v28_v9 }
   0x7   :  { %v40_v14 = vmax.f32 %v36_v10, 0.0  ;;  %v41_v15 = vmax.f32 %v37_v11, 0.0  ;;  %v42_v16 = vmax.f32 %v38_v12, 0.0  ;;  %v43_v17 = vmax.f32 %v39_v13, 0.0 }
   0x9   :  { %v75_v18 = vpack.c.bf16 %v40_v14, %v40_v14  ;;  %v76_v19 = vpack.c.bf16 %v41_v15, %v41_v15  ;;  %v77_v20 = vpack.c.bf16 %v42_v16, %v42_v16  ;;  %v78_v21 = vpack.c.bf16 %v43_v17, %v43_v17 }
   0xb   :  { %61 = vst.msk [vmem:[%s132_s3] sm:$0xf] %vm60_vm0, %v75_v18  ;;  %62 = vst.msk [vmem:[%s132_s3 + $0x4] sm:$0xf] %vm60_vm0, %v76_v19 }
   0xc   :  { %63 = vst.msk [vmem:[%s132_s3 + $0x8] sm:$0xf] %vm60_vm0, %v77_v20  ;;  %64 = vst.msk [vmem:[%s132_s3 + $0xc] sm:$0xf] %vm60_vm0, %v78_v21 }

// kernel: downblock_forward.7
= control target key start
LH: loop header
LB: loop body
LE: loop exit
PB: predicated region body
PF: predicated region fallthrough
CT: control target
= control target key end

     0   :  { %vm44_vm0 = vcmask 523264   ;;  %s105_s0 = inlined_call_operand.vmem [shape: f32[32,64], index: 0, kind: input, shape index: {}]   ;;  %s106_s1 = inlined_call_operand.vmem [shape: f32[1,64], index: 1, kind: input, shape index: {}]   ;;  %s107_s2 = inlined_call_operand.vmem [shape: f32[1,64], index: 2, kind: input, shape index: {}]   ;;  %s108_s3 = inlined_call_operand.vmem [shape: f32[32,64], index: 3, kind: output, shape index: {}]  }
   0x1   :  { %v14_v0 = vld [vmem:[%s105_s0] sm:$0xff]  ;;  %v15_v4 = vld [vmem:[%s105_s0 + $0x8] sm:$0xff]  ;;  %v16_v5 = vld [vmem:[%s105_s0 + $0x10] sm:$0xff] }
   0x2   :  { %v53_v1 = vld [vmem:[%s106_s1] ss:$0 sm:$0xff]  ;;  %v17_v6 = vld [vmem:[%s105_s0 + $0x18] sm:$0xff] }
   0x3   :  { %v54_v2 = vld [vmem:[%s107_s2] ss:$0 sm:$0xff]  ;;  %v25_v3 = vmul.f32 %v53_v1, %v14_v0  ;;  %v26_v7 = vmul.f32 %v53_v1, %v15_v4  ;;  %v27_v8 = vmul.f32 %v53_v1, %v16_v5  ;;  %v28_v9 = vmul.f32 %v53_v1, %v17_v6 }
   0x5   :  { %v36_v10 = vadd.f32 %v54_v2, %v25_v3  ;;  %v37_v11 = vadd.f32 %v54_v2, %v26_v7  ;;  %v38_v12 = vadd.f32 %v54_v2, %v27_v8  ;;  %v39_v13 = vadd.f32 %v54_v2, %v28_v9 }
   0x7   :  { %v40_v14 = vmax.f32 %v36_v10, 0.0  ;;  %v41_v15 = vmax.f32 %v37_v11, 0.0  ;;  %v42_v16 = vmax.f32 %v38_v12, 0.0  ;;  %v43_v17 = vmax.f32 %v39_v13, 0.0 }
   0x9   :  { %45 = vst.msk [vmem:[%s108_s3] sm:$0xff] %vm44_vm0, %v40_v14  ;;  %46 = vst.msk [vmem:[%s108_s3 + $0x8] sm:$0xff] %vm44_vm0, %v41_v15 }
   0xa   :  { %47 = vst.msk [vmem:[%s108_s3 + $0x10] sm:$0xff] %vm44_vm0, %v42_v16  ;;  %48 = vst.msk [vmem:[%s108_s3 + $0x18] sm:$0xff] %vm44_vm0, %v43_v17 }

// kernel: downblock_forward.4
= control target key start
LH: loop header
LB: loop body
LE: loop exit
PB: predicated region body
PF: predicated region fallthrough
CT: control target
= control target key end

     0   :  { %s3965_s18 = smov 0   ;;  %s5191_s0 = inlined_call_operand.vmem [shape: bf16[2,256,8], index: 0, kind: input, shape index: {}]   ;;  %s5192_s1 = inlined_call_operand.vmem [shape: bf16[9,8,4], index: 1, kind: input, shape index: {}]   ;;  %s5193_s2 = inlined_call_operand.vmem [shape: f32[1,4], index: 2, kind: input, shape index: {}]   ;;  %s5194_s3 = inlined_call_operand.vmem [shape: f32[2,16,16,4], index: 3, kind: output, shape index: {0}]   ;;  %s5195_s4 = inlined_call_operand.vmem [shape: f32[2,1,4], index: 4, kind: output, shape index: {1}]   ;;  %s5196_s5 = inlined_call_operand.vmem [shape: f32[2,1,4], index: 5, kind: output, shape index: {2}]  }
   0x1 LB: > { %s3183_s19 = sadd.s32 4294967295, %s3917_s18   ;;  %p3187_p0 = scmp.ge.s32.totalorder %s3917_s18, 1  ;;  %s3917_s18 = sphi %s3965_s18, %s16_s18  }
   0x2   : > { %p192_p1 = scmp.lt.s32.totalorder %s3917_s18, 3 }
   0x4   : > { %p193_p2 = pnand %p3187_p0, %p192_p1 }
   0x6   : > { %196 = sbr.rel (%p193_p2) target bundleno = 545 (0x221), region = 32 }
   0xb   : > { %v3192_v0 = vld [vmem:[%s5192_s1 + $0x4] sm:$0xf]  ;;  %vm500_vm0 = vcmask 1043456   ;;  %p226_p3 = scmp.lt.s32.totalorder %s3183_s19, 1  ;;  %v3236_v2 = vld [vmem:[%s5192_s1 + $0x8] sm:$0xf] }
   0xc   : > { %3797 = vmatprep.subr.msk.bf16.mxu0 %vm500_vm0, %v3192_v0  ;;  %3798 = vmatprep.subr.msk.bf16.mxu1 %vm500_vm0, %v3192_v0  ;;  %v502_v1 = vsel %vm500_vm0, %v3192_v0, 0  ;;  %v271_v3 = vld [vmem:[%s5192_s1] sm:$0xf]  ;;  %vm345_vm1 = vsmask.f32 7424  ;;  %vm457_vm2 = vcmask 64512  }
   0xd   : > { %3526 = vmatpush3.bf16.msra.mxu0 %v502_v1  ;;  %3796 = vmatpush3.bf16.msra.mxu1 %v502_v1  ;;  %s5264_s19 = smov (!%p226_p3, %s3183_s19), 1  ;;  %v906_v8 = vsel %vm500_vm0, %v3236_v2, 0  ;;  %v682_v16 = vsel %vm500_vm0, %v271_v3, 0  ;;  %v4052_v33 = vld [vmem:[%s5192_s1 + $0x10] sm:$0xf]  ;;  %vm835_vm3 = vcmask 1046528  }
   0xe   : > { %3800 = vmatprep.subr.msk.bf16.mxu0 %vm500_vm0, %v3236_v2  ;;  %3799 = vmatprep.subr.msk.bf16.mxu1 %vm500_vm0, %v271_v3  ;;  %s3388_s26 = sshll.u32 %s5264_s19, 7  ;;  %s3389_s27 = sshll.u32 %s5264_s19, 8  ;;  %v4072_v45 = vld [vmem:[%s5192_s1 + $0xc] sm:$0xf]  ;;  %vm2898_vm4 = vcmask 31744   ;;  %vm2926_vm5 = vcmask 29696  }
   0xf   : > { %s3994_s30 = scalar_lea.vmem %s5191_s0, %s3388_s26  ;;  %s3999_s8 = scalar_lea.vmem %s5194_s3, %s3389_s27 }
  0x10   : > { %s238_s11 = scalar_lea.vmem %s5195_s4, %s5264_s19  ;;  %s241_s14 = scalar_lea.vmem %s5196_s5, %s5264_s19  ;;  %v243_v4 = vld [vmem:[%s3994_s30] sm:$0xf]  ;;  %v4011_v5 = vld [vmem:[%s3994_s30 + $0x4] sm:$0xf]  ;;  %v4017_v7 = vld [vmem:[%s3994_s30 + $0x8] sm:$0xff]  }
  0x11   : > { %v4014_v6 = vcombine.low %v243_v4, %v4011_v5  ;;  %v354_v11 = vshll.u32 %v4017_v7, 16  ;;  %v358_v12 = vshrl.u32 %v4017_v7, 16  ;;  %v4025_v13 = vld [vmem:[%s3994_s30 + $0x40] sm:$0xff]   ;;  %v4028_v14 = vld [vmem:[%s3994_s30 + $0x48] sm:$0xff]   ;;  %v4031_v15 = vld [vmem:[%s3994_s30 + $0x10] sm:$0xff]   ;;  %s3919_s6 = smov 0  }
  0x12   : > { %v410_v19 = vshll.u32 %v4025_v13, 16  ;;  %v414_v20 = vshrl.u32 %v4025_v13, 16  ;;  %v418_v21 = vshll.u32 %v4028_v14, 16  ;;  %v422_v22 = vshrl.u32 %v4028_v14, 16  ;;  %v4040_v24 = vld [vmem:[%s3994_s30 + $0x50] sm:$0xff]   ;;  %v4045_v28 = vld [vmem:[%s3994_s30 + $0x18] sm:$0xff]  }
  0x13   : > { %v347_v9 = vshrl.u32 %v4014_v6, 16  ;;  %v349_v10 = vshll.u32 %v4014_v6, 16  ;;  %v356_v18 = vrot.slane %v354_v11, 1  ;;  %v362_v23 = vshll.u32 %v4031_v15, 16  ;;  %v4058_v37 = vld [vmem:[%s3994_s30 + $0x58] sm:$0xff]   ;;  %v4062_v39 = vld [vmem:[%s3994_s30 + $0x20] sm:$0xff]  }
  0x14   : > { %v4042_v27 = vrot.slane %v410_v19, 1  ;;  %v420_v29 = vrot.slane %v418_v21, 1  ;;  %v426_v31 = vshll.u32 %v4040_v24, 16  ;;  %v366_v32 = vshrl.u32 %v4031_v15, 16  ;;  %v4067_v44 = vld [vmem:[%s3994_s30 + $0x60] sm:$0xff]   ;;  %v4079_v50 = vld [vmem:[%s3994_s30 + $0x28] sm:$0xff]  }
  0x15   : > { %v351_v17 = vrot.slane %v349_v10, 1  ;;  %v360_v26 = vor.u32 %v358_v12, %v356_v18  ;;  %v364_v30 = vrot.slane %v362_v23, 1  ;;  %v370_v36 = vshll.u32 %v4045_v28, 16  ;;  %v4089_v59 = vld [vmem:[%s3994_s30 + $0x68] sm:$0xf]  ;;  %v4113_v19 = vld [vmem:[%s3994_s30 + $0x38] sm:$0xff]  }
  0x16   : > { %v416_v35 = vor.u32 %v414_v20, %v4042_v27  ;;  %v430_v38 = vshrl.u32 %v4040_v24, 16  ;;  %v424_v40 = vor.u32 %v422_v22, %v420_v29  ;;  %v428_v42 = vrot.slane %v426_v31, 1  ;;  %v272_v63 = vld [vmem:[%s3994_s30 + $0x6c] sm:$0xf]  ;;  %v829_v31 = vld [vmem:[%s3994_s30] sm:$0xe] }
  0x17   : > { %v352_v25 = vor.u32 %v351_v17, %v347_v9  ;;  %v365_v41 = vsel %vm345_vm1, %v360_v26, %v364_v30  ;;  %v368_v43 = vor.u32 %v366_v32, %v364_v30  ;;  %v372_v47 = vrot.slane %v370_v36, 1 }
  0x18   : > { %v421_v46 = vsel %vm345_vm1, %v416_v35, %v420_v29  ;;  %v434_v48 = vshll.u32 %v4058_v37, 16  ;;  %v374_v49 = vshrl.u32 %v4045_v28, 16  ;;  %v429_v51 = vsel %vm345_vm1, %v424_v40, %v428_v42 }
  0x19   : > { %v357_v34 = vsel %vm345_vm1, %v352_v25, %v356_v18  ;;  %3543 = vmatprep.mubr.msk.bf16.mxu1 %vm457_vm2, %v421_v46  ;;  %v432_v52 = vor.u32 %v430_v38, %v428_v42  ;;  %v378_v53 = vshll.u32 %v4062_v39, 16  ;;  %v438_v54 = vshrl.u32 %v4058_v37, 16 }
  0x1a   : > { %3527 = vmatprep.mubr.msk.bf16.mxu0 %vm457_vm2, %v357_v34  ;;  %3544 = vmatmul.mubr.msk.bf16.vlgmr.msra.gmra.mxu1 %vm457_vm2, %v429_v51  ;;  %v373_v55 = vsel %vm345_vm1, %v368_v43, %v372_v47  ;;  %v436_v56 = vrot.slane %v434_v48, 1  ;;  %v376_v57 = vor.u32 %v374_v49, %v372_v47  ;;  %v442_v58 = vshll.u32 %v4067_v44, 16 }
  0x1b   : > { %3528 = vmatmul.mubr.msk.bf16.vlgmr.msra.gmra.mxu0 %vm457_vm2, %v365_v41  ;;  %3556 = vmatpush3.bf16.msra.mxu1 %v682_v16  ;;  %v380_v60 = vrot.slane %v378_v53, 1  ;;  %v382_v61 = vshrl.u32 %v4062_v39, 16  ;;  %v386_v62 = vshll.u32 %v4079_v50, 16  ;;  %v446_v0 = vshrl.u32 %v4067_v44, 16 }
  0x1c   : > { %3586 = vmatpush3.bf16.msra.mxu0 %v906_v8  ;;  %3531 = vmatprep.mubr.msk.bf16.mxu0 %vm457_vm2, %v373_v55  ;;  %v437_v1 = vsel %vm345_vm1, %v432_v52, %v436_v56  ;;  %v440_v2 = vor.u32 %v438_v54, %v436_v56  ;;  %v444_v3 = vrot.slane %v442_v58, 1  ;;  %v4100_v4 = vcombine.low %v4089_v59, %v272_v63  ;;  %v4103_v8 = vld [vmem:[%s3994_s30 + $0x30] sm:$0xff]  }
  0x1d   : > { %3802 = vmatprep.subr.msk.bf16.mxu0 %vm500_vm0, %v4052_v33  ;;  %3801 = vmatprep.subr.msk.bf16.mxu1 %vm500_vm0, %v4072_v45  ;;  %v381_v9 = vsel %vm345_vm1, %v376_v57, %v380_v60  ;;  %v384_v10 = vor.u32 %v382_v61, %v380_v60  ;;  %v388_v11 = vrot.slane %v386_v62, 1  ;;  %v390_v12 = vshrl.u32 %v4079_v50, 16  ;;  %v4147_v52 = vld [vmem:[%s5192_s1 + $0x14] sm:$0xf] }
  0x1e   : > { %3547 = vmatprep.mubr.msk.bf16.mxu1 %vm457_vm2, %v437_v1  ;;  %v448_v16 = vor.u32 %v446_v0, %v444_v3  ;;  %v450_v17 = vshll.u32 %v4100_v4, 16  ;;  %v394_v18 = vshll.u32 %v4103_v8, 16  ;;  %v445_v20 = vsel %vm345_vm1, %v440_v2, %v444_v3  ;;  %v1081_v0 = vld [vmem:[%s3994_s30 + $0x8] sm:$0xf]  ;;  %v4208_v1 = vld [vmem:[%s3994_s30 + $0xc] sm:$0xf] }
  0x1f   : > { %v389_v21 = vsel %vm345_vm1, %v384_v10, %v388_v11  ;;  %v398_v22 = vshrl.u32 %v4103_v8, 16  ;;  %v402_v26 = vshll.u32 %v4113_v19, 16  ;;  %v392_v29 = vor.u32 %v390_v12, %v388_v11  ;;  %v4222_v10 = vld [vmem:[%s3994_s30 + $0x10] sm:$0xff]  }
  0x20   : > { %v452_v23 = vrot.slane %v450_v17, 1  ;;  %v396_v25 = vrot.slane %v394_v18, 1  ;;  %v454_v30 = vshrl.u32 %v4100_v4, 16  ;;  %v406_v38 = vshrl.u32 %v4113_v19, 16 }
  0x21   : > { %v404_v35 = vrot.slane %v402_v26, 1  ;;  %v3237_v42 = vcombine.low %v829_v31, %v4011_v5  ;;  %v837_v47 = vrot.slane %v4017_v7, 1  ;;  %v1224_v5 = vsel %vm500_vm0, %v4072_v45, 0 }
  0x22   : > { %3548 = vmatmul.mubr.msk.bf16.gmra.mxu1 %vm457_vm2, %v445_v20  ;;  %v453_v32 = vsel %vm345_vm1, %v448_v16, %v452_v23  ;;  %v400_v34 = vor.u32 %v398_v22, %v396_v25  ;;  %v397_v36 = vsel %vm345_vm1, %v392_v29, %v396_v25  ;;  %v456_v40 = vor.u32 %v454_v30, %v452_v23  ;;  %v4247_v30 = vld [vmem:[%s3994_s30 + $0x28] sm:$0xff]  }
  0x23   : > { %3532 = vmatmul.mubr.msk.bf16.gmra.mxu0 %vm457_vm2, %v381_v9  ;;  %3551 = vmatprep.mubr.msk.bf16.mxu1 %vm457_vm2, %v453_v32  ;;  %v408_v43 = vor.u32 %v406_v38, %v404_v35  ;;  %v836_v46 = vrot.slane %v3237_v42, 1  ;;  %v839_v51 = vrot.slane %v4031_v15, 1  ;;  %v1546_v45 = vsel %vm500_vm0, %v4052_v33, 0  ;;  %v4253_v32 = vld [vmem:[%s5192_s1 + $0x1c] sm:$0xf] }
  0x24   : > { %3535 = vmatprep.mubr.msk.bf16.mxu0 %vm457_vm2, %v389_v21  ;;  %v405_v41 = vsel %vm345_vm1, %v400_v34, %v404_v35  ;;  %v845_v54 = vrot.slane %v4079_v50, 1  ;;  %v847_v56 = vrot.slane %v4103_v8, 1  ;;  %v851_v58 = vrot.slane %v4025_v13, 1 }
  0x25   : > { %v413_v48 = vsel %vm345_vm1, %v408_v43, %v4042_v27  ;;  %v838_v49 = vsel %vm835_vm3, %v836_v46, %v837_v47  ;;  %v840_v27 = vsel %vm835_vm3, %v837_v47, %v839_v51  ;;  %v855_v62 = vrot.slane %v4040_v24, 1 }
  0x26   : > { %v857_v63 = vrot.slane %v4058_v37, 1  ;;  %v3253_v3 = vcombine.low %v1081_v0, %v4208_v1  ;;  %v1415_v21 = vshrl.u32 %v4222_v10, 16  ;;  %v1797_v26 = vsel %vm500_vm0, %v4147_v52, 0 }
  0x27   : > { %v1432_v38 = vshll.u32 %v4247_v30, 16  ;;  %v1436_v46 = vshrl.u32 %v4247_v30, 16 }
  0x28   : > { %v858_v2 = vsel %vm835_vm3, %v855_v62, %v857_v63  ;;  %v1407_v9 = vshll.u32 %v3253_v3, 16  ;;  %v1405_v17 = vshrl.u32 %v3253_v3, 16 }
  0x2a   : > { %3552 = vmatmul.mubr.msk.bf16.gmra.mxu1 %vm457_vm2, %v456_v40  ;;  %v1409_v18 = vrot.slane %v1407_v9, 1 }
  0x2b   : > { %3536 = vmatmul.mubr.msk.bf16.gmra.mxu0 %vm457_vm2, %v397_v36  ;;  %3557 = vmatprep.mubr.msk.bf16.mxu1 %vm457_vm2, %v4014_v6  ;;  %v841_v6 = vrot.slane %v4045_v28, 1  ;;  %v4260_v36 = vld [vmem:[%s3994_s30 + $0x30] sm:$0xff]  }
  0x2c   : > { %3539 = vmatprep.mubr.msk.bf16.mxu0 %vm457_vm2, %v405_v41  ;;  %v1439_v47 = vshll.u32 %v4260_v36, 16 }
  0x2d   : > { %v842_v53 = vsel %vm835_vm3, %v839_v51, %v841_v6 }
  0x32   : > { %3558 = vmatmul.mubr.msk.bf16.vlgmr.msra.gmra.mxu1 %vm457_vm2, %v4017_v7  ;;  %v4163_v7 = vld [vmem:[%s5192_s1 + $0x18] sm:$0xf] }
  0x33   : > { %3540 = vmatmul.mubr.msk.bf16.gmra.mxu0 %vm457_vm2, %v413_v48  ;;  %3616 = vmatpush3.bf16.msra.mxu1 %v1224_v5  ;;  %v2115_v42 = vsel %vm500_vm0, %v4163_v7, 0  ;;  %v4275_v48 = vld [vmem:[%s5192_s1 + $0x20] sm:$0xf]  ;;  %v4279_v5 = vld [vmem:[%s3994_s30 + $0x38] sm:$0xff]  }
  0x34   : > { %3587 = vmatprep.mubr.msk.bf16.mxu0 %vm457_vm2, %v838_v49  ;;  %3561 = vmatprep.mubr.msk.bf16.mxu1 %vm457_vm2, %v4031_v15  ;;  %v843_v15 = vrot.slane %v4062_v39, 1  ;;  %v1434_v49 = vrot.slane %v1432_v38, 1 }
  0x35   : > { %3803 = vmatprep.subr.msk.bf16.mxu1 %vm500_vm0, %v4147_v52 }
  0x36   : > { %v844_v33 = vsel %vm835_vm3, %v841_v6, %v843_v15  ;;  %v846_v55 = vsel %vm835_vm3, %v843_v15, %v845_v54  ;;  %v1438_v52 = vor.u32 %v1436_v46, %v1434_v49  ;;  %v1441_v6 = vrot.slane %v1439_v47, 1 }
  0x38   : > { %v1442_v15 = vsel %vm345_vm1, %v1438_v52, %v1441_v6  ;;  %v1728_v52 = vrot.slane %v4222_v10, 1 }
  0x3a   : > { %3562 = vmatmul.mubr.msk.bf16.gmra.mxu1 %vm457_vm2, %v4045_v28  ;;  %v849_v28 = vrot.slane %v4113_v19, 1 }
  0x3b   : > { %3588 = vmatmul.mubr.msk.bf16.vlgmr.msra.gmra.mxu0 %vm457_vm2, %v840_v27  ;;  %3565 = vmatprep.mubr.msk.bf16.mxu1 %vm457_vm2, %v4062_v39  ;;  %v848_v39 = vsel %vm835_vm3, %v845_v54, %v847_v56  ;;  %v4289_v27 = vld [vmem:[%s3994_s30 + $0x40] sm:$0xff]   ;;  %v1450_v54 = vshrl.u32 %v4279_v5, 16 }
  0x3c   : > { %3646 = vmatpush3.bf16.msra.mxu0 %v1546_v45  ;;  %3591 = vmatprep.mubr.msk.bf16.mxu0 %vm457_vm2, %v842_v53  ;;  %v850_v57 = vsel %vm835_vm3, %v847_v56, %v849_v28  ;;  %v852_v60 = vsel %vm835_vm3, %v849_v28, %v851_v58  ;;  %v1446_v45 = vshll.u32 %v4279_v5, 16  ;;  %v4299_v56 = vld [vmem:[%s3994_s30 + $0x48] sm:$0xff]  }
  0x3d   : > { %3804 = vmatprep.subr.msk.bf16.mxu0 %vm500_vm0, %v4163_v7  ;;  %v1443_v7 = vshrl.u32 %v4260_v36, 16 }
  0x3f   : > { %v1445_v28 = vor.u32 %v1443_v7, %v1441_v6 }
  0x42   : > { %3566 = vmatmul.mubr.msk.bf16.gmra.mxu1 %vm457_vm2, %v4079_v50  ;;  %v853_v50 = vrot.slane %v4028_v14, 1 }
  0x43   : > { %3592 = vmatmul.mubr.msk.bf16.gmra.mxu0 %vm457_vm2, %v844_v33  ;;  %3569 = vmatprep.mubr.msk.bf16.mxu1 %vm457_vm2, %v4103_v8  ;;  %v861_v8 = vrot.slane %v4100_v4, 1  ;;  %v4230_v4 = vld [vmem:[%s3994_s30 + $0x18] sm:$0xff]   ;;  %v1453_v33 = vshll.u32 %v4289_v27, 16 }
  0x44   : > { %3595 = vmatprep.mubr.msk.bf16.mxu0 %vm457_vm2, %v846_v55  ;;  %v854_v61 = vsel %vm835_vm3, %v851_v58, %v853_v50  ;;  %v1418_v20 = vshll.u32 %v4230_v4, 16  ;;  %v1422_v23 = vshrl.u32 %v4230_v4, 16  ;;  %v1448_v55 = vrot.slane %v1446_v45, 1  ;;  %v4307_v58 = vld [vmem:[%s3994_s30 + $0x50] sm:$0xff]  }
  0x46   : > { %v1420_v29 = vrot.slane %v1418_v20, 1 }
  0x48   : > { %v1424_v34 = vor.u32 %v1422_v23, %v1420_v29 }
  0x4a   : > { %3570 = vmatmul.mubr.msk.bf16.gmra.mxu1 %vm457_vm2, %v4113_v19 }
  0x4b   : > { %3596 = vmatmul.mubr.msk.bf16.gmra.mxu0 %vm457_vm2, %v848_v39  ;;  %3573 = vmatprep.mubr.msk.bf16.mxu1 %vm457_vm2, %v4025_v13  ;;  %v856_v13 = vsel %vm835_vm3, %v853_v50, %v855_v62  ;;  %v1452_v39 = vor.u32 %v1450_v54, %v1448_v55  ;;  %v1460_v50 = vshll.u32 %v4299_v56, 16  ;;  %v4371_v54 = vld [vmem:[%s3994_s30 + $0x14] sm:$0xf] }
  0x4c   : > { %3599 = vmatprep.mubr.msk.bf16.mxu0 %vm457_vm2, %v850_v57  ;;  %v1455_v57 = vrot.slane %v1453_v33, 1 }
  0x4d   : > { %v1462_v0 = vrot.slane %v1460_v50, 1 }
  0x4e   : > { %v1456_v62 = vsel %vm345_vm1, %v1452_v39, %v1455_v57 }
  0x52   : > { %3574 = vmatmul.mubr.msk.bf16.gmra.mxu1 %vm457_vm2, %v4028_v14  ;;  %v859_v14 = vrot.slane %v4067_v44, 1 }
  0x53   : > { %3600 = vmatmul.mubr.msk.bf16.gmra.mxu0 %vm457_vm2, %v852_v60  ;;  %3577 = vmatprep.mubr.msk.bf16.mxu1 %vm457_vm2, %v4040_v24  ;;  %v270_v24 = vld [vmem:[%s3994_s30 + $0x6c] sm:$0x7]  ;;  %v1449_v60 = vsel %vm345_vm1, %v1445_v28, %v1448_v55 }
  0x54   : > { %3603 = vmatprep.mubr.msk.bf16.mxu0 %vm457_vm2, %v854_v61  ;;  %v3221_v11 = vcombine.low %v4089_v59, %v270_v24  ;;  %v860_v12 = vsel %vm835_vm3, %v857_v63, %v859_v14  ;;  %v862_v16 = vsel %vm835_vm3, %v859_v14, %v861_v8  ;;  %v4236_v59 = vld [vmem:[%s3994_s30 + $0x20] sm:$0xff]   ;;  %v1457_v61 = vshrl.u32 %v4289_v27, 16 }
  0x55   : > { %v1425_v25 = vshll.u32 %v4236_v59, 16  ;;  %v1429_v41 = vshrl.u32 %v4236_v59, 16  ;;  %v1464_v63 = vshrl.u32 %v4299_v56, 16  ;;  %v1732_v55 = vrot.slane %v4236_v59, 1 }
  0x57   : > { %v1427_v35 = vrot.slane %v1425_v25, 1  ;;  %v1466_v14 = vor.u32 %v1464_v63, %v1462_v0 }
  0x59   : > { %v1428_v43 = vsel %vm345_vm1, %v1424_v34, %v1427_v35  ;;  %v1431_v51 = vor.u32 %v1429_v41, %v1427_v35  ;;  %v1721_v34 = vld [vmem:[%s3994_s30 + $0x8] sm:$0xe] }
  0x5a   : > { %3578 = vmatmul.mubr.msk.bf16.gmra.mxu1 %vm457_vm2, %v4058_v37  ;;  %v1411_v37 = vshll.u32 %v4222_v10, 16 }
  0x5b   : > { %3604 = vmatmul.mubr.msk.bf16.gmra.mxu0 %vm457_vm2, %v856_v13  ;;  %3581 = vmatprep.mubr.msk.bf16.mxu1 %vm457_vm2, %v4067_v44  ;;  %v1410_v44 = vor.u32 %v1409_v18, %v1405_v17  ;;  %v1435_v53 = vsel %vm345_vm1, %v1431_v51, %v1434_v49  ;;  %v1467_v13 = vshll.u32 %v4307_v58, 16  ;;  %v1108_v49 = vld [vmem:[%s3994_s30 + $0x74] sm:$0x7] }
  0x5c   : > { %3607 = vmatprep.mubr.msk.bf16.mxu0 %vm457_vm2, %v858_v2  ;;  %v1413_v19 = vrot.slane %v1411_v37, 1  ;;  %v4317_v2 = vld [vmem:[%s3994_s30 + $0x58] sm:$0xff]   ;;  %v1399_v37 = vld [vmem:[%s3994_s30 + $0x74] sm:$0xf] }
  0x5d   : > { %v1469_v24 = vrot.slane %v1467_v13, 1  ;;  %v1474_v9 = vshll.u32 %v4317_v2, 16  ;;  %v1478_v17 = vshrl.u32 %v4317_v2, 16  ;;  %v4412_v13 = vld [vmem:[%s3994_s30 + $0x30] sm:$0xff]  }
  0x5e   : > { %v1414_v22 = vsel %vm345_vm1, %v1410_v44, %v1413_v19  ;;  %v1417_v31 = vor.u32 %v1415_v21, %v1413_v19  ;;  %v4336_v19 = vld [vmem:[%s3994_s30 + $0x68] sm:$0xff]   ;;  %v1107_v21 = vld [vmem:[%s3994_s30 + $0x70] sm:$0xf] }
  0x5f   : > { %v1476_v44 = vrot.slane %v1474_v9, 1  ;;  %v4342_v25 = vcombine.low %v1107_v21, %v1399_v37  ;;  %v1492_v38 = vshrl.u32 %v4336_v19, 16 }
  0x60   : > { %v1421_v40 = vsel %vm345_vm1, %v1417_v31, %v1420_v29 }
  0x61   : > { %v1500_v7 = vshrl.u32 %v4342_v25, 16  ;;  %v1752_v37 = vrot.slane %v4342_v25, 1 }
  0x62   : > { %3582 = vmatmul.mubr.msk.bf16.gmra.mxu1 %vm457_vm2, %v3221_v11 }
  0x63   : > { %3608 = vmatmul.mubr.msk.bf16.gmra.mxu0 %vm457_vm2, %v860_v12  ;;  %3617 = vmatprep.mubr.msk.bf16.mxu1 %vm457_vm2, %v3253_v3  ;;  %v1459_v3 = vor.u32 %v1457_v61, %v1455_v57  ;;  %v1471_v12 = vshrl.u32 %v4307_v58, 16  ;;  %v2437_v57 = vsel %vm500_vm0, %v4253_v32, 0  ;;  %v4394_v61 = vld [vmem:[%s3994_s30 + $0x20] sm:$0xff]  }
  0x64   : > { %3611 = vmatprep.mubr.msk.bf16.mxu0 %vm457_vm2, %v862_v16  ;;  %v1470_v16 = vsel %vm345_vm1, %v1466_v14, %v1469_v24  ;;  %v1744_v14 = vrot.slane %v4307_v58, 1 }
  0x65   : > { %v1463_v11 = vsel %vm345_vm1, %v1459_v3, %v1462_v0  ;;  %v1473_v20 = vor.u32 %v1471_v12, %v1469_v24  ;;  %v4428_v24 = vld [vmem:[%s3994_s30 + $0x40] sm:$0xff]  }
  0x67   : > { %v1477_v29 = vsel %vm345_vm1, %v1473_v20, %v1476_v44  ;;  %v4461_v20 = vld [vmem:[%s3994_s30 + $0x60] sm:$0xff]  }
  0x6a   : > { %3618 = vmatmul.mubr.msk.bf16.vlgmr.msra.gmra.mxu1 %vm457_vm2, %v4222_v10  ;;  %v1730_v10 = vrot.slane %v4230_v4, 1 }
  0x6b   : > { %3612 = vmatmul.mubr.msk.bf16.gmra.mxu0 %vm457_vm2, %v861_v8  ;;  %3676 = vmatpush3.bf16.msra.mxu1 %v1797_v26  ;;  %v4325_v8 = vld [vmem:[%s3994_s30 + $0x60] sm:$0xff]   ;;  %v1488_v26 = vshll.u32 %v4336_v19, 16 }
  0x6c   : > { %3647 = vmatprep.mubr.msk.bf16.mxu0 %vm457_vm2, %v1414_v22  ;;  %3621 = vmatprep.mubr.msk.bf16.mxu1 %vm457_vm2, %v4230_v4  ;;  %v1481_v18 = vshll.u32 %v4325_v8, 16  ;;  %v1480_v22 = vor.u32 %v1478_v17, %v1476_v44  ;;  %v1485_v31 = vshrl.u32 %v4325_v8, 16  ;;  %v1731_v39 = vsel %vm835_vm3, %v1728_v52, %v1730_v10 }
  0x6d   : > { %3805 = vmatprep.subr.msk.bf16.mxu1 %vm500_vm0, %v4253_v32  ;;  %v1490_v41 = vrot.slane %v1488_v26, 1  ;;  %v1733_v50 = vsel %vm835_vm3, %v1730_v10, %v1732_v55  ;;  %v1734_v4 = vrot.slane %v4247_v30, 1  ;;  %v2688_v32 = vsel %vm500_vm0, %v4275_v48, 0 }
  0x6e   : > { %v1483_v23 = vrot.slane %v1481_v18, 1  ;;  %v1748_v12 = vrot.slane %v4325_v8, 1 }
  0x6f   : > { %v1494_v46 = vor.u32 %v1492_v38, %v1490_v41  ;;  %v2309_v38 = vshll.u32 %v4394_v61, 16 }
  0x70   : > { %v1484_v35 = vsel %vm345_vm1, %v1480_v22, %v1483_v23 }
  0x72   : > { %3622 = vmatmul.mubr.msk.bf16.gmra.mxu1 %vm457_vm2, %v4236_v59  ;;  %v4390_v59 = vld [vmem:[%s3994_s30 + $0x18] sm:$0xff]  }
  0x73   : > { %3648 = vmatmul.mubr.msk.bf16.vlgmr.msra.gmra.mxu0 %vm457_vm2, %v1421_v40  ;;  %3625 = vmatprep.mubr.msk.bf16.mxu1 %vm457_vm2, %v4247_v30  ;;  %v1496_v40 = vshll.u32 %v4342_v25, 16  ;;  %v1738_v30 = vrot.slane %v4279_v5, 1  ;;  %v2612_v25 = vld [vmem:[%s3994_s30 + $0x10] sm:$0xe] }
  0x74   : > { %3706 = vmatpush3.bf16.msra.mxu0 %v2115_v42  ;;  %3651 = vmatprep.mubr.msk.bf16.mxu0 %vm457_vm2, %v1428_v43  ;;  %v3298_v42 = vcombine.low %v1721_v34, %v4208_v1  ;;  %v1487_v43 = vor.u32 %v1485_v31, %v1483_v23  ;;  %v3266_v1 = vcombine.low %v1107_v21, %v1108_v49  ;;  %v1999_v49 = vld [vmem:[%s3994_s30 + $0x7c] sm:$0x7] }
  0x75   : > { %3806 = vmatprep.subr.msk.bf16.mxu0 %vm500_vm0, %v4275_v48  ;;  %v1498_v47 = vrot.slane %v1496_v40, 1  ;;  %v1740_v48 = vrot.slane %v4289_v27, 1  ;;  %v3359_v40 = vcombine.low %v2612_v25, %v4371_v54 }
  0x76   : > { %v1727_v51 = vrot.slane %v3298_v42, 1  ;;  %v1491_v6 = vsel %vm345_vm1, %v1487_v43, %v1490_v41  ;;  %v2306_v41 = vshrl.u32 %v4390_v59, 16  ;;  %v2313_v43 = vshrl.u32 %v4394_v61, 16 }
  0x77   : > { %v1499_v45 = vsel %vm345_vm1, %v1494_v46, %v1498_v47  ;;  %v1502_v33 = vor.u32 %v1500_v7, %v1498_v47  ;;  %v1741_v3 = vsel %vm835_vm3, %v1738_v30, %v1740_v48  ;;  %v4491_v47 = vld [vmem:[%s3994_s30 + $0x78] sm:$0xf] }
  0x7a   : > { %3626 = vmatmul.mubr.msk.bf16.gmra.mxu1 %vm457_vm2, %v4260_v36 }
  0x7b   : > { %3652 = vmatmul.mubr.msk.bf16.gmra.mxu0 %vm457_vm2, %v1435_v53  ;;  %3629 = vmatprep.mubr.msk.bf16.mxu1 %vm457_vm2, %v4279_v5  ;;  %v1729_v53 = vsel %vm835_vm3, %v1727_v51, %v1728_v52  ;;  %v1742_v5 = vrot.slane %v4299_v56, 1  ;;  %v2311_v51 = vrot.slane %v2309_v38, 1  ;;  %v2618_v52 = vrot.slane %v3359_v40, 1 }
  0x7c   : > { %3655 = vmatprep.mubr.msk.bf16.mxu0 %vm457_vm2, %v1442_v15  ;;  %v1972_v15 = vld [vmem:[%s3994_s30 + $0x10] sm:$0xf] }
  0x7d   : > { %v4377_v28 = vcombine.low %v1972_v15, %v4371_v54  ;;  %v1743_v9 = vsel %vm835_vm3, %v1740_v48, %v1742_v5  ;;  %v2323_v54 = vshll.u32 %v4412_v13, 16 }
  0x7f   : > { %v2298_v44 = vshll.u32 %v4377_v28, 16  ;;  %v2296_v23 = vshrl.u32 %v4377_v28, 16 }
  0x81   : > { %v2300_v26 = vrot.slane %v2298_v44, 1 }
  0x82   : > { %3630 = vmatmul.mubr.msk.bf16.gmra.mxu1 %vm457_vm2, %v4289_v27  ;;  %v4424_v27 = vld [vmem:[%s3994_s30 + $0x38] sm:$0xff]  }
  0x83   : > { %3656 = vmatmul.mubr.msk.bf16.gmra.mxu0 %vm457_vm2, %v1449_v60  ;;  %3633 = vmatprep.mubr.msk.bf16.mxu1 %vm457_vm2, %v4299_v56  ;;  %v1736_v60 = vrot.slane %v4260_v36, 1  ;;  %v4408_v36 = vld [vmem:[%s3994_s30 + $0x28] sm:$0xff]   ;;  %v1746_v56 = vrot.slane %v4317_v2, 1  ;;  %v2301_v31 = vor.u32 %v2300_v26, %v2296_v23  ;;  %v2627_v23 = vrot.slane %v4424_v27, 1 }
  0x84   : > { %3659 = vmatprep.mubr.msk.bf16.mxu0 %vm457_vm2, %v1456_v62  ;;  %v1735_v62 = vsel %vm835_vm3, %v1732_v55, %v1734_v4  ;;  %v2316_v46 = vshll.u32 %v4408_v36, 16 }
  0x85   : > { %v1737_v63 = vsel %vm835_vm3, %v1734_v4, %v1736_v60  ;;  %v1739_v0 = vsel %vm835_vm3, %v1736_v60, %v1738_v30  ;;  %v1747_v17 = vsel %vm835_vm3, %v1744_v14, %v1746_v56  ;;  %v1749_v18 = vsel %vm835_vm3, %v1746_v56, %v1748_v12 }
  0x86   : > { %v2318_v7 = vrot.slane %v2316_v46, 1  ;;  %v2325_v60 = vrot.slane %v2323_v54, 1 }
  0x8a   : > { %3634 = vmatmul.mubr.msk.bf16.gmra.mxu1 %vm457_vm2, %v4307_v58  ;;  %v4440_v58 = vld [vmem:[%s3994_s30 + $0x48] sm:$0xff]  }
  0x8b   : > { %3660 = vmatmul.mubr.msk.bf16.gmra.mxu0 %vm457_vm2, %v1463_v11  ;;  %3637 = vmatprep.mubr.msk.bf16.mxu1 %vm457_vm2, %v4317_v2  ;;  %v1745_v11 = vsel %vm835_vm3, %v1742_v5, %v1744_v14  ;;  %v1750_v2 = vrot.slane %v4336_v19, 1 }
  0x8c   : > { %3663 = vmatprep.mubr.msk.bf16.mxu0 %vm457_vm2, %v1470_v16  ;;  %v4444_v16 = vld [vmem:[%s3994_s30 + $0x50] sm:$0xff]  }
  0x8d   : > { %v1751_v21 = vsel %vm835_vm3, %v1748_v12, %v1750_v2  ;;  %v1753_v22 = vsel %vm835_vm3, %v1750_v2, %v1752_v37  ;;  %v2344_v2 = vshll.u32 %v4440_v58, 16 }
  0x92   : > { %3638 = vmatmul.mubr.msk.bf16.gmra.mxu1 %vm457_vm2, %v4325_v8  ;;  %v4456_v8 = vld [vmem:[%s3994_s30 + $0x58] sm:$0xff]  }
  0x93   : > { %3664 = vmatmul.mubr.msk.bf16.gmra.mxu0 %vm457_vm2, %v1477_v29  ;;  %3641 = vmatprep.mubr.msk.bf16.mxu1 %vm457_vm2, %v4336_v19  ;;  %v2302_v19 = vshll.u32 %v4390_v59, 16  ;;  %v4475_v29 = vld [vmem:[%s3994_s30 + $0x68] sm:$0xff]  }
  0x94   : > { %3667 = vmatprep.mubr.msk.bf16.mxu0 %vm457_vm2, %v1484_v35  ;;  %v4478_v35 = vld [vmem:[%s3994_s30 + $0x70] sm:$0xff]  }
  0x95   : > { %v2304_v34 = vrot.slane %v2302_v19, 1 }
  0x97   : > { %v2305_v42 = vsel %vm345_vm1, %v2301_v31, %v2304_v34 }
  0x9a   : > { %3642 = vmatmul.mubr.msk.bf16.gmra.mxu1 %vm457_vm2, %v3266_v1  ;;  %v2308_v1 = vor.u32 %v2306_v41, %v2304_v34  ;;  %v2346_v34 = vrot.slane %v2344_v2, 1 }
  0x9b   : > { %3668 = vmatmul.mubr.msk.bf16.gmra.mxu0 %vm457_vm2, %v1491_v6  ;;  %3677 = vmatprep.mubr.msk.bf16.mxu1 %vm457_vm2, %v1729_v53  ;;  %v2619_v6 = vrot.slane %v4390_v59, 1  ;;  %v2315_v53 = vor.u32 %v2313_v43, %v2311_v51  ;;  %v2348_v43 = vshrl.u32 %v4440_v58, 16 }
  0x9c   : > { %3671 = vmatprep.mubr.msk.bf16.mxu0 %vm457_vm2, %v1499_v45  ;;  %v3327_v45 = vcombine.low %v4491_v47, %v1999_v49  ;;  %v2312_v10 = vsel %vm345_vm1, %v2308_v1, %v2311_v51  ;;  %v2629_v1 = vrot.slane %v4428_v24, 1 }
  0x9d   : > { %v2620_v15 = vsel %vm835_vm3, %v2618_v52, %v2619_v6  ;;  %v2355_v52 = vshrl.u32 %v4444_v16, 16  ;;  %v2350_v54 = vor.u32 %v2348_v43, %v2346_v34 }
  0xa2   : > { %3678 = vmatmul.mubr.msk.bf16.vlgmr.msra.gmra.mxu1 %vm457_vm2, %v1731_v39  ;;  %v2327_v39 = vshrl.u32 %v4412_v13, 16 }
  0xa3   : > { %3672 = vmatmul.mubr.msk.bf16.gmra.mxu0 %vm457_vm2, %v1502_v33  ;;  %3736 = vmatpush3.bf16.msra.mxu1 %v2437_v57  ;;  %v2320_v33 = vshrl.u32 %v4408_v36, 16  ;;  %v2330_v57 = vshll.u32 %v4424_v27, 16 }
  0xa4   : > { %3707 = vmatprep.mubr.msk.bf16.mxu0 %vm457_vm2, %v4377_v28  ;;  %3681 = vmatprep.mubr.msk.bf16.mxu1 %vm457_vm2, %v1733_v50  ;;  %v2319_v28 = vsel %vm345_vm1, %v2315_v53, %v2318_v7  ;;  %v2621_v50 = vrot.slane %v4394_v61, 1  ;;  %v2329_v48 = vor.u32 %v2327_v39, %v2325_v60 }
  0xaa   : > { %3682 = vmatmul.mubr.msk.bf16.gmra.mxu1 %vm457_vm2, %v1735_v62  ;;  %v2322_v62 = vor.u32 %v2320_v33, %v2318_v7 }
  0xab   : > { %3708 = vmatmul.mubr.msk.bf16.vlgmr.msra.gmra.mxu0 %vm457_vm2, %v4390_v59  ;;  %3685 = vmatprep.mubr.msk.bf16.mxu1 %vm457_vm2, %v1737_v63 }
  0xac   : > { %3766 = vmatpush3.bf16.msra.mxu0 %v2688_v32  ;;  %3711 = vmatprep.mubr.msk.bf16.mxu0 %vm457_vm2, %v4394_v61  ;;  %v2623_v32 = vrot.slane %v4408_v36, 1  ;;  %v2622_v61 = vsel %vm835_vm3, %v2619_v6, %v2621_v50  ;;  %v2358_v6 = vshll.u32 %v4456_v8, 16 }
  0xae   : > { %v2624_v14 = vsel %vm835_vm3, %v2621_v50, %v2623_v32  ;;  %v2360_v39 = vrot.slane %v2358_v6, 1 }
  0xb2   : > { %3686 = vmatmul.mubr.msk.bf16.gmra.mxu1 %vm457_vm2, %v1739_v0  ;;  %v2332_v0 = vrot.slane %v2330_v57, 1 }
  0xb3   : > { %3712 = vmatmul.mubr.msk.bf16.gmra.mxu0 %vm457_vm2, %v4408_v36  ;;  %3689 = vmatprep.mubr.msk.bf16.mxu1 %vm457_vm2, %v1741_v3  ;;  %v2326_v36 = vsel %vm345_vm1, %v2322_v62, %v2325_v60  ;;  %v2362_v62 = vshrl.u32 %v4456_v8, 16 }
  0xb4   : > { %3715 = vmatprep.mubr.msk.bf16.mxu0 %vm457_vm2, %v4412_v13 }
  0xba   : > { %3690 = vmatmul.mubr.msk.bf16.gmra.mxu1 %vm457_vm2, %v1743_v9  ;;  %v2337_v9 = vshll.u32 %v4428_v24, 16 }
  0xbb   : > { %3716 = vmatmul.mubr.msk.bf16.gmra.mxu0 %vm457_vm2, %v4424_v27  ;;  %3693 = vmatprep.mubr.msk.bf16.mxu1 %vm457_vm2, %v1745_v11  ;;  %v2334_v11 = vshrl.u32 %v4424_v27, 16 }
  0xbc   : > { %3719 = vmatprep.mubr.msk.bf16.mxu0 %vm457_vm2, %v4428_v24 }
  0xbd   : > { %v2336_v26 = vor.u32 %v2334_v11, %v2332_v0  ;;  %v2633_v11 = vrot.slane %v4444_v16, 1 }
  0xc2   : > { %3694 = vmatmul.mubr.msk.bf16.gmra.mxu1 %vm457_vm2, %v1747_v17  ;;  %v2333_v17 = vsel %vm345_vm1, %v2329_v48, %v2332_v0 }
  0xc3   : > { %3720 = vmatmul.mubr.msk.bf16.gmra.mxu0 %vm457_vm2, %v4440_v58  ;;  %3697 = vmatprep.mubr.msk.bf16.mxu1 %vm457_vm2, %v1749_v18  ;;  %v2341_v18 = vshrl.u32 %v4428_v24, 16  ;;  %v2630_v24 = vsel %vm835_vm3, %v2627_v23, %v2629_v1 }
  0xc4   : > { %3723 = vmatprep.mubr.msk.bf16.mxu0 %vm457_vm2, %v4444_v16 }
  0xca   : > { %3698 = vmatmul.mubr.msk.bf16.gmra.mxu1 %vm457_vm2, %v1751_v21 }
  0xcb   : > { %3724 = vmatmul.mubr.msk.bf16.gmra.mxu0 %vm457_vm2, %v4456_v8  ;;  %3701 = vmatprep.mubr.msk.bf16.mxu1 %vm457_vm2, %v1753_v22  ;;  %v2339_v22 = vrot.slane %v2337_v9, 1  ;;  %v2372_v9 = vshll.u32 %v4475_v29, 16 }
  0xcc   : > { %3727 = vmatprep.mubr.msk.bf16.mxu0 %vm457_vm2, %v4461_v20 }
  0xcd   : > { %v2343_v31 = vor.u32 %v2341_v18, %v2339_v22  ;;  %v2340_v27 = vsel %vm345_vm1, %v2336_v26, %v2339_v22 }
  0xcf   : > { %v2347_v51 = vsel %vm345_vm1, %v2343_v31, %v2346_v34 }
  0xd2   : > { %3702 = vmatmul.mubr.msk.bf16.gmra.mxu1 %vm457_vm2, %v1752_v37  ;;  %v2625_v37 = vrot.slane %v4412_v13, 1 }
  0xd3   : > { %3728 = vmatmul.mubr.msk.bf16.gmra.mxu0 %vm457_vm2, %v4475_v29  ;;  %3737 = vmatprep.mubr.msk.bf16.mxu1 %vm457_vm2, %v2305_v42  ;;  %v2351_v42 = vshll.u32 %v4444_v16, 16 }
  0xd4   : > { %3731 = vmatprep.mubr.msk.bf16.mxu0 %vm457_vm2, %v4478_v35  ;;  %v2626_v13 = vsel %vm835_vm3, %v2623_v32, %v2625_v37  ;;  %v2628_v41 = vsel %vm835_vm3, %v2625_v37, %v2627_v23  ;;  %v2635_v37 = vrot.slane %v4456_v8, 1  ;;  %v2364_v23 = vor.u32 %v2362_v62, %v2360_v39 }
  0xd5   : > { %v2353_v7 = vrot.slane %v2351_v42, 1 }
  0xd6   : > { %v2636_v8 = vsel %vm835_vm3, %v2633_v11, %v2635_v37 }
  0xd7   : > { %v2354_v32 = vsel %vm345_vm1, %v2350_v54, %v2353_v7 }
  0xda   : > { %v4510_v4 = vpop.f32.mrf.mxu1  ;;  %3738 = vmatmul.mubr.msk.bf16.vlgmr.msra.gmra.mxu1 %vm457_vm2, %v2312_v10 }
  0xdb   : > { %v4502_v55 = vpop.f32.mrf.mxu0  ;;  %3732 = vmatmul.mubr.msk.bf16.gmra.mxu0 %vm457_vm2, %v3327_v45  ;;  %3741 = vmatprep.mubr.msk.bf16.mxu1 %vm457_vm2, %v2319_v28  ;;  %v2357_v28 = vor.u32 %v2355_v52, %v2353_v7  ;;  %v2376_v52 = vshrl.u32 %v4475_v29, 16  ;;  %v2383_v7 = vshrl.u32 %v4478_v35, 16 }
  0xdc   : > { %3767 = vmatprep.mubr.msk.bf16.mxu0 %vm457_vm2, %v2620_v15  ;;  %v4517_v63 = vpop.f32.mrf.mxu1  ;;  %v2631_v15 = vrot.slane %v4440_v58, 1  ;;  %v2365_v58 = vshll.u32 %v4461_v20, 16 }
  0xdd   : > { %v4513_v59 = vpop.f32.mrf.mxu0 }
  0xde   : > { %v4522_v3 = vpop.f32.mrf.mxu1  ;;  %v2632_v60 = vsel %vm835_vm3, %v2629_v1, %v2631_v15  ;;  %v2367_v2 = vrot.slane %v2365_v58, 1  ;;  %v2634_v42 = vsel %vm835_vm3, %v2631_v15, %v2633_v11  ;;  %v2639_v58 = vrot.slane %v4475_v29, 1 }
  0xdf   : > { %v4519_v30 = vpop.f32.mrf.mxu0 }
  0xe0   : > { %v4530_v56 = vpop.f32.mrf.mxu1 }
  0xe1   : > { %v4524_v5 = vpop.f32.mrf.mxu0 }
  0xe2   : > { %v4540_v44 = vpop.f32.mrf.mxu1  ;;  %3742 = vmatmul.mubr.msk.bf16.gmra.mxu1 %vm457_vm2, %v2326_v36  ;;  %v2290_v36 = vld [vmem:[%s3994_s30 + $0x7c] sm:$0xf] }
  0xe3   : > { %v4532_v12 = vpop.f32.mrf.mxu0  ;;  %3768 = vmatmul.mubr.msk.bf16.vlgmr.msra.gmra.mxu0 %vm457_vm2, %v2622_v61  ;;  %3745 = vmatprep.mubr.msk.bf16.mxu1 %vm457_vm2, %v2333_v17  ;;  %v2361_v61 = vsel %vm345_vm1, %v2357_v28, %v2360_v39  ;;  %v4608_v26 = vcombine.low %v4491_v47, %v2290_v36  ;;  %v2368_v47 = vsel %vm345_vm1, %v2364_v23, %v2367_v2 }
  0xe4   : > { %3771 = vmatprep.mubr.msk.bf16.mxu0 %vm457_vm2, %v2624_v14  ;;  %v4547_v19 = vpop.f32.mrf.mxu1  ;;  %v2369_v14 = vshrl.u32 %v4461_v20, 16 }
  0xe5   : > { %v4543_v21 = vpop.f32.mrf.mxu0  ;;  %v2387_v15 = vshll.u32 %v4608_v26, 16 }
  0xe6   : > { %v4552_v38 = vpop.f32.mrf.mxu1  ;;  %v2371_v16 = vor.u32 %v2369_v14, %v2367_v2 }
  0xe7   : > { %v4549_v25 = vpop.f32.mrf.mxu0  ;;  %v2389_v36 = vrot.slane %v2387_v15, 1 }
  0xe8   : > { %v4560_v46 = vpop.f32.mrf.mxu1 }
  0xe9   : > { %v4554_v40 = vpop.f32.mrf.mxu0 }
  0xea   : > { %v4570_v45 = vpop.f32.mrf.mxu1  ;;  %3746 = vmatmul.mubr.msk.bf16.gmra.mxu1 %vm457_vm2, %v2340_v27 }
  0xeb   : > { %v4562_v49 = vpop.f32.mrf.mxu0  ;;  %3772 = vmatmul.mubr.msk.bf16.gmra.mxu0 %vm457_vm2, %v2626_v13  ;;  %3749 = vmatprep.mubr.msk.bf16.mxu1 %vm457_vm2, %v2347_v51  ;;  %v2374_v13 = vrot.slane %v2372_v9, 1 }
  0xec   : > { %3775 = vmatprep.mubr.msk.bf16.mxu0 %vm457_vm2, %v2628_v41  ;;  %v4577_v10 = vpop.f32.mrf.mxu1 }
  0xed   : > { %v4573_v53 = vpop.f32.mrf.mxu0 }
  0xee   : > { %v4582_v57 = vpop.f32.mrf.mxu1 }
  0xef   : > { %v4579_v33 = vpop.f32.mrf.mxu0 }
  0xf0   : > { %v4590_v48 = vpop.f32.mrf.mxu1 }
  0xf1   : > { %v4584_v50 = vpop.f32.mrf.mxu0 }
  0xf2   : > { %v3559_v17 = vpop.f32.mrf.mxu1  ;;  %3750 = vmatmul.mubr.msk.bf16.gmra.mxu1 %vm457_vm2, %v2354_v32 }
  0xf3   : > { %v4592_v0 = vpop.f32.mrf.mxu0  ;;  %3776 = vmatmul.mubr.msk.bf16.gmra.mxu0 %vm457_vm2, %v2630_v24  ;;  %v727_v22 = vadd.f32 %v3559_v17, %v4502_v55  ;;  %3753 = vmatprep.mubr.msk.bf16.mxu1 %vm457_vm2, %v2361_v61  ;;  %v2379_v55 = vshll.u32 %v4478_v35, 16  ;;  %v2378_v61 = vor.u32 %v2376_v52, %v2374_v13 }
  0xf4   : > { %3779 = vmatprep.mubr.msk.bf16.mxu0 %vm457_vm2, %v2632_v60  ;;  %v718_v31 = vpop.f32.mrf.mxu1 }
  0xf5   : > { %v4602_v18 = vpop.f32.mrf.mxu0  ;;  %v719_v41 = vadd.f32 %v718_v31, %v4513_v59  ;;  %v2375_v59 = vsel %vm345_vm1, %v2371_v16, %v2374_v13  ;;  %v2381_v60 = vrot.slane %v2379_v55, 1  ;;  %v2643_v55 = vrot.slane %v4608_v26, 1 }
  0xf6   : > { %v3560_v27 = vpop.f32.mrf.mxu1 }
  0xf7   : > { %v4610_v34 = vpop.f32.mrf.mxu0  ;;  %v730_v51 = vadd.f32 %v3560_v27, %v4519_v30  ;;  %v2637_v30 = vrot.slane %v4461_v20, 1  ;;  %v2385_v9 = vor.u32 %v2383_v7, %v2381_v60  ;;  %v2382_v31 = vsel %vm345_vm1, %v2378_v61, %v2381_v60 }
  0xf8   : > { %v721_v6 = vpop.f32.mrf.mxu1 }
  0xf9   : > { %v4614_v43 = vpop.f32.mrf.mxu0  ;;  %v722_v54 = vadd.f32 %v721_v6, %v4524_v5  ;;  %v2638_v17 = vsel %vm835_vm3, %v2635_v37, %v2637_v30  ;;  %v2640_v29 = vsel %vm835_vm3, %v2637_v30, %v2639_v58  ;;  %v2641_v37 = vrot.slane %v4478_v35, 1 }
  0xfa   : > { %v3563_v39 = vpop.f32.mrf.mxu1  ;;  %3754 = vmatmul.mubr.msk.bf16.gmra.mxu1 %vm457_vm2, %v2368_v47 }
  0xfb   : > { %v3589_v1 = vpop.f32.mrf.mxu0  ;;  %3780 = vmatmul.mubr.msk.bf16.gmra.mxu0 %vm457_vm2, %v2634_v42  ;;  %v743_v32 = vadd.f32 %v3563_v39, %v4532_v12  ;;  %3757 = vmatprep.mubr.msk.bf16.mxu1 %vm457_vm2, %v2375_v59  ;;  %v2642_v35 = vsel %vm835_vm3, %v2639_v58, %v2641_v37 }
  0xfc   : > { %v4626_v28 = vadd.f32 %v3589_v1, %v727_v22  ;;  %3783 = vmatprep.mubr.msk.bf16.mxu0 %vm457_vm2, %v2636_v8  ;;  %v734_v5 = vpop.f32.mrf.mxu1  ;;  %v2391_v8 = vshrl.u32 %v4608_v26, 16 }
  0xfd   : > { %v942_v24 = vpop.f32.mrf.mxu0  ;;  %v735_v20 = vadd.f32 %v734_v5, %v4543_v21  ;;  %v2390_v21 = vsel %vm345_vm1, %v2385_v9, %v2389_v36 }
  0xfe   : > { %v4633_v62 = vadd.f32 %v942_v24, %v719_v41  ;;  %v3564_v2 = vpop.f32.mrf.mxu1  ;;  %v2393_v15 = vor.u32 %v2391_v8, %v2389_v36 }
  0xff   : > { %v3590_v14 = vpop.f32.mrf.mxu0  ;;  %v746_v12 = vadd.f32 %v3564_v2, %v4549_v25 }
 0x100   : > { %v4637_v11 = vadd.f32 %v3590_v14, %v730_v51  ;;  %v737_v16 = vpop.f32.mrf.mxu1 }
 0x101   : > { %v945_v22 = vpop.f32.mrf.mxu0  ;;  %v738_v41 = vadd.f32 %v737_v16, %v4554_v40 }
 0x102   : > { %v4642_v23 = vadd.f32 %v945_v22, %v722_v54  ;;  %v3567_v27 = vpop.f32.mrf.mxu1  ;;  %3758 = vmatmul.mubr.msk.bf16.gmra.mxu1 %vm457_vm2, %v2382_v31  ;;  %v2644_v54 = vsel %vm835_vm3, %v2641_v37, %v2643_v55 }
 0x103   : > { %v3593_v13 = vpop.f32.mrf.mxu0  ;;  %3784 = vmatmul.mubr.msk.bf16.gmra.mxu0 %vm457_vm2, %v2638_v17  ;;  %v759_v51 = vadd.f32 %v3567_v27, %v4562_v49  ;;  %3761 = vmatprep.mubr.msk.bf16.mxu1 %vm457_vm2, %v2390_v21 }
 0x104   : > { %v4648_v42 = vadd.f32 %v3593_v13, %v743_v32  ;;  %3787 = vmatprep.mubr.msk.bf16.mxu0 %vm457_vm2, %v2640_v29  ;;  %v750_v40 = vpop.f32.mrf.mxu1 }
 0x105   : > { %v958_v25 = vpop.f32.mrf.mxu0  ;;  %v751_v6 = vadd.f32 %v750_v40, %v4573_v53 }
 0x106   : > { %v4656_v47 = vadd.f32 %v958_v25, %v735_v20  ;;  %v3568_v59 = vpop.f32.mrf.mxu1 }
 0x107   : > { %v3594_v52 = vpop.f32.mrf.mxu0  ;;  %v762_v26 = vadd.f32 %v3568_v59, %v4579_v33 }
 0x108   : > { %v4660_v1 = vadd.f32 %v3594_v52, %v746_v12  ;;  %v753_v30 = vpop.f32.mrf.mxu1 }
 0x109   : > { %v961_v7 = vpop.f32.mrf.mxu0  ;;  %v754_v24 = vadd.f32 %v753_v30, %v4584_v50 }
 0x10a   : > { %v4665_v49 = vadd.f32 %v961_v7, %v738_v41  ;;  %v3571_v60 = vpop.f32.mrf.mxu1  ;;  %3762 = vmatmul.mubr.msk.bf16.gmra.mxu1 %vm457_vm2, %v2393_v15 }
 0x10b   : > { %v3597_v39 = vpop.f32.mrf.mxu0  ;;  %3788 = vmatmul.mubr.msk.bf16.gmra.mxu0 %vm457_vm2, %v2642_v35  ;;  %v775_v32 = vadd.f32 %v3571_v60, %v4592_v0 }
 0x10c   : > { %v4669_v53 = vadd.f32 %v3597_v39, %v759_v51  ;;  %3791 = vmatprep.mubr.msk.bf16.mxu0 %vm457_vm2, %v2644_v54  ;;  %v766_v33 = vpop.f32.mrf.mxu1 }
 0x10d   : > { %v974_v58 = vpop.f32.mrf.mxu0  ;;  %v767_v14 = vadd.f32 %v766_v33, %v4602_v18 }
 0x10e   : > { %v4674_v61 = vadd.f32 %v974_v58, %v751_v6  ;;  %v3572_v36 = vpop.f32.mrf.mxu1 }
 0x10f   : > { %v3598_v5 = vpop.f32.mrf.mxu0  ;;  %v778_v20 = vadd.f32 %v3572_v36, %v4610_v34 }
 0x110   : > { %v4677_v9 = vadd.f32 %v3598_v5, %v762_v26  ;;  %v769_v2 = vpop.f32.mrf.mxu1 }
 0x111   : > { %v977_v50 = vpop.f32.mrf.mxu0  ;;  %v770_v0 = vadd.f32 %v769_v2, %v4614_v43 }
 0x112   : > { %v4680_v17 = vadd.f32 %v977_v50, %v754_v24  ;;  %v3575_v12 = vpop.f32.mrf.mxu1 }
 0x113   : > { %v3601_v22 = vpop.f32.mrf.mxu0  ;;  %3792 = vmatmul.mubr.msk.bf16.gmra.mxu0 %vm457_vm2, %v2643_v55  ;;  %v791_v18 = vadd.f32 %v3575_v12, %v4510_v4 }
 0x114   : > { %v4684_v29 = vadd.f32 %v3601_v22, %v775_v32  ;;  %v782_v13 = vpop.f32.mrf.mxu1 }
 0x115   : > { %v990_v31 = vpop.f32.mrf.mxu0  ;;  %v783_v34 = vadd.f32 %v782_v13, %v4517_v63 }
 0x116   : > { %v4687_v16 = vadd.f32 %v990_v31, %v767_v14  ;;  %v3576_v37 = vpop.f32.mrf.mxu1 }
 0x117   : > { %v3602_v21 = vpop.f32.mrf.mxu0  ;;  %v794_v25 = vadd.f32 %v3576_v37, %v4522_v3 }
 0x118   : > { %v4690_v41 = vadd.f32 %v3602_v21, %v778_v20  ;;  %v785_v43 = vpop.f32.mrf.mxu1 }
 0x119   : > { %v993_v27 = vpop.f32.mrf.mxu0  ;;  %v786_v51 = vadd.f32 %v785_v43, %v4530_v56 }
 0x11a   : > { %v4693_v8 = vadd.f32 %v993_v27, %v770_v0  ;;  %v3579_v4 = vpop.f32.mrf.mxu1 }
 0x11b   : > { %v3605_v55 = vpop.f32.mrf.mxu0  ;;  %v807_v6 = vadd.f32 %v3579_v4, %v4540_v44 }
 0x11c   : > { %v4696_v40 = vadd.f32 %v3605_v55, %v791_v18  ;;  %v798_v63 = vpop.f32.mrf.mxu1 }
 0x11d   : > { %v1006_v52 = vpop.f32.mrf.mxu0  ;;  %v799_v7 = vadd.f32 %v798_v63, %v4547_v19 }
 0x11e   : > { %v4699_v35 = vadd.f32 %v1006_v52, %v783_v34  ;;  %v3580_v3 = vpop.f32.mrf.mxu1 }
 0x11f   : > { %v3606_v59 = vpop.f32.mrf.mxu0  ;;  %v810_v26 = vadd.f32 %v3580_v3, %v4552_v38 }
 0x120   : > { %v4702_v15 = vadd.f32 %v3606_v59, %v794_v25  ;;  %v801_v56 = vpop.f32.mrf.mxu1 }
 0x121   : > { %v1009_v54 = vpop.f32.mrf.mxu0  ;;  %v802_v24 = vadd.f32 %v801_v56, %v4560_v46 }
 0x122   : > { %v4705_v30 = vadd.f32 %v1009_v54, %v786_v51  ;;  %v3583_v44 = vpop.f32.mrf.mxu1 }
 0x123   : > { %v3609_v39 = vpop.f32.mrf.mxu0  ;;  %v823_v32 = vadd.f32 %v3583_v44, %v4570_v45 }
 0x124   : > { %v4708_v60 = vadd.f32 %v3609_v39, %v807_v6  ;;  %v814_v19 = vpop.f32.mrf.mxu1 }
 0x125   : > { %v1022_v58 = vpop.f32.mrf.mxu0  ;;  %v815_v14 = vadd.f32 %v814_v19, %v4577_v10 }
 0x126   : > { %v4711_v33 = vadd.f32 %v1022_v58, %v799_v7  ;;  %v3584_v38 = vpop.f32.mrf.mxu1 }
 0x127   : > { %v3610_v5 = vpop.f32.mrf.mxu0  ;;  %v826_v20 = vadd.f32 %v3584_v38, %v4582_v57 }
 0x128   : > { %v4714_v36 = vadd.f32 %v3610_v5, %v810_v26  ;;  %v817_v46 = vpop.f32.mrf.mxu1 }
 0x129   : > { %v1025_v50 = vpop.f32.mrf.mxu0  ;;  %v818_v0 = vadd.f32 %v817_v46, %v4590_v48 }
 0x12a   : > { %v4717_v2 = vadd.f32 %v1025_v50, %v802_v24  ;;  %v3619_v45 = vpop.f32.mrf.mxu1 }
 0x12b   : > { %v3613_v22 = vpop.f32.mrf.mxu0  ;;  %v1373_v18 = vadd.f32 %v3619_v45, %v4626_v28 }
 0x12c   : > { %v4720_v12 = vadd.f32 %v3613_v22, %v823_v32  ;;  %v1260_v10 = vpop.f32.mrf.mxu1 }
 0x12d   : > { %v1038_v31 = vpop.f32.mrf.mxu0  ;;  %v1371_v34 = vadd.f32 %v1260_v10, %v4633_v62 }
 0x12e   : > { %v4723_v13 = vadd.f32 %v1038_v31, %v815_v14  ;;  %v3620_v57 = vpop.f32.mrf.mxu1 }
 0x12f   : > { %v3614_v21 = vpop.f32.mrf.mxu0  ;;  %v1374_v25 = vadd.f32 %v3620_v57, %v4637_v11 }
 0x130   : > { %v4726_v37 = vadd.f32 %v3614_v21, %v826_v20  ;;  %v1263_v48 = vpop.f32.mrf.mxu1 }
 0x131   : > { %v1041_v27 = vpop.f32.mrf.mxu0  ;;  %v1372_v51 = vadd.f32 %v1263_v48, %v4642_v23 }
 0x132   : > { %v4729_v43 = vadd.f32 %v1041_v27, %v818_v0  ;;  %v3623_v28 = vpop.f32.mrf.mxu1 }
 0x133   : > { %v3649_v55 = vpop.f32.mrf.mxu0  ;;  %v1377_v6 = vadd.f32 %v3623_v28, %v4648_v42 }
 0x134   : > { %v4732_v4 = vadd.f32 %v3649_v55, %v1373_v18  ;;  %v1276_v62 = vpop.f32.mrf.mxu1 }
 0x135   : > { %v1582_v52 = vpop.f32.mrf.mxu0  ;;  %v1375_v7 = vadd.f32 %v1276_v62, %v4656_v47 }
 0x136   : > { %v4735_v63 = vadd.f32 %v1582_v52, %v1371_v34  ;;  %v3624_v11 = vpop.f32.mrf.mxu1 }
 0x137   : > { %v3650_v59 = vpop.f32.mrf.mxu0  ;;  %v1378_v26 = vadd.f32 %v3624_v11, %v4660_v1 }
 0x138   : > { %v4738_v3 = vadd.f32 %v3650_v59, %v1374_v25  ;;  %v1279_v23 = vpop.f32.mrf.mxu1 }
 0x139   : > { %v1585_v54 = vpop.f32.mrf.mxu0  ;;  %v1376_v24 = vadd.f32 %v1279_v23, %v4665_v49 }
 0x13a   : > { %v4741_v56 = vadd.f32 %v1585_v54, %v1372_v51  ;;  %v3627_v42 = vpop.f32.mrf.mxu1 }
 0x13b   : > { %v3653_v39 = vpop.f32.mrf.mxu0  ;;  %v1381_v32 = vadd.f32 %v3627_v42, %v4669_v53 }
 0x13c   : > { %v4744_v44 = vadd.f32 %v3653_v39, %v1377_v6  ;;  %v1292_v47 = vpop.f32.mrf.mxu1 }
 0x13d   : > { %v1598_v58 = vpop.f32.mrf.mxu0  ;;  %v1379_v14 = vadd.f32 %v1292_v47, %v4674_v61 }
 0x13e   : > { %v4747_v19 = vadd.f32 %v1598_v58, %v1375_v7  ;;  %v3628_v1 = vpop.f32.mrf.mxu1 }
 0x13f   : > { %v3654_v5 = vpop.f32.mrf.mxu0  ;;  %v1382_v20 = vadd.f32 %v3628_v1, %v4677_v9 }
 0x140   : > { %v4750_v38 = vadd.f32 %v3654_v5, %v1378_v26  ;;  %v1295_v49 = vpop.f32.mrf.mxu1 }
 0x141   : > { %v1601_v50 = vpop.f32.mrf.mxu0  ;;  %v1380_v0 = vadd.f32 %v1295_v49, %v4680_v17 }
 0x142   : > { %v4753_v46 = vadd.f32 %v1601_v50, %v1376_v24  ;;  %v3631_v53 = vpop.f32.mrf.mxu1 }
 0x143   : > { %v3657_v22 = vpop.f32.mrf.mxu0  ;;  %v1385_v18 = vadd.f32 %v3631_v53, %v4684_v29 }
 0x144   : > { %v4756_v45 = vadd.f32 %v3657_v22, %v1381_v32  ;;  %v1308_v61 = vpop.f32.mrf.mxu1 }
 0x145   : > { %v1614_v31 = vpop.f32.mrf.mxu0  ;;  %v1383_v34 = vadd.f32 %v1308_v61, %v4687_v16 }
 0x146   : > { %v4759_v10 = vadd.f32 %v1614_v31, %v1379_v14  ;;  %v3632_v9 = vpop.f32.mrf.mxu1 }
 0x147   : > { %v3658_v21 = vpop.f32.mrf.mxu0  ;;  %v1386_v25 = vadd.f32 %v3632_v9, %v4690_v41 }
 0x148   : > { %v4762_v57 = vadd.f32 %v3658_v21, %v1382_v20  ;;  %v1311_v17 = vpop.f32.mrf.mxu1 }
 0x149   : > { %v1617_v27 = vpop.f32.mrf.mxu0  ;;  %v1384_v51 = vadd.f32 %v1311_v17, %v4693_v8 }
 0x14a   : > { %v4765_v48 = vadd.f32 %v1617_v27, %v1380_v0  ;;  %v3635_v29 = vpop.f32.mrf.mxu1 }
 0x14b   : > { %v3661_v55 = vpop.f32.mrf.mxu0  ;;  %v1389_v6 = vadd.f32 %v3635_v29, %v4696_v40 }
 0x14c   : > { %v4768_v28 = vadd.f32 %v3661_v55, %v1385_v18  ;;  %v1324_v16 = vpop.f32.mrf.mxu1 }
 0x14d   : > { %v1630_v52 = vpop.f32.mrf.mxu0  ;;  %v1387_v7 = vadd.f32 %v1324_v16, %v4699_v35 }
 0x14e   : > { %v4771_v62 = vadd.f32 %v1630_v52, %v1383_v34  ;;  %v3636_v41 = vpop.f32.mrf.mxu1 }
 0x14f   : > { %v3662_v59 = vpop.f32.mrf.mxu0  ;;  %v1390_v26 = vadd.f32 %v3636_v41, %v4702_v15 }
 0x150   : > { %v4774_v11 = vadd.f32 %v3662_v59, %v1386_v25  ;;  %v1327_v8 = vpop.f32.mrf.mxu1 }
 0x151   : > { %v1633_v54 = vpop.f32.mrf.mxu0  ;;  %v1388_v24 = vadd.f32 %v1327_v8, %v4705_v30 }
 0x152   : > { %v4777_v23 = vadd.f32 %v1633_v54, %v1384_v51  ;;  %v3639_v40 = vpop.f32.mrf.mxu1 }
 0x153   : > { %v3665_v39 = vpop.f32.mrf.mxu0  ;;  %v1393_v32 = vadd.f32 %v3639_v40, %v4708_v60 }
 0x154   : > { %v4780_v42 = vadd.f32 %v3665_v39, %v1389_v6  ;;  %v1340_v35 = vpop.f32.mrf.mxu1 }
 0x155   : > { %v1646_v58 = vpop.f32.mrf.mxu0  ;;  %v1391_v14 = vadd.f32 %v1340_v35, %v4711_v33 }
 0x156   : > { %v4783_v47 = vadd.f32 %v1646_v58, %v1387_v7  ;;  %v3640_v15 = vpop.f32.mrf.mxu1 }
 0x157   : > { %v3666_v5 = vpop.f32.mrf.mxu0  ;;  %v1394_v20 = vadd.f32 %v3640_v15, %v4714_v36 }
 0x158   : > { %5197 = vst [vmem:[#allocation3_spill] sm:$0xff] %v4783_v47  ;;  %v4786_v1 = vadd.f32 %v3666_v5, %v1390_v26  ;;  %v1343_v30 = vpop.f32.mrf.mxu1 }
 0x159   : > { %v1649_v50 = vpop.f32.mrf.mxu0  ;;  %v1392_v0 = vadd.f32 %v1343_v30, %v4717_v2 }
 0x15a   : > { %5198 = vst [vmem:[#allocation4_spill] sm:$0xff] %v4786_v1  ;;  %v4789_v49 = vadd.f32 %v1649_v50, %v1388_v24  ;;  %v3643_v60 = vpop.f32.mrf.mxu1 }
 0x15b   : > { %v3669_v22 = vpop.f32.mrf.mxu0  ;;  %v1397_v18 = vadd.f32 %v3643_v60, %v4720_v12 }
 0x15c   : > { %5199 = vst [vmem:[#allocation5_spill] sm:$0xff] %v4789_v49  ;;  %v4792_v53 = vadd.f32 %v3669_v22, %v1393_v32  ;;  %v1356_v33 = vpop.f32.mrf.mxu1 }
 0x15d   : > { %v1662_v31 = vpop.f32.mrf.mxu0  ;;  %v1395_v34 = vadd.f32 %v1356_v33, %v4723_v13 }
 0x15e   : > { %5200 = vst [vmem:[#allocation6_spill] sm:$0xff] %v4792_v53  ;;  %v4795_v61 = vadd.f32 %v1662_v31, %v1391_v14  ;;  %v3644_v36 = vpop.f32.mrf.mxu1 }
 0x15f   : > { %v3670_v21 = vpop.f32.mrf.mxu0  ;;  %v1398_v25 = vadd.f32 %v3644_v36, %v4726_v37 }
 0x160   : > { %5201 = vst [vmem:[#allocation7_spill] sm:$0xff] %v4795_v61  ;;  %v4798_v9 = vadd.f32 %v3670_v21, %v1394_v20  ;;  %v1359_v2 = vpop.f32.mrf.mxu1 }
 0x161   : > { %v1665_v27 = vpop.f32.mrf.mxu0  ;;  %v1396_v51 = vadd.f32 %v1359_v2, %v4729_v43 }
 0x162   : > { %5202 = vst [vmem:[#allocation8_spill] sm:$0xff] %v4798_v9  ;;  %v4801_v17 = vadd.f32 %v1665_v27, %v1392_v0  ;;  %v3679_v12 = vpop.f32.mrf.mxu1 }
 0x163   : > { %v3673_v55 = vpop.f32.mrf.mxu0 }
 0x164   : > { %5203 = vst [vmem:[#allocation9_spill] sm:$0xff] %v4801_v17  ;;  %v4804_v29 = vadd.f32 %v3673_v55, %v1397_v18  ;;  %v1833_v16 = vpop.f32.mrf.mxu1 }
 0x165   : > { %v1678_v52 = vpop.f32.mrf.mxu0 }
 0x166   : > { %5204 = vst [vmem:[#allocation10_spill] sm:$0xff] %v4804_v29  ;;  %v4806_v6 = vadd.f32 %v1678_v52, %v1395_v34  ;;  %v3680_v7 = vpop.f32.mrf.mxu1 }
 0x167   : > { %v3674_v13 = vpop.f32.mrf.mxu0 }
 0x168   : > { %5205 = vst [vmem:[#allocation11_spill] sm:$0xff] %v4806_v6  ;;  %v4808_v59 = vadd.f32 %v3674_v13, %v1398_v25  ;;  %v4812_v37 = vpop.f32.mrf.mxu1 }
 0x169   : > { %v1681_v41 = vpop.f32.mrf.mxu0 }
 0x16a   : > { %5206 = vst [vmem:[#allocation12_spill] sm:$0xff] %v4808_v59  ;;  %v4810_v54 = vadd.f32 %v1681_v41, %v1396_v51  ;;  %v4814_v8 = vpop.f32.mrf.mxu1 }
 0x16b   : > { %v3709_v26 = vpop.f32.mrf.mxu0 }
 0x16c   : > { %5207 = vst [vmem:[#allocation13_spill] sm:$0xff] %v4810_v54  ;;  %v4816_v39 = vpop.f32.mrf.mxu1 }
 0x16d   : > { %v2151_v43 = vpop.f32.mrf.mxu0 }
 0x16e   : > { %v4818_v40 = vpop.f32.mrf.mxu1 }
 0x16f   : > { %v3710_v24 = vpop.f32.mrf.mxu0 }
 0x170   : > { %v4822_v32 = vpop.f32.mrf.mxu1 }
 0x171   : > { %v4820_v58 = vpop.f32.mrf.mxu0 }
 0x172   : > { %v4826_v5 = vpop.f32.mrf.mxu1 }
 0x173   : > { %v4824_v35 = vpop.f32.mrf.mxu0 }
 0x174   : > { %v4830_v15 = vpop.f32.mrf.mxu1 }
 0x175   : > { %v4828_v14 = vpop.f32.mrf.mxu0 }
 0x176   : > { %v4834_v20 = vpop.f32.mrf.mxu1 }
 0x177   : > { %v4832_v50 = vpop.f32.mrf.mxu0 }
 0x178   : > { %v4838_v22 = vpop.f32.mrf.mxu1 }
 0x179   : > { %v4836_v30 = vpop.f32.mrf.mxu0 }
 0x17a   : > { %v4842_v60 = vpop.f32.mrf.mxu1 }
 0x17b   : > { %v4840_v0 = vpop.f32.mrf.mxu0 }
 0x17c   : > { %v4846_v18 = vpop.f32.mrf.mxu1 }
 0x17d   : > { %v4844_v31 = vpop.f32.mrf.mxu0 }
 0x17e   : > { %v4850_v21 = vpop.f32.mrf.mxu1 }
 0x17f   : > { %v4848_v33 = vpop.f32.mrf.mxu0 }
 0x180   : > { %v4854_v36 = vpop.f32.mrf.mxu1 }
 0x181   : > { %v4852_v34 = vpop.f32.mrf.mxu0 }
 0x182   : > { %v4858_v25 = vpop.f32.mrf.mxu1 }
 0x183   : > { %v4856_v27 = vpop.f32.mrf.mxu0 }
 0x184   : > { %v4862_v55 = vpop.f32.mrf.mxu1 }
 0x185   : > { %v4860_v2 = vpop.f32.mrf.mxu0  ;;  %5208 = vst [vmem:[#allocation14_spill] sm:$0xff] %v4862_v55 }
 0x186   : > { %v4866_v52 = vpop.f32.mrf.mxu1 }
 0x187   : > { %v4864_v51 = vpop.f32.mrf.mxu0  ;;  %5209 = vst [vmem:[#allocation15_spill] sm:$0xff] %v4866_v52 }
 0x188   : > { %v4870_v41 = vpop.f32.mrf.mxu1 }
 0x189   : > { %v4868_v13 = vpop.f32.mrf.mxu0  ;;  %5210 = vst [vmem:[#allocation16_spill] sm:$0xff] %v4870_v41 }
 0x18a   : > { %v4874_v59 = vpop.f32.mrf.mxu1 }
 0x18b   : > { %v4872_v54 = vpop.f32.mrf.mxu0  ;;  %5212 = vst [vmem:[#allocation18_spill] sm:$0xff] %v4874_v59 }
 0x18c   : > { %5211 = vst [vmem:[#allocation17_spill] sm:$0xff] %v4872_v54  ;;  %v4878_v29 = vpop.f32.mrf.mxu1 }
 0x18d   : > { %v4876_v6 = vpop.f32.mrf.mxu0  ;;  %5214 = vst [vmem:[#allocation20_spill] sm:$0xff] %v4878_v29 }
 0x18e   : > { %5213 = vst [vmem:[#allocation19_spill] sm:$0xff] %v4876_v6  ;;  %v4882_v9 = vpop.f32.mrf.mxu1 }
 0x18f   : > { %v4880_v17 = vpop.f32.mrf.mxu0  ;;  %5216 = vst [vmem:[#allocation22_spill] sm:$0xff] %v4882_v9 }
 0x190   : > { %5215 = vst [vmem:[#allocation21_spill] sm:$0xff] %v4880_v17  ;;  %v4886_v53 = vpop.f32.mrf.mxu1 }
 0x191   : > { %v4884_v61 = vpop.f32.mrf.mxu0  ;;  %5218 = vst [vmem:[#allocation24_spill] sm:$0xff] %v4886_v53 }
 0x192   : > { %5217 = vst [vmem:[#allocation23_spill] sm:$0xff] %v4884_v61  ;;  %v4890_v52 = vpop.f32.mrf.mxu1 }
 0x193   : > { %v4888_v49 = vpop.f32.mrf.mxu0  ;;  %5220 = vst [vmem:[#allocation26_spill] sm:$0xff] %v4890_v52 }
 0x194   : > { %5219 = vst [vmem:[#allocation25_spill] sm:$0xff] %v4888_v49  ;;  %v4894_v1 = vpop.f32.mrf.mxu1  ;;  %v1946_v49 = vadd.f32 %v3679_v12, %v4732_v4  ;;  %v1945_v4 = vadd.f32 %v4812_v37, %v4741_v56 }
 0x195   : > { %v4892_v41 = vpop.f32.mrf.mxu0  ;;  %5222 = vst [vmem:[#allocation28_spill] sm:$0xff] %v4894_v1  ;;  %v1944_v1 = vadd.f32 %v1833_v16, %v4735_v63  ;;  %v1950_v16 = vadd.f32 %v4814_v8, %v4744_v44 }
 0x196   : > { %5221 = vst [vmem:[#allocation27_spill] sm:$0xff] %v4892_v41  ;;  %v4898_v6 = vpop.f32.mrf.mxu1  ;;  %v2264_v41 = vadd.f32 %v3709_v26, %v1946_v49 }
 0x197   : > { %v4896_v59 = vpop.f32.mrf.mxu0  ;;  %5224 = vst [vmem:[#allocation30_spill] sm:$0xff] %v4898_v6  ;;  %v1947_v6 = vadd.f32 %v3680_v7, %v4738_v3 }
 0x198   : > { %5223 = vst [vmem:[#allocation29_spill] sm:$0xff] %v4896_v59  ;;  %v4902_v17 = vpop.f32.mrf.mxu1 }
 0x199   : > { %v4900_v29 = vpop.f32.mrf.mxu0  ;;  %5226 = vst [vmem:[#allocation32_spill] sm:$0xff] %v4902_v17  ;;  %v2265_v12 = vadd.f32 %v3710_v24, %v1947_v6  ;;  %v1951_v6 = vadd.f32 %v4818_v40, %v4750_v38 }
 0x19a   : > { %5225 = vst [vmem:[#allocation31_spill] sm:$0xff] %v4900_v29  ;;  %v3739_v61 = vpop.f32.mrf.mxu1  ;;  %v2262_v29 = vadd.f32 %v2151_v43, %v1944_v1  ;;  %v2263_v1 = vadd.f32 %v4820_v58, %v1945_v4 }
 0x19b   : > { %v4904_v9 = vpop.f32.mrf.mxu0  ;;  %v2586_v17 = vadd.f32 %v3739_v61, %v2264_v41  ;;  %v1948_v41 = vadd.f32 %v4816_v39, %v4747_v19 }
 0x19c   : > { %5227 = vst [vmem:[#allocation33_spill] sm:$0xff] %v4904_v9  ;;  %v2473_v52 = vpop.f32.mrf.mxu1 }
 0x19d   : > { %v4906_v53 = vpop.f32.mrf.mxu0  ;;  %v2584_v63 = vadd.f32 %v2473_v52, %v2262_v29  ;;  %v2268_v29 = vadd.f32 %v4824_v35, %v1950_v16  ;;  %v2266_v8 = vadd.f32 %v4828_v14, %v1948_v41  ;;  %v2269_v52 = vadd.f32 %v4832_v50, %v1951_v6 }
 0x19e   : > { %5228 = vst [vmem:[#allocation34_spill] sm:$0xff] %v4906_v53  ;;  %v3740_v59 = vpop.f32.mrf.mxu1  ;;  %v4918_v53 = vld [vmem:[%s5193_s2] ss:$0 sm:$0xff]  ;;  %v1954_v14 = vadd.f32 %v4826_v5, %v4756_v45  ;;  %v1952_v50 = vadd.f32 %v4830_v15, %v4759_v10 }
 0x19f   : > { %v4909_v54 = vpop.f32.mrf.mxu0  ;;  %v2587_v61 = vadd.f32 %v3740_v59, %v2265_v12 }
 0x1a0   : > { %v2476_v47 = vpop.f32.mrf.mxu1 }
 0x1a1   : > { %v4912_v55 = vpop.f32.mrf.mxu0 }
 0x1a2   : > { %5229 = vst [vmem:[#allocation35_spill] sm:$0xff] %v4912_v55  ;;  %v3743_v26 = vpop.f32.mrf.mxu1 }
 0x1a3   : > { %v3769_v9 = vpop.f32.mrf.mxu0  ;;  %v2590_v24 = vadd.f32 %v3743_v26, %v2268_v29 }
 0x1a4   : > { %v2837_v49 = vadd.f32 %v3769_v9, %v2586_v17  ;;  %v2489_v55 = vpop.f32.mrf.mxu1  ;;  %v2585_v9 = vadd.f32 %v2476_v47, %v2263_v1  ;;  %v1949_v47 = vadd.f32 %v4822_v32, %v4753_v46 }
 0x1a5   : > { %v2724_v3 = vpop.f32.mrf.mxu0  ;;  %v2588_v4 = vadd.f32 %v2489_v55, %v2266_v8 }
 0x1a6   : > { %v2872_v7 = vadd.f32 %v4918_v53, %v2837_v49  ;;  %v2835_v43 = vadd.f32 %v2724_v3, %v2584_v63  ;;  %v3744_v59 = vpop.f32.mrf.mxu1  ;;  %v2267_v49 = vadd.f32 %v4836_v30, %v1949_v47  ;;  %v2272_v3 = vadd.f32 %v4840_v0, %v1954_v14 }
 0x1a7   : > { %v3770_v56 = vpop.f32.mrf.mxu0  ;;  %v2591_v16 = vadd.f32 %v3744_v59, %v2269_v52  ;;  %v1955_v30 = vadd.f32 %v4834_v20, %v4762_v57  ;;  %v1953_v0 = vadd.f32 %v4838_v22, %v4765_v48 }
 0x1a8   : > { %2901 = vst.msk [vmem:[#allocation2 + $0x10] sm:$0xff] %vm2898_vm4, %v2872_v7  ;;  %v2870_v44 = vadd.f32 %v4918_v53, %v2835_v43  ;;  %v2838_v17 = vadd.f32 %v3770_v56, %v2587_v61  ;;  %v2492_v58 = vpop.f32.mrf.mxu1  ;;  %v2270_v43 = vadd.f32 %v4844_v31, %v1952_v50  ;;  %v1958_v31 = vadd.f32 %v4842_v60, %v4768_v28 }
 0x1a9   : > { %v2727_v37 = vpop.f32.mrf.mxu0  ;;  %v2589_v1 = vadd.f32 %v2492_v58, %v2267_v49  ;;  %v2271_v59 = vadd.f32 %v4852_v34, %v1953_v0  ;;  %v1959_v34 = vadd.f32 %v4850_v21, %v4774_v11  ;;  %v5236_v0 = vld [vmem:[#allocation5_spill] sm:$0xff] }
 0x1aa   : > { %2899 = vst.msk [vmem:[#allocation2] sm:$0xff] %vm2898_vm4, %v2870_v44  ;;  %v2873_v19 = vadd.f32 %v4918_v53, %v2838_v17  ;;  %v2836_v39 = vadd.f32 %v2727_v37, %v2585_v9  ;;  %v3747_v12 = vpop.f32.mrf.mxu1  ;;  %v2273_v9 = vadd.f32 %v4848_v33, %v1955_v30  ;;  %v1956_v33 = vadd.f32 %v4846_v18, %v4771_v62 }
 0x1ab   : > { %v3773_v35 = vpop.f32.mrf.mxu0  ;;  %v2594_v41 = vadd.f32 %v3747_v12, %v2272_v3 }
 0x1ac   : > { %2902 = vst.msk [vmem:[#allocation2 + $0x18] sm:$0xff] %vm2898_vm4, %v2873_v19  ;;  %v2871_v38 = vadd.f32 %v4918_v53, %v2836_v39  ;;  %v2841_v40 = vadd.f32 %v3773_v35, %v2590_v24  ;;  %v2505_v55 = vpop.f32.mrf.mxu1  ;;  %v2276_v19 = vadd.f32 %v4856_v27, %v1958_v31  ;;  %v2274_v35 = vadd.f32 %v4860_v2, %v1956_v33 }
 0x1ad   : > { %v2740_v63 = vpop.f32.mrf.mxu0  ;;  %v2592_v44 = vadd.f32 %v2505_v55, %v2270_v43  ;;  %v1957_v27 = vadd.f32 %v4854_v36, %v4777_v23  ;;  %v1962_v2 = vadd.f32 %v4858_v25, %v4780_v42 }
 0x1ae   : > { %2900 = vst.msk [vmem:[#allocation2 + $0x8] sm:$0xff] %vm2898_vm4, %v2871_v38  ;;  %v2876_v46 = vadd.f32 %v4918_v53, %v2841_v40  ;;  %v2839_v32 = vadd.f32 %v2740_v63, %v2588_v4  ;;  %v3748_v61 = vpop.f32.mrf.mxu1  ;;  %v2277_v40 = vadd.f32 %v4864_v51, %v1959_v34  ;;  %v5230_v51 = vld [vmem:[#allocation3_spill] sm:$0xff]  ;;  %v5243_v34 = vld [vmem:[#allocation20_spill] sm:$0xff] }
 0x1af   : > { %v3774_v26 = vpop.f32.mrf.mxu0  ;;  %v2595_v37 = vadd.f32 %v3748_v61, %v2273_v9  ;;  %v2275_v49 = vadd.f32 %v4868_v13, %v1957_v27  ;;  %v5233_v13 = vld [vmem:[#allocation4_spill] sm:$0xff] }
 0x1b0   : > { %2905 = vst.msk [vmem:[#allocation2 + $0x30] sm:$0xff] %vm2898_vm4, %v2876_v46  ;;  %v2874_v45 = vadd.f32 %v4918_v53, %v2839_v32  ;;  %v2842_v5 = vadd.f32 %v3774_v26, %v2591_v16  ;;  %v2508_v56 = vpop.f32.mrf.mxu1  ;;  %v5231_v46 = vld [vmem:[#allocation14_spill] sm:$0xff]  ;;  %v5232_v26 = vld [vmem:[#allocation17_spill] sm:$0xff] }
 0x1b1   : > { %v2743_v7 = vpop.f32.mrf.mxu0  ;;  %v2593_v39 = vadd.f32 %v2508_v56, %v2271_v59  ;;  %v1960_v32 = vadd.f32 %v5231_v46, %v5230_v51  ;;  %v2280_v3 = vadd.f32 %v5232_v26, %v1962_v2  ;;  %v5237_v56 = vld [vmem:[#allocation16_spill] sm:$0xff]  ;;  %v5239_v59 = vld [vmem:[#allocation6_spill] sm:$0xff]  ;;  %v5247_v2 = vld [vmem:[#allocation27_spill] sm:$0xff] }
 0x1b2   : > { %2903 = vst.msk [vmem:[#allocation2 + $0x20] sm:$0xff] %vm2898_vm4, %v2874_v45  ;;  %v2877_v10 = vadd.f32 %v4918_v53, %v2842_v5  ;;  %v2840_v15 = vadd.f32 %v2743_v7, %v2589_v1  ;;  %v3751_v17 = vpop.f32.mrf.mxu1  ;;  %v5234_v45 = vld [vmem:[#allocation15_spill] sm:$0xff] }
 0x1b3   : > { %v3777_v29 = vpop.f32.mrf.mxu0  ;;  %v2598_v52 = vadd.f32 %v3751_v17, %v2276_v19  ;;  %v1963_v5 = vadd.f32 %v5234_v45, %v5233_v13  ;;  %v5235_v7 = vld [vmem:[#allocation19_spill] sm:$0xff] }
 0x1b4   : > { %2906 = vst.msk [vmem:[#allocation2 + $0x38] sm:$0xff] %vm2898_vm4, %v2877_v10  ;;  %v2875_v57 = vadd.f32 %v4918_v53, %v2840_v15  ;;  %v2845_v20 = vadd.f32 %v3777_v29, %v2594_v41  ;;  %v2521_v8 = vpop.f32.mrf.mxu1  ;;  %v2278_v43 = vadd.f32 %v5235_v7, %v1960_v32  ;;  %v1961_v29 = vadd.f32 %v5237_v56, %v5236_v0 }
 0x1b5   : > { %v2756_v6 = vpop.f32.mrf.mxu0  ;;  %v2596_v14 = vadd.f32 %v2521_v8, %v2274_v35  ;;  %v5241_v8 = vld [vmem:[#allocation23_spill] sm:$0xff] }
 0x1b6   : > { %2904 = vst.msk [vmem:[#allocation2 + $0x28] sm:$0xff] %vm2898_vm4, %v2875_v57  ;;  %v2880_v48 = vadd.f32 %v4918_v53, %v2845_v20  ;;  %v2843_v22 = vadd.f32 %v2756_v6, %v2592_v44  ;;  %v3752_v47 = vpop.f32.mrf.mxu1  ;;  %v5238_v57 = vld [vmem:[#allocation21_spill] sm:$0xff] }
 0x1b7   : > { %v3778_v24 = vpop.f32.mrf.mxu0  ;;  %v2599_v16 = vadd.f32 %v3752_v47, %v2277_v40  ;;  %v2281_v20 = vadd.f32 %v5238_v57, %v1963_v5  ;;  %v5246_v40 = vld [vmem:[#allocation22_spill] sm:$0xff] }
 0x1b8   : > { %2909 = vst.msk [vmem:[#allocation2 + $0x50] sm:$0xff] %vm2898_vm4, %v2880_v48  ;;  %v2878_v28 = vadd.f32 %v4918_v53, %v2843_v22  ;;  %v2846_v60 = vadd.f32 %v3778_v24, %v2595_v37  ;;  %v2524_v4 = vpop.f32.mrf.mxu1  ;;  %v5240_v37 = vld [vmem:[#allocation18_spill] sm:$0xff]  ;;  %v2279_v24 = vadd.f32 %v5241_v8, %v1961_v29 }
 0x1b9   : > { %v2759_v58 = vpop.f32.mrf.mxu0  ;;  %v2597_v1 = vadd.f32 %v2524_v4, %v2275_v49  ;;  %v1966_v48 = vadd.f32 %v5240_v37, %v5239_v59 }
 0x1ba   : > { %2907 = vst.msk [vmem:[#allocation2 + $0x40] sm:$0xff] %vm2898_vm4, %v2878_v28  ;;  %v2881_v62 = vadd.f32 %v4918_v53, %v2846_v60  ;;  %v2844_v18 = vadd.f32 %v2759_v58, %v2593_v39  ;;  %v3755_v12 = vpop.f32.mrf.mxu1  ;;  %v5242_v60 = vld [vmem:[#allocation7_spill] sm:$0xff] }
 0x1bb   : > { %v3781_v38 = vpop.f32.mrf.mxu0  ;;  %v2602_v41 = vadd.f32 %v3755_v12, %v2280_v3  ;;  %v1964_v47 = vadd.f32 %v5243_v34, %v5242_v60 }
 0x1bc   : > { %2910 = vst.msk [vmem:[#allocation2 + $0x58] sm:$0xff] %vm2898_vm4, %v2881_v62  ;;  %v2879_v11 = vadd.f32 %v4918_v53, %v2844_v18  ;;  %v2849_v21 = vadd.f32 %v3781_v38, %v2598_v52  ;;  %v2537_v50 = vpop.f32.mrf.mxu1  ;;  %v5244_v52 = vld [vmem:[#allocation25_spill] sm:$0xff]  ;;  %v5245_v38 = vld [vmem:[#allocation8_spill] sm:$0xff] }
 0x1bd   : > { %v2772_v63 = vpop.f32.mrf.mxu0  ;;  %v2600_v31 = vadd.f32 %v2537_v50, %v2278_v43  ;;  %v2284_v62 = vadd.f32 %v5244_v52, %v1966_v48  ;;  %v2282_v12 = vadd.f32 %v5247_v2, %v1964_v47  ;;  %v5250_v50 = vld [vmem:[#allocation29_spill] sm:$0xff] }
 0x1be   : > { %2908 = vst.msk [vmem:[#allocation2 + $0x48] sm:$0xff] %vm2898_vm4, %v2879_v11  ;;  %v2884_v23 = vadd.f32 %v4918_v53, %v2849_v21  ;;  %v2847_v36 = vadd.f32 %v2772_v63, %v2596_v14  ;;  %v3756_v30 = vpop.f32.mrf.mxu1  ;;  %v1967_v14 = vadd.f32 %v5246_v40, %v5245_v38 }
 0x1bf   : > { %v3782_v55 = vpop.f32.mrf.mxu0  ;;  %v2603_v19 = vadd.f32 %v3756_v30, %v2281_v20  ;;  %v5253_v30 = vld [vmem:[#allocation31_spill] sm:$0xff] }
 0x1c0   : > { %2913 = vst.msk [vmem:[#allocation2 + $0x70] sm:$0xff] %vm2898_vm4, %v2884_v23  ;;  %v2882_v42 = vadd.f32 %v4918_v53, %v2847_v36  ;;  %v2850_v25 = vadd.f32 %v3782_v55, %v2599_v16  ;;  %v2540_v9 = vpop.f32.mrf.mxu1  ;;  %v5248_v23 = vld [vmem:[#allocation9_spill] sm:$0xff]  ;;  %v5249_v36 = vld [vmem:[#allocation24_spill] sm:$0xff]  ;;  %v2285_v55 = vadd.f32 %v5250_v50, %v1967_v14 }
 0x1c1   : > { %v2775_v61 = vpop.f32.mrf.mxu0  ;;  %v2601_v18 = vadd.f32 %v2540_v9, %v2279_v24  ;;  %v1965_v51 = vadd.f32 %v5249_v36, %v5248_v23  ;;  %v5256_v9 = vld [vmem:[#allocation33_spill] sm:$0xff] }
 0x1c2   : > { %2911 = vst.msk [vmem:[#allocation2 + $0x60] sm:$0xff] %vm2898_vm4, %v2882_v42  ;;  %v2885_v10 = vadd.f32 %v4918_v53, %v2850_v25  ;;  %v2848_v15 = vadd.f32 %v2775_v61, %v2597_v1  ;;  %v3759_v22 = vpop.f32.mrf.mxu1  ;;  %v5251_v42 = vld [vmem:[#allocation10_spill] sm:$0xff] }
 0x1c3   : > { %v3785_v44 = vpop.f32.mrf.mxu0  ;;  %v2606_v63 = vadd.f32 %v3759_v22, %v2284_v62  ;;  %v5252_v25 = vld [vmem:[#allocation26_spill] sm:$0xff]  ;;  %v2283_v61 = vadd.f32 %v5253_v30, %v1965_v51 }
 0x1c4   : > { %2914 = vst.msk [vmem:[#allocation2 + $0x78] sm:$0xff] %vm2898_vm4, %v2885_v10  ;;  %v2883_v17 = vadd.f32 %v4918_v53, %v2848_v15  ;;  %v2853_v6 = vadd.f32 %v3785_v44, %v2602_v41  ;;  %v2553_v58 = vpop.f32.mrf.mxu1  ;;  %v1970_v13 = vadd.f32 %v5252_v25, %v5251_v42  ;;  %v5254_v10 = vld [vmem:[#allocation11_spill] sm:$0xff]  ;;  %v5255_v15 = vld [vmem:[#allocation28_spill] sm:$0xff]  ;;  %v5259_v22 = vld [vmem:[#allocation34_spill] sm:$0xff] }
 0x1c5   : > { %v2788_v33 = vpop.f32.mrf.mxu0  ;;  %v2604_v26 = vadd.f32 %v2553_v58, %v2282_v12  ;;  %v1968_v0 = vadd.f32 %v5255_v15, %v5254_v10 }
 0x1c6   : > { %2912 = vst.msk [vmem:[#allocation2 + $0x68] sm:$0xff] %vm2898_vm4, %v2883_v17  ;;  %v2888_v39 = vadd.f32 %v4918_v53, %v2853_v6  ;;  %v2851_v28 = vadd.f32 %v2788_v33, %v2600_v31  ;;  %v3760_v11 = vpop.f32.mrf.mxu1  ;;  %v2288_v44 = vadd.f32 %v5256_v9, %v1970_v13  ;;  %v5257_v17 = vld [vmem:[#allocation12_spill] sm:$0xff]  ;;  %v5258_v6 = vld [vmem:[#allocation30_spill] sm:$0xff] }
 0x1c7   : > { %v3786_v35 = vpop.f32.mrf.mxu0  ;;  %v2607_v7 = vadd.f32 %v3760_v11, %v2285_v55  ;;  %v1971_v59 = vadd.f32 %v5258_v6, %v5257_v17  ;;  %v2286_v33 = vadd.f32 %v5259_v22, %v1968_v0 }
 0x1c8   : > { %2917 = vst.msk [vmem:[#allocation2 + $0x90] sm:$0xff] %vm2898_vm4, %v2888_v39  ;;  %v2886_v27 = vadd.f32 %v4918_v53, %v2851_v28  ;;  %v2854_v4 = vadd.f32 %v3786_v35, %v2603_v19  ;;  %v2556_v46 = vpop.f32.mrf.mxu1  ;;  %v5260_v39 = vld [vmem:[#allocation13_spill] sm:$0xff]  ;;  %v5261_v28 = vld [vmem:[#allocation32_spill] sm:$0xff] }
 0x1c9   : > { %v2791_v21 = vpop.f32.mrf.mxu0  ;;  %v2605_v57 = vadd.f32 %v2556_v46, %v2283_v61  ;;  %v1969_v60 = vadd.f32 %v5261_v28, %v5260_v39  ;;  %v2289_v47 = vadd.f32 %v4909_v54, %v1971_v59 }
 0x1ca   : > { %2915 = vst.msk [vmem:[#allocation2 + $0x80] sm:$0xff] %vm2898_vm4, %v2886_v27  ;;  %v2889_v49 = vadd.f32 %v4918_v53, %v2854_v4  ;;  %v2852_v16 = vadd.f32 %v2791_v21, %v2601_v18  ;;  %v3763_v45 = vpop.f32.mrf.mxu1  ;;  %v5262_v27 = vld [vmem:[#allocation35_spill] sm:$0xff] }
 0x1cb   : > { %v3789_v32 = vpop.f32.mrf.mxu0  ;;  %v2610_v8 = vadd.f32 %v3763_v45, %v2288_v44  ;;  %v2287_v4 = vadd.f32 %v5262_v27, %v1969_v60 }
 0x1cc   : > { %2918 = vst.msk [vmem:[#allocation2 + $0x98] sm:$0xff] %vm2898_vm4, %v2889_v49  ;;  %v2887_v3 = vadd.f32 %v4918_v53, %v2852_v16  ;;  %v2857_v1 = vadd.f32 %v3789_v32, %v2606_v63  ;;  %v2569_v56 = vpop.f32.mrf.mxu1 }
 0x1cd   : > { %v2804_v5 = vpop.f32.mrf.mxu0  ;;  %v2608_v58 = vadd.f32 %v2569_v56, %v2286_v33 }
 0x1ce   : > { %2916 = vst.msk [vmem:[#allocation2 + $0x88] sm:$0xff] %vm2898_vm4, %v2887_v3  ;;  %v2892_v43 = vadd.f32 %v4918_v53, %v2857_v1  ;;  %v2855_v41 = vadd.f32 %v2804_v5, %v2604_v26  ;;  %v3764_v37 = vpop.f32.mrf.mxu1 }
 0x1cf   : > { %v3790_v29 = vpop.f32.mrf.mxu0  ;;  %v2611_v38 = vadd.f32 %v3764_v37, %v2289_v47 }
 0x1d0   : > { %2921 = vst.msk [vmem:[#allocation2 + $0xb0] sm:$0xff] %vm2898_vm4, %v2892_v43  ;;  %v2890_v20 = vadd.f32 %v4918_v53, %v2855_v41  ;;  %v2858_v31 = vadd.f32 %v3790_v29, %v2607_v7  ;;  %v2572_v62 = vpop.f32.mrf.mxu1 }
 0x1d1   : > { %v2807_v48 = vpop.f32.mrf.mxu0  ;;  %v2609_v21 = vadd.f32 %v2572_v62, %v2287_v4 }
 0x1d2   : > { %2919 = vst.msk [vmem:[#allocation2 + $0xa0] sm:$0xff] %vm2898_vm4, %v2890_v20  ;;  %v2893_v24 = vadd.f32 %v4918_v53, %v2858_v31  ;;  %v2856_v19 = vadd.f32 %v2807_v48, %v2605_v57 }
 0x1d3   : > { %v3793_v34 = vpop.f32.mrf.mxu0 }
 0x1d4   : > { %2922 = vst.msk [vmem:[#allocation2 + $0xb8] sm:$0xff] %vm2898_vm4, %v2893_v24  ;;  %v2891_v35 = vadd.f32 %v4918_v53, %v2856_v19  ;;  %v2861_v52 = vadd.f32 %v3793_v34, %v2610_v8 }
 0x1d5   : > { %v2820_v18 = vpop.f32.mrf.mxu0 }
 0x1d6   : > { %2920 = vst.msk [vmem:[#allocation2 + $0xa8] sm:$0xff] %vm2898_vm4, %v2891_v35  ;;  %v2896_v40 = vadd.f32 %v4918_v53, %v2861_v52  ;;  %v2859_v14 = vadd.f32 %v2820_v18, %v2608_v58 }
 0x1d7   : > { %v3794_v11 = vpop.f32.mrf.mxu0 }
 0x1d8   : > { %2925 = vst.msk [vmem:[#allocation2 + $0xd0] sm:$0xff] %vm2898_vm4, %v2896_v40  ;;  %v2894_v54 = vadd.f32 %v4918_v53, %v2859_v14  ;;  %v2862_v2 = vadd.f32 %v3794_v11, %v2611_v38 }
 0x1d9   : > { %v2823_v12 = vpop.f32.mrf.mxu0 }
 0x1da   : > { %2923 = vst.msk [vmem:[#allocation2 + $0xc0] sm:$0xff] %vm2898_vm4, %v2894_v54  ;;  %v2897_v63 = vadd.f32 %v4918_v53, %v2862_v2  ;;  %v2860_v49 = vadd.f32 %v2823_v12, %v2609_v21 }
 0x1dc   : > { %2927 = vst.msk [vmem:[#allocation2 + $0xd8] sm:$0x3f] %vm2926_vm5, %v2897_v63  ;;  %v2895_v16 = vadd.f32 %v4918_v53, %v2860_v49 }
 0x1de   : > { %2924 = vst.msk [vmem:[#allocation2 + $0xc8] sm:$0xff] %vm2898_vm4, %v2895_v16 }
 0x1df LB: >> { %s3375_s7 = sshll.u32 %s3921_s6, 4  ;;  %s2933_s6 = sadd.s32 1, %s3921_s6   ;;  %s3921_s6 = sphi %s3919_s6, %s2933_s6  }
 0x1e0   : >> { %s3117_s9 = scalar_lea.vmem %s3999_s8, %s3375_s7  ;;  %s2935_s10 = scalar_lea.vmem [#allocation2], %s3375_s7 }
 0x1e1   : >> { %p2930_p4 = scmp.ge.s32.totalorder %s2933_s6, 14  }
 0x1e2   : > { %vm2970_vm6 = vcmask (%p2930_p4), 24576   ;;  %v3923_v8 = vmov (%p2930_p4), 0.0   ;;  %v3927_v24 = vmov (%p2930_p4), 0.0   ;;  %s5162_s12 = smov (%p2930_p4), 0  }
 0x1e3   : > { %2932 = sbr.rel (!%p2930_p4) target bundleno = 479 (0x1df), region = 114 }
 0x1e5   : >> { %v2936_v23 = vld [vmem:[%s2935_s10] sm:$0xff]  ;;  %v2937_v36 = vld [vmem:[%s2935_s10 + $0x8] sm:$0x3f] }
 0x1e6   : >> { %3377 = vst.msk [vmem:[%s3117_s9 + $0x11] sm:$0xff] %vm2898_vm4, %v2936_v23 }
 0x1e7   : >> { %3378 = vst.msk [vmem:[%s3117_s9 + $0x19] sm:$0x3f] %vm2926_vm5, %v2937_v36 }
 0x1ee   : > { %v3379_v53 = vld [vmem:[%s3999_s8 + $0x21] sm:$0xff]  ;;  %v3380_v51 = vld [vmem:[%s3999_s8 + $0x29] sm:$0x3f]  ;;  %v3381_v46 = vld [vmem:[%s3999_s8 + $0xd1] sm:$0xff] }
 0x1ef   : > { %2946 = vst.msk [vmem:[%s3999_s8 + $0x1] sm:$0xff] %vm2898_vm4, %v3379_v53  ;;  %3383 = vst.msk [vmem:[%s3999_s8 + $0xf1] sm:$0xff] %vm2898_vm4, %v3381_v46  ;;  %v3382_v32 = vld [vmem:[%s3999_s8 + $0xd9] sm:$0x3f]  ;;  %v2955_v50 = vld [vmem:[%s3999_s8 + $0x12] sm:$0x1] }
 0x1f0   : > { %2947 = vst.msk [vmem:[%s3999_s8 + $0x9] sm:$0x3f] %vm2926_vm5, %v3380_v51  ;;  %v2956_v55 = vld [vmem:[%s3999_s8 + $0x22] sm:$0x1]  ;;  %3384 = vst.msk [vmem:[%s3999_s8 + $0xf9] sm:$0x3f] %vm2926_vm5, %v3382_v32 }
 0x1f1   : > { %2972 = vst.msk [vmem:[%s3999_s8 + $0x10] sm:$0x1] %vm2970_vm6, %v2955_v50  ;;  %2973 = vst.msk [vmem:[%s3999_s8 + $0x20] sm:$0x1] %vm2970_vm6, %v2956_v55  ;;  %v2957_v26 = vld [vmem:[%s3999_s8 + $0x32] sm:$0x1] }
 0x1f2   : > { %v2958_v3 = vld [vmem:[%s3999_s8 + $0x42] sm:$0x1]  ;;  %v2959_v1 = vld [vmem:[%s3999_s8 + $0x52] sm:$0x1]  ;;  %2974 = vst.msk [vmem:[%s3999_s8 + $0x30] sm:$0x1] %vm2970_vm6, %v2957_v26 }
 0x1f3   : > { %2975 = vst.msk [vmem:[%s3999_s8 + $0x40] sm:$0x1] %vm2970_vm6, %v2958_v3  ;;  %2976 = vst.msk [vmem:[%s3999_s8 + $0x50] sm:$0x1] %vm2970_vm6, %v2959_v1  ;;  %v2960_v42 = vld [vmem:[%s3999_s8 + $0x62] sm:$0x1] }
 0x1f4   : > { %v2961_v25 = vld [vmem:[%s3999_s8 + $0x72] sm:$0x1]  ;;  %v2962_v13 = vld [vmem:[%s3999_s8 + $0x82] sm:$0x1]  ;;  %2977 = vst.msk [vmem:[%s3999_s8 + $0x60] sm:$0x1] %vm2970_vm6, %v2960_v42 }
 0x1f5   : > { %2978 = vst.msk [vmem:[%s3999_s8 + $0x70] sm:$0x1] %vm2970_vm6, %v2961_v25  ;;  %2979 = vst.msk [vmem:[%s3999_s8 + $0x80] sm:$0x1] %vm2970_vm6, %v2962_v13  ;;  %v2963_v45 = vld [vmem:[%s3999_s8 + $0x92] sm:$0x1] }
 0x1f6   : > { %v2964_v5 = vld [vmem:[%s3999_s8 + $0xa2] sm:$0x1]  ;;  %v2965_v30 = vld [vmem:[%s3999_s8 + $0xb2] sm:$0x1]  ;;  %2980 = vst.msk [vmem:[%s3999_s8 + $0x90] sm:$0x1] %vm2970_vm6, %v2963_v45 }
 0x1f7   : > { %2981 = vst.msk [vmem:[%s3999_s8 + $0xa0] sm:$0x1] %vm2970_vm6, %v2964_v5  ;;  %2982 = vst.msk [vmem:[%s3999_s8 + $0xb0] sm:$0x1] %vm2970_vm6, %v2965_v30  ;;  %v2966_v61 = vld [vmem:[%s3999_s8 + $0xc2] sm:$0x1] }
 0x1f8   : > { %v2967_v7 = vld [vmem:[%s3999_s8 + $0xd2] sm:$0x1]  ;;  %v2968_v43 = vld [vmem:[%s3999_s8 + $0xe2] sm:$0x1]  ;;  %2983 = vst.msk [vmem:[%s3999_s8 + $0xc0] sm:$0x1] %vm2970_vm6, %v2966_v61 }
 0x1f9   : > { %2984 = vst.msk [vmem:[%s3999_s8 + $0xd0] sm:$0x1] %vm2970_vm6, %v2967_v7  ;;  %2985 = vst.msk [vmem:[%s3999_s8 + $0xe0] sm:$0x1] %vm2970_vm6, %v2968_v43  ;;  %v2988_v41 = vld [vmem:[%s3999_s8 + $0x1d] sm:$0x1] }
 0x1fa   : > { %v2989_v10 = vld [vmem:[%s3999_s8 + $0x2d] sm:$0x1]  ;;  %v2990_v15 = vld [vmem:[%s3999_s8 + $0x3d] sm:$0x1]  ;;  %3004 = vst.msk [vmem:[%s3999_s8 + $0x1f] sm:$0x1] %vm2970_vm6, %v2988_v41 }
 0x1fb   : > { %3005 = vst.msk [vmem:[%s3999_s8 + $0x2f] sm:$0x1] %vm2970_vm6, %v2989_v10  ;;  %3006 = vst.msk [vmem:[%s3999_s8 + $0x3f] sm:$0x1] %vm2970_vm6, %v2990_v15  ;;  %v2991_v0 = vld [vmem:[%s3999_s8 + $0x4d] sm:$0x1] }
 0x1fc   : > { %v2992_v56 = vld [vmem:[%s3999_s8 + $0x5d] sm:$0x1]  ;;  %v2993_v29 = vld [vmem:[%s3999_s8 + $0x6d] sm:$0x1]  ;;  %v2954_v9 = vld [vmem:[%s3999_s8 + $0x2] sm:$0x1] }
 0x1fd   : > { %v2969_v44 = vld [vmem:[%s3999_s8 + $0xf2] sm:$0x1]  ;;  %v2987_v57 = vld [vmem:[%s3999_s8 + $0xd] sm:$0x1]  ;;  %3007 = vst.msk [vmem:[%s3999_s8 + $0x4f] sm:$0x1] %vm2970_vm6, %v2991_v0 }
 0x1fe   : > { %3008 = vst.msk [vmem:[%s3999_s8 + $0x5f] sm:$0x1] %vm2970_vm6, %v2992_v56  ;;  %3009 = vst.msk [vmem:[%s3999_s8 + $0x6f] sm:$0x1] %vm2970_vm6, %v2993_v29  ;;  %v2994_v20 = vld [vmem:[%s3999_s8 + $0x7d] sm:$0x1] }
 0x1ff   : > { %2971 = vst.msk [vmem:[%s3999_s8] sm:$0x1] %vm2970_vm6, %v2954_v9  ;;  %2986 = vst.msk [vmem:[%s3999_s8 + $0xf0] sm:$0x1] %vm2970_vm6, %v2969_v44  ;;  %v2995_v31 = vld [vmem:[%s3999_s8 + $0x8d] sm:$0x1] }
 0x200   : > { %3003 = vst.msk [vmem:[%s3999_s8 + $0xf] sm:$0x1] %vm2970_vm6, %v2987_v57  ;;  %v2996_v17 = vld [vmem:[%s3999_s8 + $0x9d] sm:$0x1]  ;;  %3010 = vst.msk [vmem:[%s3999_s8 + $0x7f] sm:$0x1] %vm2970_vm6, %v2994_v20 }
 0x201   : > { %3011 = vst.msk [vmem:[%s3999_s8 + $0x8f] sm:$0x1] %vm2970_vm6, %v2995_v31  ;;  %3012 = vst.msk [vmem:[%s3999_s8 + $0x9f] sm:$0x1] %vm2970_vm6, %v2996_v17  ;;  %v2997_v6 = vld [vmem:[%s3999_s8 + $0xad] sm:$0x1] }
 0x202   : > { %v2998_v59 = vld [vmem:[%s3999_s8 + $0xbd] sm:$0x1]  ;;  %v2999_v37 = vld [vmem:[%s3999_s8 + $0xcd] sm:$0x1]  ;;  %3013 = vst.msk [vmem:[%s3999_s8 + $0xaf] sm:$0x1] %vm2970_vm6, %v2997_v6 }
 0x203   : > { %3014 = vst.msk [vmem:[%s3999_s8 + $0xbf] sm:$0x1] %vm2970_vm6, %v2998_v59  ;;  %3015 = vst.msk [vmem:[%s3999_s8 + $0xcf] sm:$0x1] %vm2970_vm6, %v2999_v37  ;;  %v3000_v48 = vld [vmem:[%s3999_s8 + $0xdd] sm:$0x1] }
 0x204   : > { %v3001_v22 = vld [vmem:[%s3999_s8 + $0xed] sm:$0x1]  ;;  %v3002_v33 = vld [vmem:[%s3999_s8 + $0xfd] sm:$0x1]  ;;  %3016 = vst.msk [vmem:[%s3999_s8 + $0xdf] sm:$0x1] %vm2970_vm6, %v3000_v48 }
 0x205   : > { %3017 = vst.msk [vmem:[%s3999_s8 + $0xef] sm:$0x1] %vm2970_vm6, %v3001_v22  ;;  %3018 = vst.msk [vmem:[%s3999_s8 + $0xff] sm:$0x1] %vm2970_vm6, %v3002_v33 }
 0x206 LB: >> { %s3385_s13 = sshll.u32 %s3933_s12, 4  ;;  %s3024_s12 = sadd.s32 1, %s3933_s12   ;;  %s3933_s12 = sphi %s5162_s12, %s3024_s12   ;;  %v3929_v24 = vphi %v3927_v24, %v3928_v24   ;;  %v3925_v8 = vphi %v3923_v8, %v3924_v8  }
 0x207   : >> { %s3028_s15 = scalar_lea.vmem %s3999_s8, %s3385_s13  ;;  %p3021_p5 = scmp.ge.s32.totalorder %s3024_s12, 16  }
 0x20c   : >> { %v3029_v19 = vld [vmem:[%s3028_s15] sm:$0xff]  ;;  %v3030_v39 = vld [vmem:[%s3028_s15 + $0x8] sm:$0xff] }
 0x20d   : >> { %v3031_v28 = vsel %vm2898_vm4, %v3029_v19, 0.0  ;;  %v3032_v60 = vsel %vm2898_vm4, %v3030_v39, 0.0  ;;  %v3041_v34 = vmul.f32 %v3029_v19, %v3029_v19  ;;  %v3042_v47 = vmul.f32 %v3030_v39, %v3030_v39 }
 0x20e   : >> { %v3033_v58 = vadd.f32 %v3032_v60, %v3031_v28 }
 0x20f   : >> { %v3043_v35 = vsel %vm2898_vm4, %v3041_v34, 0.0  ;;  %v3044_v52 = vsel %vm2898_vm4, %v3042_v47, 0.0 }
 0x210   : >> { %v3034_v62 = vrot.slane %v3033_v58, 4  ;;  %v3045_v18 = vadd.f32 %v3044_v52, %v3043_v35 }
 0x212   : >> { %v3035_v27 = vadd.f32 %v3034_v62, %v3033_v58  ;;  %v3046_v4 = vrot.slane %v3045_v18, 4 }
 0x214   : >> { %v3036_v38 = vrot.slane %v3035_v27, 2  ;;  %v3047_v40 = vadd.f32 %v3046_v4, %v3045_v18 }
 0x216   : >> { %v3037_v14 = vadd.f32 %v3036_v38, %v3035_v27  ;;  %v3048_v11 = vrot.slane %v3047_v40, 2 }
 0x218   : >> { %v3038_v21 = vrot.slane %v3037_v14, 1  ;;  %v3049_v54 = vadd.f32 %v3048_v11, %v3047_v40 }
 0x21a   : >> { %v3039_v2 = vadd.f32 %v3038_v21, %v3037_v14  ;;  %v3050_v12 = vrot.slane %v3049_v54, 1 }
 0x21c   : >> { %v3040_v63 = vadd.f32 %v3929_v24, %v3039_v2   ;;  %v3051_v49 = vadd.f32 %v3050_v12, %v3049_v54  ;;  %3023 = sbr.rel (!%p3021_p5) target bundleno = 518 (0x206), region = 125 }
 0x21e   : >> { %v3052_v16 = vadd.f32 %v3925_v8, %v3051_v49   ;;  %v3928_v24 = vmov %v3040_v63   ;;  %3053 = vst.msk [vmem:[%s238_s11] sm:$0x1] (%p3021_p5), %vm2970_vm6, %v3040_v63 }
 0x220   : >> { %v3924_v8 = vmov %v3052_v16   ;;  %3054 = vst.msk [vmem:[%s241_s14] sm:$0x1] (%p3021_p5), %vm2970_vm6, %v3052_v16 }
 0x221 PF: > { %s16_s18 = sadd.s32 1, %s3917_s18  }
 0x222   : > { %p13_p6 = scmp.ge.s32.totalorder %s16_s18, 4  }
 0x224   :  { %15 = sbr.rel (!%p13_p6) target bundleno = 1 (0x1), region = 136 }

// kernel: downblock_forward.6
= control target key start
LH: loop header
LB: loop body
LE: loop exit
PB: predicated region body
PF: predicated region fallthrough
CT: control target
= control target key end

     0   :  { %s3964_s18 = smov 0   ;;  %s5190_s0 = inlined_call_operand.vmem [shape: bf16[2,256,4], index: 0, kind: input, shape index: {}]   ;;  %s5191_s1 = inlined_call_operand.vmem [shape: bf16[9,4,4], index: 1, kind: input, shape index: {}]   ;;  %s5192_s2 = inlined_call_operand.vmem [shape: f32[1,4], index: 2, kind: input, shape index: {}]   ;;  %s5193_s3 = inlined_call_operand.vmem [shape: f32[2,16,16,4], index: 3, kind: output, shape index: {0}]   ;;  %s5194_s4 = inlined_call_operand.vmem [shape: f32[2,1,4], index: 4, kind: output, shape index: {1}]   ;;  %s5195_s5 = inlined_call_operand.vmem [shape: f32[2,1,4], index: 5, kind: output, shape index: {2}]  }
   0x1 LB: > { %s3182_s19 = sadd.s32 4294967295, %s3916_s18   ;;  %p3186_p0 = scmp.ge.s32.totalorder %s3916_s18, 1  ;;  %s3916_s18 = sphi %s3964_s18, %s16_s18  }
   0x2   : > { %p192_p1 = scmp.lt.s32.totalorder %s3916_s18, 3 }
   0x4   : > { %p193_p2 = pnand %p3186_p0, %p192_p1 }
   0x6   : > { %196 = sbr.rel (%p193_p2) target bundleno = 545 (0x221), region = 32 }
   0xb   : > { %v3191_v0 = vld [vmem:[%s5191_s1 + $0x2] sm:$0x3]  ;;  %vm500_vm0 = vcmask 1041408   ;;  %p226_p3 = scmp.lt.s32.totalorder %s3182_s19, 1  ;;  %v3235_v2 = vld [vmem:[%s5191_s1 + $0x4] sm:$0x3] }
   0xc   : > { %3796 = vmatprep.subr.msk.bf16.mxu0 %vm500_vm0, %v3191_v0  ;;  %3797 = vmatprep.subr.msk.bf16.mxu1 %vm500_vm0, %v3191_v0  ;;  %v502_v1 = vsel %vm500_vm0, %v3191_v0, 0  ;;  %v271_v3 = vld [vmem:[%s5191_s1] sm:$0x3]  ;;  %vm345_vm1 = vsmask.f32 7424  ;;  %vm457_vm2 = vcmask 31744  }
   0xd   : > { %3525 = vmatpush3.bf16.msra.mxu0 %v502_v1  ;;  %3795 = vmatpush3.bf16.msra.mxu1 %v502_v1  ;;  %s5265_s19 = smov (!%p226_p3, %s3182_s19), 1  ;;  %v906_v8 = vsel %vm500_vm0, %v3235_v2, 0  ;;  %v682_v16 = vsel %vm500_vm0, %v271_v3, 0  ;;  %v4051_v33 = vld [vmem:[%s5191_s1 + $0x8] sm:$0x3]  ;;  %vm835_vm3 = vcmask 1046528  }
   0xe   : > { %3799 = vmatprep.subr.msk.bf16.mxu0 %vm500_vm0, %v3235_v2  ;;  %3798 = vmatprep.subr.msk.bf16.mxu1 %vm500_vm0, %v271_v3  ;;  %s3387_s26 = sshll.u32 %s5265_s19, 7  ;;  %s3388_s27 = sshll.u32 %s5265_s19, 8  ;;  %v4071_v45 = vld [vmem:[%s5191_s1 + $0x6] sm:$0x3]  ;;  %vm2925_vm4 = vcmask 29696  }
   0xf   : > { %s3993_s30 = scalar_lea.vmem %s5190_s0, %s3387_s26  ;;  %s3998_s8 = scalar_lea.vmem %s5193_s3, %s3388_s27 }
  0x10   : > { %s238_s11 = scalar_lea.vmem %s5194_s4, %s5265_s19  ;;  %s241_s14 = scalar_lea.vmem %s5195_s5, %s5265_s19  ;;  %v243_v4 = vld [vmem:[%s3993_s30] sm:$0xf]  ;;  %v4010_v5 = vld [vmem:[%s3993_s30 + $0x4] sm:$0xf]  ;;  %v4016_v7 = vld [vmem:[%s3993_s30 + $0x8] sm:$0xff]  }
  0x11   : > { %v4013_v6 = vcombine.low %v243_v4, %v4010_v5  ;;  %v354_v11 = vshll.u32 %v4016_v7, 16  ;;  %v358_v12 = vshrl.u32 %v4016_v7, 16  ;;  %v4024_v13 = vld [vmem:[%s3993_s30 + $0x40] sm:$0xff]   ;;  %v4027_v14 = vld [vmem:[%s3993_s30 + $0x48] sm:$0xff]   ;;  %v4030_v15 = vld [vmem:[%s3993_s30 + $0x10] sm:$0xff]   ;;  %s3918_s6 = smov 0  }
  0x12   : > { %v410_v19 = vshll.u32 %v4024_v13, 16  ;;  %v414_v20 = vshrl.u32 %v4024_v13, 16  ;;  %v418_v21 = vshll.u32 %v4027_v14, 16  ;;  %v422_v22 = vshrl.u32 %v4027_v14, 16  ;;  %v4039_v24 = vld [vmem:[%s3993_s30 + $0x50] sm:$0xff]   ;;  %v4044_v28 = vld [vmem:[%s3993_s30 + $0x18] sm:$0xff]  }
  0x13   : > { %v347_v9 = vshrl.u32 %v4013_v6, 16  ;;  %v349_v10 = vshll.u32 %v4013_v6, 16  ;;  %v356_v18 = vrot.slane %v354_v11, 1  ;;  %v362_v23 = vshll.u32 %v4030_v15, 16  ;;  %v4057_v37 = vld [vmem:[%s3993_s30 + $0x58] sm:$0xff]   ;;  %v4061_v39 = vld [vmem:[%s3993_s30 + $0x20] sm:$0xff]  }
  0x14   : > { %v4041_v27 = vrot.slane %v410_v19, 1  ;;  %v420_v29 = vrot.slane %v418_v21, 1  ;;  %v426_v31 = vshll.u32 %v4039_v24, 16  ;;  %v366_v32 = vshrl.u32 %v4030_v15, 16  ;;  %v4066_v44 = vld [vmem:[%s3993_s30 + $0x60] sm:$0xff]   ;;  %v4078_v50 = vld [vmem:[%s3993_s30 + $0x28] sm:$0xff]  }
  0x15   : > { %v351_v17 = vrot.slane %v349_v10, 1  ;;  %v360_v26 = vor.u32 %v358_v12, %v356_v18  ;;  %v364_v30 = vrot.slane %v362_v23, 1  ;;  %v370_v36 = vshll.u32 %v4044_v28, 16  ;;  %v4088_v59 = vld [vmem:[%s3993_s30 + $0x68] sm:$0xf]  ;;  %v4112_v19 = vld [vmem:[%s3993_s30 + $0x38] sm:$0xff]  }
  0x16   : > { %v416_v35 = vor.u32 %v414_v20, %v4041_v27  ;;  %v430_v38 = vshrl.u32 %v4039_v24, 16  ;;  %v424_v40 = vor.u32 %v422_v22, %v420_v29  ;;  %v428_v42 = vrot.slane %v426_v31, 1  ;;  %v272_v63 = vld [vmem:[%s3993_s30 + $0x6c] sm:$0xf]  ;;  %v829_v31 = vld [vmem:[%s3993_s30] sm:$0xe] }
  0x17   : > { %v352_v25 = vor.u32 %v351_v17, %v347_v9  ;;  %v365_v41 = vsel %vm345_vm1, %v360_v26, %v364_v30  ;;  %v368_v43 = vor.u32 %v366_v32, %v364_v30  ;;  %v372_v47 = vrot.slane %v370_v36, 1 }
  0x18   : > { %v421_v46 = vsel %vm345_vm1, %v416_v35, %v420_v29  ;;  %v434_v48 = vshll.u32 %v4057_v37, 16  ;;  %v374_v49 = vshrl.u32 %v4044_v28, 16  ;;  %v429_v51 = vsel %vm345_vm1, %v424_v40, %v428_v42 }
  0x19   : > { %v357_v34 = vsel %vm345_vm1, %v352_v25, %v356_v18  ;;  %3542 = vmatprep.mubr.msk.bf16.mxu1 %vm457_vm2, %v421_v46  ;;  %v432_v52 = vor.u32 %v430_v38, %v428_v42  ;;  %v378_v53 = vshll.u32 %v4061_v39, 16  ;;  %v438_v54 = vshrl.u32 %v4057_v37, 16 }
  0x1a   : > { %3526 = vmatprep.mubr.msk.bf16.mxu0 %vm457_vm2, %v357_v34  ;;  %3543 = vmatmul.mubr.msk.bf16.vlgmr.msra.gmra.mxu1 %vm457_vm2, %v429_v51  ;;  %v373_v55 = vsel %vm345_vm1, %v368_v43, %v372_v47  ;;  %v436_v56 = vrot.slane %v434_v48, 1  ;;  %v376_v57 = vor.u32 %v374_v49, %v372_v47  ;;  %v442_v58 = vshll.u32 %v4066_v44, 16 }
  0x1b   : > { %3527 = vmatmul.mubr.msk.bf16.vlgmr.msra.gmra.mxu0 %vm457_vm2, %v365_v41  ;;  %3555 = vmatpush3.bf16.msra.mxu1 %v682_v16  ;;  %v380_v60 = vrot.slane %v378_v53, 1  ;;  %v382_v61 = vshrl.u32 %v4061_v39, 16  ;;  %v386_v62 = vshll.u32 %v4078_v50, 16  ;;  %v446_v0 = vshrl.u32 %v4066_v44, 16 }
  0x1c   : > { %3585 = vmatpush3.bf16.msra.mxu0 %v906_v8  ;;  %3530 = vmatprep.mubr.msk.bf16.mxu0 %vm457_vm2, %v373_v55  ;;  %v437_v1 = vsel %vm345_vm1, %v432_v52, %v436_v56  ;;  %v440_v2 = vor.u32 %v438_v54, %v436_v56  ;;  %v444_v3 = vrot.slane %v442_v58, 1  ;;  %v4099_v4 = vcombine.low %v4088_v59, %v272_v63  ;;  %v4102_v8 = vld [vmem:[%s3993_s30 + $0x30] sm:$0xff]   ;;  %v4146_v52 = vld [vmem:[%s5191_s1 + $0xa] sm:$0x3] }
  0x1d   : > { %3801 = vmatprep.subr.msk.bf16.mxu0 %vm500_vm0, %v4051_v33  ;;  %3800 = vmatprep.subr.msk.bf16.mxu1 %vm500_vm0, %v4071_v45  ;;  %v381_v9 = vsel %vm345_vm1, %v376_v57, %v380_v60  ;;  %v384_v10 = vor.u32 %v382_v61, %v380_v60  ;;  %v388_v11 = vrot.slane %v386_v62, 1  ;;  %v390_v12 = vshrl.u32 %v4078_v50, 16 }
  0x1e   : > { %3546 = vmatprep.mubr.msk.bf16.mxu1 %vm457_vm2, %v437_v1  ;;  %v448_v16 = vor.u32 %v446_v0, %v444_v3  ;;  %v450_v17 = vshll.u32 %v4099_v4, 16  ;;  %v394_v18 = vshll.u32 %v4102_v8, 16  ;;  %v445_v20 = vsel %vm345_vm1, %v440_v2, %v444_v3  ;;  %v1081_v0 = vld [vmem:[%s3993_s30 + $0x8] sm:$0xf]  ;;  %v4207_v1 = vld [vmem:[%s3993_s30 + $0xc] sm:$0xf] }
  0x1f   : > { %v389_v21 = vsel %vm345_vm1, %v384_v10, %v388_v11  ;;  %v398_v22 = vshrl.u32 %v4102_v8, 16  ;;  %v402_v26 = vshll.u32 %v4112_v19, 16  ;;  %v392_v29 = vor.u32 %v390_v12, %v388_v11  ;;  %v4221_v10 = vld [vmem:[%s3993_s30 + $0x10] sm:$0xff]  }
  0x20   : > { %v452_v23 = vrot.slane %v450_v17, 1  ;;  %v396_v25 = vrot.slane %v394_v18, 1  ;;  %v454_v30 = vshrl.u32 %v4099_v4, 16  ;;  %v406_v38 = vshrl.u32 %v4112_v19, 16 }
  0x21   : > { %v404_v35 = vrot.slane %v402_v26, 1  ;;  %v3236_v42 = vcombine.low %v829_v31, %v4010_v5  ;;  %v837_v47 = vrot.slane %v4016_v7, 1  ;;  %v1224_v5 = vsel %vm500_vm0, %v4071_v45, 0 }
  0x22   : > { %3547 = vmatmul.mubr.msk.bf16.gmra.mxu1 %vm457_vm2, %v445_v20  ;;  %v453_v32 = vsel %vm345_vm1, %v448_v16, %v452_v23  ;;  %v400_v34 = vor.u32 %v398_v22, %v396_v25  ;;  %v397_v36 = vsel %vm345_vm1, %v392_v29, %v396_v25  ;;  %v456_v40 = vor.u32 %v454_v30, %v452_v23  ;;  %v4246_v30 = vld [vmem:[%s3993_s30 + $0x28] sm:$0xff]  }
  0x23   : > { %3531 = vmatmul.mubr.msk.bf16.gmra.mxu0 %vm457_vm2, %v381_v9  ;;  %3550 = vmatprep.mubr.msk.bf16.mxu1 %vm457_vm2, %v453_v32  ;;  %v408_v43 = vor.u32 %v406_v38, %v404_v35  ;;  %v836_v46 = vrot.slane %v3236_v42, 1  ;;  %v839_v51 = vrot.slane %v4030_v15, 1  ;;  %v1546_v45 = vsel %vm500_vm0, %v4051_v33, 0  ;;  %v4252_v32 = vld [vmem:[%s5191_s1 + $0xe] sm:$0x3] }
  0x24   : > { %3534 = vmatprep.mubr.msk.bf16.mxu0 %vm457_vm2, %v389_v21  ;;  %v405_v41 = vsel %vm345_vm1, %v400_v34, %v404_v35  ;;  %v845_v54 = vrot.slane %v4078_v50, 1  ;;  %v847_v56 = vrot.slane %v4102_v8, 1  ;;  %v851_v58 = vrot.slane %v4024_v13, 1 }
  0x25   : > { %v413_v48 = vsel %vm345_vm1, %v408_v43, %v4041_v27  ;;  %v838_v49 = vsel %vm835_vm3, %v836_v46, %v837_v47  ;;  %v840_v27 = vsel %vm835_vm3, %v837_v47, %v839_v51  ;;  %v855_v62 = vrot.slane %v4039_v24, 1 }
  0x26   : > { %v857_v63 = vrot.slane %v4057_v37, 1  ;;  %v3252_v3 = vcombine.low %v1081_v0, %v4207_v1  ;;  %v1415_v21 = vshrl.u32 %v4221_v10, 16  ;;  %v1797_v26 = vsel %vm500_vm0, %v4146_v52, 0 }
  0x27   : > { %v1432_v38 = vshll.u32 %v4246_v30, 16  ;;  %v1436_v46 = vshrl.u32 %v4246_v30, 16 }
  0x28   : > { %v858_v2 = vsel %vm835_vm3, %v855_v62, %v857_v63  ;;  %v1407_v9 = vshll.u32 %v3252_v3, 16  ;;  %v1405_v17 = vshrl.u32 %v3252_v3, 16 }
  0x2a   : > { %3551 = vmatmul.mubr.msk.bf16.gmra.mxu1 %vm457_vm2, %v456_v40  ;;  %v1409_v18 = vrot.slane %v1407_v9, 1 }
  0x2b   : > { %3535 = vmatmul.mubr.msk.bf16.gmra.mxu0 %vm457_vm2, %v397_v36  ;;  %3556 = vmatprep.mubr.msk.bf16.mxu1 %vm457_vm2, %v4013_v6  ;;  %v841_v6 = vrot.slane %v4044_v28, 1  ;;  %v4259_v36 = vld [vmem:[%s3993_s30 + $0x30] sm:$0xff]  }
  0x2c   : > { %3538 = vmatprep.mubr.msk.bf16.mxu0 %vm457_vm2, %v405_v41  ;;  %v1439_v47 = vshll.u32 %v4259_v36, 16 }
  0x2d   : > { %v842_v53 = vsel %vm835_vm3, %v839_v51, %v841_v6 }
  0x32   : > { %3557 = vmatmul.mubr.msk.bf16.vlgmr.msra.gmra.mxu1 %vm457_vm2, %v4016_v7  ;;  %v4162_v7 = vld [vmem:[%s5191_s1 + $0xc] sm:$0x3] }
  0x33   : > { %3539 = vmatmul.mubr.msk.bf16.gmra.mxu0 %vm457_vm2, %v413_v48  ;;  %3615 = vmatpush3.bf16.msra.mxu1 %v1224_v5  ;;  %v2115_v42 = vsel %vm500_vm0, %v4162_v7, 0  ;;  %v4274_v48 = vld [vmem:[%s5191_s1 + $0x10] sm:$0x3]  ;;  %v4278_v5 = vld [vmem:[%s3993_s30 + $0x38] sm:$0xff]  }
  0x34   : > { %3586 = vmatprep.mubr.msk.bf16.mxu0 %vm457_vm2, %v838_v49  ;;  %3560 = vmatprep.mubr.msk.bf16.mxu1 %vm457_vm2, %v4030_v15  ;;  %v843_v15 = vrot.slane %v4061_v39, 1  ;;  %v1434_v49 = vrot.slane %v1432_v38, 1 }
  0x35   : > { %3802 = vmatprep.subr.msk.bf16.mxu1 %vm500_vm0, %v4146_v52 }
  0x36   : > { %v844_v33 = vsel %vm835_vm3, %v841_v6, %v843_v15  ;;  %v846_v55 = vsel %vm835_vm3, %v843_v15, %v845_v54  ;;  %v1438_v52 = vor.u32 %v1436_v46, %v1434_v49  ;;  %v1441_v6 = vrot.slane %v1439_v47, 1 }
  0x38   : > { %v1442_v15 = vsel %vm345_vm1, %v1438_v52, %v1441_v6  ;;  %v1728_v52 = vrot.slane %v4221_v10, 1 }
  0x3a   : > { %3561 = vmatmul.mubr.msk.bf16.gmra.mxu1 %vm457_vm2, %v4044_v28  ;;  %v849_v28 = vrot.slane %v4112_v19, 1 }
  0x3b   : > { %3587 = vmatmul.mubr.msk.bf16.vlgmr.msra.gmra.mxu0 %vm457_vm2, %v840_v27  ;;  %3564 = vmatprep.mubr.msk.bf16.mxu1 %vm457_vm2, %v4061_v39  ;;  %v848_v39 = vsel %vm835_vm3, %v845_v54, %v847_v56  ;;  %v4288_v27 = vld [vmem:[%s3993_s30 + $0x40] sm:$0xff]   ;;  %v1450_v54 = vshrl.u32 %v4278_v5, 16 }
  0x3c   : > { %3645 = vmatpush3.bf16.msra.mxu0 %v1546_v45  ;;  %3590 = vmatprep.mubr.msk.bf16.mxu0 %vm457_vm2, %v842_v53  ;;  %v850_v57 = vsel %vm835_vm3, %v847_v56, %v849_v28  ;;  %v852_v60 = vsel %vm835_vm3, %v849_v28, %v851_v58  ;;  %v1446_v45 = vshll.u32 %v4278_v5, 16  ;;  %v4298_v56 = vld [vmem:[%s3993_s30 + $0x48] sm:$0xff]  }
  0x3d   : > { %3803 = vmatprep.subr.msk.bf16.mxu0 %vm500_vm0, %v4162_v7  ;;  %v1443_v7 = vshrl.u32 %v4259_v36, 16 }
  0x3f   : > { %v1445_v28 = vor.u32 %v1443_v7, %v1441_v6 }
  0x42   : > { %3565 = vmatmul.mubr.msk.bf16.gmra.mxu1 %vm457_vm2, %v4078_v50  ;;  %v853_v50 = vrot.slane %v4027_v14, 1 }
  0x43   : > { %3591 = vmatmul.mubr.msk.bf16.gmra.mxu0 %vm457_vm2, %v844_v33  ;;  %3568 = vmatprep.mubr.msk.bf16.mxu1 %vm457_vm2, %v4102_v8  ;;  %v861_v8 = vrot.slane %v4099_v4, 1  ;;  %v4229_v4 = vld [vmem:[%s3993_s30 + $0x18] sm:$0xff]   ;;  %v1453_v33 = vshll.u32 %v4288_v27, 16 }
  0x44   : > { %3594 = vmatprep.mubr.msk.bf16.mxu0 %vm457_vm2, %v846_v55  ;;  %v854_v61 = vsel %vm835_vm3, %v851_v58, %v853_v50  ;;  %v1418_v20 = vshll.u32 %v4229_v4, 16  ;;  %v1422_v23 = vshrl.u32 %v4229_v4, 16  ;;  %v1448_v55 = vrot.slane %v1446_v45, 1  ;;  %v4306_v58 = vld [vmem:[%s3993_s30 + $0x50] sm:$0xff]  }
  0x46   : > { %v1420_v29 = vrot.slane %v1418_v20, 1 }
  0x48   : > { %v1424_v34 = vor.u32 %v1422_v23, %v1420_v29 }
  0x4a   : > { %3569 = vmatmul.mubr.msk.bf16.gmra.mxu1 %vm457_vm2, %v4112_v19 }
  0x4b   : > { %3595 = vmatmul.mubr.msk.bf16.gmra.mxu0 %vm457_vm2, %v848_v39  ;;  %3572 = vmatprep.mubr.msk.bf16.mxu1 %vm457_vm2, %v4024_v13  ;;  %v856_v13 = vsel %vm835_vm3, %v853_v50, %v855_v62  ;;  %v1452_v39 = vor.u32 %v1450_v54, %v1448_v55  ;;  %v1460_v50 = vshll.u32 %v4298_v56, 16  ;;  %v4370_v54 = vld [vmem:[%s3993_s30 + $0x14] sm:$0xf] }
  0x4c   : > { %3598 = vmatprep.mubr.msk.bf16.mxu0 %vm457_vm2, %v850_v57  ;;  %v1455_v57 = vrot.slane %v1453_v33, 1 }
  0x4d   : > { %v1462_v0 = vrot.slane %v1460_v50, 1 }
  0x4e   : > { %v1456_v62 = vsel %vm345_vm1, %v1452_v39, %v1455_v57 }
  0x52   : > { %3573 = vmatmul.mubr.msk.bf16.gmra.mxu1 %vm457_vm2, %v4027_v14  ;;  %v859_v14 = vrot.slane %v4066_v44, 1 }
  0x53   : > { %3599 = vmatmul.mubr.msk.bf16.gmra.mxu0 %vm457_vm2, %v852_v60  ;;  %3576 = vmatprep.mubr.msk.bf16.mxu1 %vm457_vm2, %v4039_v24  ;;  %v270_v24 = vld [vmem:[%s3993_s30 + $0x6c] sm:$0x7]  ;;  %v1449_v60 = vsel %vm345_vm1, %v1445_v28, %v1448_v55 }
  0x54   : > { %3602 = vmatprep.mubr.msk.bf16.mxu0 %vm457_vm2, %v854_v61  ;;  %v3220_v11 = vcombine.low %v4088_v59, %v270_v24  ;;  %v860_v12 = vsel %vm835_vm3, %v857_v63, %v859_v14  ;;  %v862_v16 = vsel %vm835_vm3, %v859_v14, %v861_v8  ;;  %v4235_v59 = vld [vmem:[%s3993_s30 + $0x20] sm:$0xff]   ;;  %v1457_v61 = vshrl.u32 %v4288_v27, 16 }
  0x55   : > { %v1425_v25 = vshll.u32 %v4235_v59, 16  ;;  %v1429_v41 = vshrl.u32 %v4235_v59, 16  ;;  %v1464_v63 = vshrl.u32 %v4298_v56, 16  ;;  %v1732_v55 = vrot.slane %v4235_v59, 1 }
  0x57   : > { %v1427_v35 = vrot.slane %v1425_v25, 1  ;;  %v1466_v14 = vor.u32 %v1464_v63, %v1462_v0 }
  0x59   : > { %v1428_v43 = vsel %vm345_vm1, %v1424_v34, %v1427_v35  ;;  %v1431_v51 = vor.u32 %v1429_v41, %v1427_v35  ;;  %v1721_v34 = vld [vmem:[%s3993_s30 + $0x8] sm:$0xe] }
  0x5a   : > { %3577 = vmatmul.mubr.msk.bf16.gmra.mxu1 %vm457_vm2, %v4057_v37  ;;  %v1411_v37 = vshll.u32 %v4221_v10, 16 }
  0x5b   : > { %3603 = vmatmul.mubr.msk.bf16.gmra.mxu0 %vm457_vm2, %v856_v13  ;;  %3580 = vmatprep.mubr.msk.bf16.mxu1 %vm457_vm2, %v4066_v44  ;;  %v1410_v44 = vor.u32 %v1409_v18, %v1405_v17  ;;  %v1435_v53 = vsel %vm345_vm1, %v1431_v51, %v1434_v49  ;;  %v1467_v13 = vshll.u32 %v4306_v58, 16  ;;  %v1108_v49 = vld [vmem:[%s3993_s30 + $0x74] sm:$0x7] }
  0x5c   : > { %3606 = vmatprep.mubr.msk.bf16.mxu0 %vm457_vm2, %v858_v2  ;;  %v1413_v19 = vrot.slane %v1411_v37, 1  ;;  %v4316_v2 = vld [vmem:[%s3993_s30 + $0x58] sm:$0xff]   ;;  %v1399_v37 = vld [vmem:[%s3993_s30 + $0x74] sm:$0xf] }
  0x5d   : > { %v1469_v24 = vrot.slane %v1467_v13, 1  ;;  %v1474_v9 = vshll.u32 %v4316_v2, 16  ;;  %v1478_v17 = vshrl.u32 %v4316_v2, 16  ;;  %v4411_v13 = vld [vmem:[%s3993_s30 + $0x30] sm:$0xff]  }
  0x5e   : > { %v1414_v22 = vsel %vm345_vm1, %v1410_v44, %v1413_v19  ;;  %v1417_v31 = vor.u32 %v1415_v21, %v1413_v19  ;;  %v4335_v19 = vld [vmem:[%s3993_s30 + $0x68] sm:$0xff]   ;;  %v1107_v21 = vld [vmem:[%s3993_s30 + $0x70] sm:$0xf] }
  0x5f   : > { %v1476_v44 = vrot.slane %v1474_v9, 1  ;;  %v4341_v25 = vcombine.low %v1107_v21, %v1399_v37  ;;  %v1492_v38 = vshrl.u32 %v4335_v19, 16 }
  0x60   : > { %v1421_v40 = vsel %vm345_vm1, %v1417_v31, %v1420_v29 }
  0x61   : > { %v1500_v7 = vshrl.u32 %v4341_v25, 16  ;;  %v1752_v37 = vrot.slane %v4341_v25, 1 }
  0x62   : > { %3581 = vmatmul.mubr.msk.bf16.gmra.mxu1 %vm457_vm2, %v3220_v11 }
  0x63   : > { %3607 = vmatmul.mubr.msk.bf16.gmra.mxu0 %vm457_vm2, %v860_v12  ;;  %3616 = vmatprep.mubr.msk.bf16.mxu1 %vm457_vm2, %v3252_v3  ;;  %v1459_v3 = vor.u32 %v1457_v61, %v1455_v57  ;;  %v1471_v12 = vshrl.u32 %v4306_v58, 16  ;;  %v2437_v57 = vsel %vm500_vm0, %v4252_v32, 0  ;;  %v4393_v61 = vld [vmem:[%s3993_s30 + $0x20] sm:$0xff]  }
  0x64   : > { %3610 = vmatprep.mubr.msk.bf16.mxu0 %vm457_vm2, %v862_v16  ;;  %v1470_v16 = vsel %vm345_vm1, %v1466_v14, %v1469_v24  ;;  %v1744_v14 = vrot.slane %v4306_v58, 1 }
  0x65   : > { %v1463_v11 = vsel %vm345_vm1, %v1459_v3, %v1462_v0  ;;  %v1473_v20 = vor.u32 %v1471_v12, %v1469_v24  ;;  %v4427_v24 = vld [vmem:[%s3993_s30 + $0x40] sm:$0xff]  }
  0x67   : > { %v1477_v29 = vsel %vm345_vm1, %v1473_v20, %v1476_v44  ;;  %v4460_v20 = vld [vmem:[%s3993_s30 + $0x60] sm:$0xff]  }
  0x6a   : > { %3617 = vmatmul.mubr.msk.bf16.vlgmr.msra.gmra.mxu1 %vm457_vm2, %v4221_v10  ;;  %v1730_v10 = vrot.slane %v4229_v4, 1 }
  0x6b   : > { %3611 = vmatmul.mubr.msk.bf16.gmra.mxu0 %vm457_vm2, %v861_v8  ;;  %3675 = vmatpush3.bf16.msra.mxu1 %v1797_v26  ;;  %v4324_v8 = vld [vmem:[%s3993_s30 + $0x60] sm:$0xff]   ;;  %v1488_v26 = vshll.u32 %v4335_v19, 16 }
  0x6c   : > { %3646 = vmatprep.mubr.msk.bf16.mxu0 %vm457_vm2, %v1414_v22  ;;  %3620 = vmatprep.mubr.msk.bf16.mxu1 %vm457_vm2, %v4229_v4  ;;  %v1481_v18 = vshll.u32 %v4324_v8, 16  ;;  %v1480_v22 = vor.u32 %v1478_v17, %v1476_v44  ;;  %v1485_v31 = vshrl.u32 %v4324_v8, 16  ;;  %v1731_v39 = vsel %vm835_vm3, %v1728_v52, %v1730_v10 }
  0x6d   : > { %3804 = vmatprep.subr.msk.bf16.mxu1 %vm500_vm0, %v4252_v32  ;;  %v1490_v41 = vrot.slane %v1488_v26, 1  ;;  %v1733_v50 = vsel %vm835_vm3, %v1730_v10, %v1732_v55  ;;  %v1734_v4 = vrot.slane %v4246_v30, 1  ;;  %v2688_v32 = vsel %vm500_vm0, %v4274_v48, 0 }
  0x6e   : > { %v1483_v23 = vrot.slane %v1481_v18, 1  ;;  %v1748_v12 = vrot.slane %v4324_v8, 1 }
  0x6f   : > { %v1494_v46 = vor.u32 %v1492_v38, %v1490_v41  ;;  %v2309_v38 = vshll.u32 %v4393_v61, 16 }
  0x70   : > { %v1484_v35 = vsel %vm345_vm1, %v1480_v22, %v1483_v23 }
  0x72   : > { %3621 = vmatmul.mubr.msk.bf16.gmra.mxu1 %vm457_vm2, %v4235_v59  ;;  %v4389_v59 = vld [vmem:[%s3993_s30 + $0x18] sm:$0xff]  }
  0x73   : > { %3647 = vmatmul.mubr.msk.bf16.vlgmr.msra.gmra.mxu0 %vm457_vm2, %v1421_v40  ;;  %3624 = vmatprep.mubr.msk.bf16.mxu1 %vm457_vm2, %v4246_v30  ;;  %v1496_v40 = vshll.u32 %v4341_v25, 16  ;;  %v1738_v30 = vrot.slane %v4278_v5, 1  ;;  %v2612_v25 = vld [vmem:[%s3993_s30 + $0x10] sm:$0xe] }
  0x74   : > { %3705 = vmatpush3.bf16.msra.mxu0 %v2115_v42  ;;  %3650 = vmatprep.mubr.msk.bf16.mxu0 %vm457_vm2, %v1428_v43  ;;  %v3297_v42 = vcombine.low %v1721_v34, %v4207_v1  ;;  %v1487_v43 = vor.u32 %v1485_v31, %v1483_v23  ;;  %v3265_v1 = vcombine.low %v1107_v21, %v1108_v49  ;;  %v1999_v49 = vld [vmem:[%s3993_s30 + $0x7c] sm:$0x7] }
  0x75   : > { %3805 = vmatprep.subr.msk.bf16.mxu0 %vm500_vm0, %v4274_v48  ;;  %v1498_v47 = vrot.slane %v1496_v40, 1  ;;  %v1740_v48 = vrot.slane %v4288_v27, 1  ;;  %v3358_v40 = vcombine.low %v2612_v25, %v4370_v54 }
  0x76   : > { %v1727_v51 = vrot.slane %v3297_v42, 1  ;;  %v1491_v6 = vsel %vm345_vm1, %v1487_v43, %v1490_v41  ;;  %v2306_v41 = vshrl.u32 %v4389_v59, 16  ;;  %v2313_v43 = vshrl.u32 %v4393_v61, 16 }
  0x77   : > { %v1499_v45 = vsel %vm345_vm1, %v1494_v46, %v1498_v47  ;;  %v1502_v33 = vor.u32 %v1500_v7, %v1498_v47  ;;  %v1741_v3 = vsel %vm835_vm3, %v1738_v30, %v1740_v48  ;;  %v4490_v47 = vld [vmem:[%s3993_s30 + $0x78] sm:$0xf] }
  0x7a   : > { %3625 = vmatmul.mubr.msk.bf16.gmra.mxu1 %vm457_vm2, %v4259_v36 }
  0x7b   : > { %3651 = vmatmul.mubr.msk.bf16.gmra.mxu0 %vm457_vm2, %v1435_v53  ;;  %3628 = vmatprep.mubr.msk.bf16.mxu1 %vm457_vm2, %v4278_v5  ;;  %v1729_v53 = vsel %vm835_vm3, %v1727_v51, %v1728_v52  ;;  %v1742_v5 = vrot.slane %v4298_v56, 1  ;;  %v2311_v51 = vrot.slane %v2309_v38, 1  ;;  %v2618_v52 = vrot.slane %v3358_v40, 1 }
  0x7c   : > { %3654 = vmatprep.mubr.msk.bf16.mxu0 %vm457_vm2, %v1442_v15  ;;  %v1972_v15 = vld [vmem:[%s3993_s30 + $0x10] sm:$0xf] }
  0x7d   : > { %v4376_v28 = vcombine.low %v1972_v15, %v4370_v54  ;;  %v1743_v9 = vsel %vm835_vm3, %v1740_v48, %v1742_v5  ;;  %v2323_v54 = vshll.u32 %v4411_v13, 16 }
  0x7f   : > { %v2298_v44 = vshll.u32 %v4376_v28, 16  ;;  %v2296_v23 = vshrl.u32 %v4376_v28, 16 }
  0x81   : > { %v2300_v26 = vrot.slane %v2298_v44, 1 }
  0x82   : > { %3629 = vmatmul.mubr.msk.bf16.gmra.mxu1 %vm457_vm2, %v4288_v27  ;;  %v4423_v27 = vld [vmem:[%s3993_s30 + $0x38] sm:$0xff]  }
  0x83   : > { %3655 = vmatmul.mubr.msk.bf16.gmra.mxu0 %vm457_vm2, %v1449_v60  ;;  %3632 = vmatprep.mubr.msk.bf16.mxu1 %vm457_vm2, %v4298_v56  ;;  %v1736_v60 = vrot.slane %v4259_v36, 1  ;;  %v4407_v36 = vld [vmem:[%s3993_s30 + $0x28] sm:$0xff]   ;;  %v1746_v56 = vrot.slane %v4316_v2, 1  ;;  %v2301_v31 = vor.u32 %v2300_v26, %v2296_v23  ;;  %v2627_v23 = vrot.slane %v4423_v27, 1 }
  0x84   : > { %3658 = vmatprep.mubr.msk.bf16.mxu0 %vm457_vm2, %v1456_v62  ;;  %v1735_v62 = vsel %vm835_vm3, %v1732_v55, %v1734_v4  ;;  %v2316_v46 = vshll.u32 %v4407_v36, 16 }
  0x85   : > { %v1737_v63 = vsel %vm835_vm3, %v1734_v4, %v1736_v60  ;;  %v1739_v0 = vsel %vm835_vm3, %v1736_v60, %v1738_v30  ;;  %v1747_v17 = vsel %vm835_vm3, %v1744_v14, %v1746_v56  ;;  %v1749_v18 = vsel %vm835_vm3, %v1746_v56, %v1748_v12 }
  0x86   : > { %v2318_v7 = vrot.slane %v2316_v46, 1  ;;  %v2325_v60 = vrot.slane %v2323_v54, 1 }
  0x8a   : > { %3633 = vmatmul.mubr.msk.bf16.gmra.mxu1 %vm457_vm2, %v4306_v58  ;;  %v4439_v58 = vld [vmem:[%s3993_s30 + $0x48] sm:$0xff]  }
  0x8b   : > { %3659 = vmatmul.mubr.msk.bf16.gmra.mxu0 %vm457_vm2, %v1463_v11  ;;  %3636 = vmatprep.mubr.msk.bf16.mxu1 %vm457_vm2, %v4316_v2  ;;  %v1745_v11 = vsel %vm835_vm3, %v1742_v5, %v1744_v14  ;;  %v1750_v2 = vrot.slane %v4335_v19, 1 }
  0x8c   : > { %3662 = vmatprep.mubr.msk.bf16.mxu0 %vm457_vm2, %v1470_v16  ;;  %v4443_v16 = vld [vmem:[%s3993_s30 + $0x50] sm:$0xff]  }
  0x8d   : > { %v1751_v21 = vsel %vm835_vm3, %v1748_v12, %v1750_v2  ;;  %v1753_v22 = vsel %vm835_vm3, %v1750_v2, %v1752_v37  ;;  %v2344_v2 = vshll.u32 %v4439_v58, 16 }
  0x92   : > { %3637 = vmatmul.mubr.msk.bf16.gmra.mxu1 %vm457_vm2, %v4324_v8  ;;  %v4455_v8 = vld [vmem:[%s3993_s30 + $0x58] sm:$0xff]  }
  0x93   : > { %3663 = vmatmul.mubr.msk.bf16.gmra.mxu0 %vm457_vm2, %v1477_v29  ;;  %3640 = vmatprep.mubr.msk.bf16.mxu1 %vm457_vm2, %v4335_v19  ;;  %v2302_v19 = vshll.u32 %v4389_v59, 16  ;;  %v4474_v29 = vld [vmem:[%s3993_s30 + $0x68] sm:$0xff]  }
  0x94   : > { %3666 = vmatprep.mubr.msk.bf16.mxu0 %vm457_vm2, %v1484_v35  ;;  %v4477_v35 = vld [vmem:[%s3993_s30 + $0x70] sm:$0xff]  }
  0x95   : > { %v2304_v34 = vrot.slane %v2302_v19, 1 }
  0x97   : > { %v2305_v42 = vsel %vm345_vm1, %v2301_v31, %v2304_v34 }
  0x9a   : > { %3641 = vmatmul.mubr.msk.bf16.gmra.mxu1 %vm457_vm2, %v3265_v1  ;;  %v2308_v1 = vor.u32 %v2306_v41, %v2304_v34  ;;  %v2346_v34 = vrot.slane %v2344_v2, 1 }
  0x9b   : > { %3667 = vmatmul.mubr.msk.bf16.gmra.mxu0 %vm457_vm2, %v1491_v6  ;;  %3676 = vmatprep.mubr.msk.bf16.mxu1 %vm457_vm2, %v1729_v53  ;;  %v2619_v6 = vrot.slane %v4389_v59, 1  ;;  %v2315_v53 = vor.u32 %v2313_v43, %v2311_v51  ;;  %v2348_v43 = vshrl.u32 %v4439_v58, 16 }
  0x9c   : > { %3670 = vmatprep.mubr.msk.bf16.mxu0 %vm457_vm2, %v1499_v45  ;;  %v3326_v45 = vcombine.low %v4490_v47, %v1999_v49  ;;  %v2312_v10 = vsel %vm345_vm1, %v2308_v1, %v2311_v51  ;;  %v2629_v1 = vrot.slane %v4427_v24, 1 }
  0x9d   : > { %v2620_v15 = vsel %vm835_vm3, %v2618_v52, %v2619_v6  ;;  %v2355_v52 = vshrl.u32 %v4443_v16, 16  ;;  %v2350_v54 = vor.u32 %v2348_v43, %v2346_v34 }
  0xa2   : > { %3677 = vmatmul.mubr.msk.bf16.vlgmr.msra.gmra.mxu1 %vm457_vm2, %v1731_v39  ;;  %v2327_v39 = vshrl.u32 %v4411_v13, 16 }
  0xa3   : > { %3671 = vmatmul.mubr.msk.bf16.gmra.mxu0 %vm457_vm2, %v1502_v33  ;;  %3735 = vmatpush3.bf16.msra.mxu1 %v2437_v57  ;;  %v2320_v33 = vshrl.u32 %v4407_v36, 16  ;;  %v2330_v57 = vshll.u32 %v4423_v27, 16 }
  0xa4   : > { %3706 = vmatprep.mubr.msk.bf16.mxu0 %vm457_vm2, %v4376_v28  ;;  %3680 = vmatprep.mubr.msk.bf16.mxu1 %vm457_vm2, %v1733_v50  ;;  %v2319_v28 = vsel %vm345_vm1, %v2315_v53, %v2318_v7  ;;  %v2621_v50 = vrot.slane %v4393_v61, 1  ;;  %v2329_v48 = vor.u32 %v2327_v39, %v2325_v60 }
  0xaa   : > { %3681 = vmatmul.mubr.msk.bf16.gmra.mxu1 %vm457_vm2, %v1735_v62  ;;  %v2322_v62 = vor.u32 %v2320_v33, %v2318_v7 }
  0xab   : > { %3707 = vmatmul.mubr.msk.bf16.vlgmr.msra.gmra.mxu0 %vm457_vm2, %v4389_v59  ;;  %3684 = vmatprep.mubr.msk.bf16.mxu1 %vm457_vm2, %v1737_v63 }
  0xac   : > { %3765 = vmatpush3.bf16.msra.mxu0 %v2688_v32  ;;  %3710 = vmatprep.mubr.msk.bf16.mxu0 %vm457_vm2, %v4393_v61  ;;  %v2623_v32 = vrot.slane %v4407_v36, 1  ;;  %v2622_v61 = vsel %vm835_vm3, %v2619_v6, %v2621_v50  ;;  %v2358_v6 = vshll.u32 %v4455_v8, 16 }
  0xae   : > { %v2624_v14 = vsel %vm835_vm3, %v2621_v50, %v2623_v32  ;;  %v2360_v39 = vrot.slane %v2358_v6, 1 }
  0xb2   : > { %3685 = vmatmul.mubr.msk.bf16.gmra.mxu1 %vm457_vm2, %v1739_v0  ;;  %v2332_v0 = vrot.slane %v2330_v57, 1 }
  0xb3   : > { %3711 = vmatmul.mubr.msk.bf16.gmra.mxu0 %vm457_vm2, %v4407_v36  ;;  %3688 = vmatprep.mubr.msk.bf16.mxu1 %vm457_vm2, %v1741_v3  ;;  %v2326_v36 = vsel %vm345_vm1, %v2322_v62, %v2325_v60  ;;  %v2362_v62 = vshrl.u32 %v4455_v8, 16 }
  0xb4   : > { %3714 = vmatprep.mubr.msk.bf16.mxu0 %vm457_vm2, %v4411_v13 }
  0xba   : > { %3689 = vmatmul.mubr.msk.bf16.gmra.mxu1 %vm457_vm2, %v1743_v9  ;;  %v2337_v9 = vshll.u32 %v4427_v24, 16 }
  0xbb   : > { %3715 = vmatmul.mubr.msk.bf16.gmra.mxu0 %vm457_vm2, %v4423_v27  ;;  %3692 = vmatprep.mubr.msk.bf16.mxu1 %vm457_vm2, %v1745_v11  ;;  %v2334_v11 = vshrl.u32 %v4423_v27, 16 }
  0xbc   : > { %3718 = vmatprep.mubr.msk.bf16.mxu0 %vm457_vm2, %v4427_v24 }
  0xbd   : > { %v2336_v26 = vor.u32 %v2334_v11, %v2332_v0  ;;  %v2633_v11 = vrot.slane %v4443_v16, 1 }
  0xc2   : > { %3693 = vmatmul.mubr.msk.bf16.gmra.mxu1 %vm457_vm2, %v1747_v17  ;;  %v2333_v17 = vsel %vm345_vm1, %v2329_v48, %v2332_v0 }
  0xc3   : > { %3719 = vmatmul.mubr.msk.bf16.gmra.mxu0 %vm457_vm2, %v4439_v58  ;;  %3696 = vmatprep.mubr.msk.bf16.mxu1 %vm457_vm2, %v1749_v18  ;;  %v2341_v18 = vshrl.u32 %v4427_v24, 16  ;;  %v2630_v24 = vsel %vm835_vm3, %v2627_v23, %v2629_v1 }
  0xc4   : > { %3722 = vmatprep.mubr.msk.bf16.mxu0 %vm457_vm2, %v4443_v16 }
  0xca   : > { %3697 = vmatmul.mubr.msk.bf16.gmra.mxu1 %vm457_vm2, %v1751_v21 }
  0xcb   : > { %3723 = vmatmul.mubr.msk.bf16.gmra.mxu0 %vm457_vm2, %v4455_v8  ;;  %3700 = vmatprep.mubr.msk.bf16.mxu1 %vm457_vm2, %v1753_v22  ;;  %v2339_v22 = vrot.slane %v2337_v9, 1  ;;  %v2372_v9 = vshll.u32 %v4474_v29, 16 }
  0xcc   : > { %3726 = vmatprep.mubr.msk.bf16.mxu0 %vm457_vm2, %v4460_v20 }
  0xcd   : > { %v2343_v31 = vor.u32 %v2341_v18, %v2339_v22  ;;  %v2340_v27 = vsel %vm345_vm1, %v2336_v26, %v2339_v22 }
  0xcf   : > { %v2347_v51 = vsel %vm345_vm1, %v2343_v31, %v2346_v34 }
  0xd2   : > { %3701 = vmatmul.mubr.msk.bf16.gmra.mxu1 %vm457_vm2, %v1752_v37  ;;  %v2625_v37 = vrot.slane %v4411_v13, 1 }
  0xd3   : > { %3727 = vmatmul.mubr.msk.bf16.gmra.mxu0 %vm457_vm2, %v4474_v29  ;;  %3736 = vmatprep.mubr.msk.bf16.mxu1 %vm457_vm2, %v2305_v42  ;;  %v2351_v42 = vshll.u32 %v4443_v16, 16 }
  0xd4   : > { %3730 = vmatprep.mubr.msk.bf16.mxu0 %vm457_vm2, %v4477_v35  ;;  %v2626_v13 = vsel %vm835_vm3, %v2623_v32, %v2625_v37  ;;  %v2628_v41 = vsel %vm835_vm3, %v2625_v37, %v2627_v23  ;;  %v2635_v37 = vrot.slane %v4455_v8, 1  ;;  %v2364_v23 = vor.u32 %v2362_v62, %v2360_v39 }
  0xd5   : > { %v2353_v7 = vrot.slane %v2351_v42, 1 }
  0xd6   : > { %v2636_v8 = vsel %vm835_vm3, %v2633_v11, %v2635_v37 }
  0xd7   : > { %v2354_v32 = vsel %vm345_vm1, %v2350_v54, %v2353_v7 }
  0xda   : > { %v4509_v4 = vpop.f32.mrf.mxu1  ;;  %3737 = vmatmul.mubr.msk.bf16.vlgmr.msra.gmra.mxu1 %vm457_vm2, %v2312_v10 }
  0xdb   : > { %v4501_v55 = vpop.f32.mrf.mxu0  ;;  %3731 = vmatmul.mubr.msk.bf16.gmra.mxu0 %vm457_vm2, %v3326_v45  ;;  %3740 = vmatprep.mubr.msk.bf16.mxu1 %vm457_vm2, %v2319_v28  ;;  %v2357_v28 = vor.u32 %v2355_v52, %v2353_v7  ;;  %v2376_v52 = vshrl.u32 %v4474_v29, 16  ;;  %v2383_v7 = vshrl.u32 %v4477_v35, 16 }
  0xdc   : > { %3766 = vmatprep.mubr.msk.bf16.mxu0 %vm457_vm2, %v2620_v15  ;;  %v4516_v63 = vpop.f32.mrf.mxu1  ;;  %v2631_v15 = vrot.slane %v4439_v58, 1  ;;  %v2365_v58 = vshll.u32 %v4460_v20, 16 }
  0xdd   : > { %v4512_v59 = vpop.f32.mrf.mxu0 }
  0xde   : > { %v4521_v3 = vpop.f32.mrf.mxu1  ;;  %v2632_v60 = vsel %vm835_vm3, %v2629_v1, %v2631_v15  ;;  %v2367_v2 = vrot.slane %v2365_v58, 1  ;;  %v2634_v42 = vsel %vm835_vm3, %v2631_v15, %v2633_v11  ;;  %v2639_v58 = vrot.slane %v4474_v29, 1 }
  0xdf   : > { %v4518_v30 = vpop.f32.mrf.mxu0 }
  0xe0   : > { %v4529_v56 = vpop.f32.mrf.mxu1 }
  0xe1   : > { %v4523_v5 = vpop.f32.mrf.mxu0 }
  0xe2   : > { %v4539_v44 = vpop.f32.mrf.mxu1  ;;  %3741 = vmatmul.mubr.msk.bf16.gmra.mxu1 %vm457_vm2, %v2326_v36  ;;  %v2290_v36 = vld [vmem:[%s3993_s30 + $0x7c] sm:$0xf] }
  0xe3   : > { %v4531_v12 = vpop.f32.mrf.mxu0  ;;  %3767 = vmatmul.mubr.msk.bf16.vlgmr.msra.gmra.mxu0 %vm457_vm2, %v2622_v61  ;;  %3744 = vmatprep.mubr.msk.bf16.mxu1 %vm457_vm2, %v2333_v17  ;;  %v2361_v61 = vsel %vm345_vm1, %v2357_v28, %v2360_v39  ;;  %v4607_v26 = vcombine.low %v4490_v47, %v2290_v36  ;;  %v2368_v47 = vsel %vm345_vm1, %v2364_v23, %v2367_v2 }
  0xe4   : > { %3770 = vmatprep.mubr.msk.bf16.mxu0 %vm457_vm2, %v2624_v14  ;;  %v4546_v19 = vpop.f32.mrf.mxu1  ;;  %v2369_v14 = vshrl.u32 %v4460_v20, 16 }
  0xe5   : > { %v4542_v21 = vpop.f32.mrf.mxu0  ;;  %v2387_v15 = vshll.u32 %v4607_v26, 16 }
  0xe6   : > { %v4551_v38 = vpop.f32.mrf.mxu1  ;;  %v2371_v16 = vor.u32 %v2369_v14, %v2367_v2 }
  0xe7   : > { %v4548_v25 = vpop.f32.mrf.mxu0  ;;  %v2389_v36 = vrot.slane %v2387_v15, 1 }
  0xe8   : > { %v4559_v46 = vpop.f32.mrf.mxu1 }
  0xe9   : > { %v4553_v40 = vpop.f32.mrf.mxu0 }
  0xea   : > { %v4569_v45 = vpop.f32.mrf.mxu1  ;;  %3745 = vmatmul.mubr.msk.bf16.gmra.mxu1 %vm457_vm2, %v2340_v27 }
  0xeb   : > { %v4561_v49 = vpop.f32.mrf.mxu0  ;;  %3771 = vmatmul.mubr.msk.bf16.gmra.mxu0 %vm457_vm2, %v2626_v13  ;;  %3748 = vmatprep.mubr.msk.bf16.mxu1 %vm457_vm2, %v2347_v51  ;;  %v2374_v13 = vrot.slane %v2372_v9, 1 }
  0xec   : > { %3774 = vmatprep.mubr.msk.bf16.mxu0 %vm457_vm2, %v2628_v41  ;;  %v4576_v10 = vpop.f32.mrf.mxu1 }
  0xed   : > { %v4572_v53 = vpop.f32.mrf.mxu0 }
  0xee   : > { %v4581_v57 = vpop.f32.mrf.mxu1 }
  0xef   : > { %v4578_v33 = vpop.f32.mrf.mxu0 }
  0xf0   : > { %v4589_v48 = vpop.f32.mrf.mxu1 }
  0xf1   : > { %v4583_v50 = vpop.f32.mrf.mxu0 }
  0xf2   : > { %v3558_v17 = vpop.f32.mrf.mxu1  ;;  %3749 = vmatmul.mubr.msk.bf16.gmra.mxu1 %vm457_vm2, %v2354_v32 }
  0xf3   : > { %v4591_v0 = vpop.f32.mrf.mxu0  ;;  %3775 = vmatmul.mubr.msk.bf16.gmra.mxu0 %vm457_vm2, %v2630_v24  ;;  %v727_v22 = vadd.f32 %v3558_v17, %v4501_v55  ;;  %3752 = vmatprep.mubr.msk.bf16.mxu1 %vm457_vm2, %v2361_v61  ;;  %v2379_v55 = vshll.u32 %v4477_v35, 16  ;;  %v2378_v61 = vor.u32 %v2376_v52, %v2374_v13 }
  0xf4   : > { %3778 = vmatprep.mubr.msk.bf16.mxu0 %vm457_vm2, %v2632_v60  ;;  %v718_v31 = vpop.f32.mrf.mxu1 }
  0xf5   : > { %v4601_v18 = vpop.f32.mrf.mxu0  ;;  %v719_v41 = vadd.f32 %v718_v31, %v4512_v59  ;;  %v2375_v59 = vsel %vm345_vm1, %v2371_v16, %v2374_v13  ;;  %v2381_v60 = vrot.slane %v2379_v55, 1  ;;  %v2643_v55 = vrot.slane %v4607_v26, 1 }
  0xf6   : > { %v3559_v27 = vpop.f32.mrf.mxu1 }
  0xf7   : > { %v4609_v34 = vpop.f32.mrf.mxu0  ;;  %v730_v51 = vadd.f32 %v3559_v27, %v4518_v30  ;;  %v2637_v30 = vrot.slane %v4460_v20, 1  ;;  %v2385_v9 = vor.u32 %v2383_v7, %v2381_v60  ;;  %v2382_v31 = vsel %vm345_vm1, %v2378_v61, %v2381_v60 }
  0xf8   : > { %v721_v6 = vpop.f32.mrf.mxu1 }
  0xf9   : > { %v4613_v43 = vpop.f32.mrf.mxu0  ;;  %v722_v54 = vadd.f32 %v721_v6, %v4523_v5  ;;  %v2638_v17 = vsel %vm835_vm3, %v2635_v37, %v2637_v30  ;;  %v2640_v29 = vsel %vm835_vm3, %v2637_v30, %v2639_v58  ;;  %v2641_v37 = vrot.slane %v4477_v35, 1 }
  0xfa   : > { %v3562_v39 = vpop.f32.mrf.mxu1  ;;  %3753 = vmatmul.mubr.msk.bf16.gmra.mxu1 %vm457_vm2, %v2368_v47 }
  0xfb   : > { %v3588_v1 = vpop.f32.mrf.mxu0  ;;  %3779 = vmatmul.mubr.msk.bf16.gmra.mxu0 %vm457_vm2, %v2634_v42  ;;  %v743_v32 = vadd.f32 %v3562_v39, %v4531_v12  ;;  %3756 = vmatprep.mubr.msk.bf16.mxu1 %vm457_vm2, %v2375_v59  ;;  %v2642_v35 = vsel %vm835_vm3, %v2639_v58, %v2641_v37 }
  0xfc   : > { %v4625_v28 = vadd.f32 %v3588_v1, %v727_v22  ;;  %3782 = vmatprep.mubr.msk.bf16.mxu0 %vm457_vm2, %v2636_v8  ;;  %v734_v5 = vpop.f32.mrf.mxu1  ;;  %v2391_v8 = vshrl.u32 %v4607_v26, 16 }
  0xfd   : > { %v942_v24 = vpop.f32.mrf.mxu0  ;;  %v735_v20 = vadd.f32 %v734_v5, %v4542_v21  ;;  %v2390_v21 = vsel %vm345_vm1, %v2385_v9, %v2389_v36 }
  0xfe   : > { %v4632_v62 = vadd.f32 %v942_v24, %v719_v41  ;;  %v3563_v2 = vpop.f32.mrf.mxu1  ;;  %v2393_v15 = vor.u32 %v2391_v8, %v2389_v36 }
  0xff   : > { %v3589_v14 = vpop.f32.mrf.mxu0  ;;  %v746_v12 = vadd.f32 %v3563_v2, %v4548_v25 }
 0x100   : > { %v4636_v11 = vadd.f32 %v3589_v14, %v730_v51  ;;  %v737_v16 = vpop.f32.mrf.mxu1 }
 0x101   : > { %v945_v22 = vpop.f32.mrf.mxu0  ;;  %v738_v41 = vadd.f32 %v737_v16, %v4553_v40 }
 0x102   : > { %v4641_v23 = vadd.f32 %v945_v22, %v722_v54  ;;  %v3566_v27 = vpop.f32.mrf.mxu1  ;;  %3757 = vmatmul.mubr.msk.bf16.gmra.mxu1 %vm457_vm2, %v2382_v31  ;;  %v2644_v54 = vsel %vm835_vm3, %v2641_v37, %v2643_v55 }
 0x103   : > { %v3592_v13 = vpop.f32.mrf.mxu0  ;;  %3783 = vmatmul.mubr.msk.bf16.gmra.mxu0 %vm457_vm2, %v2638_v17  ;;  %v759_v51 = vadd.f32 %v3566_v27, %v4561_v49  ;;  %3760 = vmatprep.mubr.msk.bf16.mxu1 %vm457_vm2, %v2390_v21 }
 0x104   : > { %v4647_v42 = vadd.f32 %v3592_v13, %v743_v32  ;;  %3786 = vmatprep.mubr.msk.bf16.mxu0 %vm457_vm2, %v2640_v29  ;;  %v750_v40 = vpop.f32.mrf.mxu1 }
 0x105   : > { %v958_v25 = vpop.f32.mrf.mxu0  ;;  %v751_v6 = vadd.f32 %v750_v40, %v4572_v53 }
 0x106   : > { %v4655_v47 = vadd.f32 %v958_v25, %v735_v20  ;;  %v3567_v59 = vpop.f32.mrf.mxu1 }
 0x107   : > { %v3593_v52 = vpop.f32.mrf.mxu0  ;;  %v762_v26 = vadd.f32 %v3567_v59, %v4578_v33 }
 0x108   : > { %v4659_v1 = vadd.f32 %v3593_v52, %v746_v12  ;;  %v753_v30 = vpop.f32.mrf.mxu1 }
 0x109   : > { %v961_v7 = vpop.f32.mrf.mxu0  ;;  %v754_v24 = vadd.f32 %v753_v30, %v4583_v50 }
 0x10a   : > { %v4664_v49 = vadd.f32 %v961_v7, %v738_v41  ;;  %v3570_v60 = vpop.f32.mrf.mxu1  ;;  %3761 = vmatmul.mubr.msk.bf16.gmra.mxu1 %vm457_vm2, %v2393_v15 }
 0x10b   : > { %v3596_v39 = vpop.f32.mrf.mxu0  ;;  %3787 = vmatmul.mubr.msk.bf16.gmra.mxu0 %vm457_vm2, %v2642_v35  ;;  %v775_v32 = vadd.f32 %v3570_v60, %v4591_v0 }
 0x10c   : > { %v4668_v53 = vadd.f32 %v3596_v39, %v759_v51  ;;  %3790 = vmatprep.mubr.msk.bf16.mxu0 %vm457_vm2, %v2644_v54  ;;  %v766_v33 = vpop.f32.mrf.mxu1 }
 0x10d   : > { %v974_v58 = vpop.f32.mrf.mxu0  ;;  %v767_v14 = vadd.f32 %v766_v33, %v4601_v18 }
 0x10e   : > { %v4673_v61 = vadd.f32 %v974_v58, %v751_v6  ;;  %v3571_v36 = vpop.f32.mrf.mxu1 }
 0x10f   : > { %v3597_v5 = vpop.f32.mrf.mxu0  ;;  %v778_v20 = vadd.f32 %v3571_v36, %v4609_v34 }
 0x110   : > { %v4676_v9 = vadd.f32 %v3597_v5, %v762_v26  ;;  %v769_v2 = vpop.f32.mrf.mxu1 }
 0x111   : > { %v977_v50 = vpop.f32.mrf.mxu0  ;;  %v770_v0 = vadd.f32 %v769_v2, %v4613_v43 }
 0x112   : > { %v4679_v17 = vadd.f32 %v977_v50, %v754_v24  ;;  %v3574_v12 = vpop.f32.mrf.mxu1 }
 0x113   : > { %v3600_v22 = vpop.f32.mrf.mxu0  ;;  %3791 = vmatmul.mubr.msk.bf16.gmra.mxu0 %vm457_vm2, %v2643_v55  ;;  %v791_v18 = vadd.f32 %v3574_v12, %v4509_v4 }
 0x114   : > { %v4683_v29 = vadd.f32 %v3600_v22, %v775_v32  ;;  %v782_v13 = vpop.f32.mrf.mxu1 }
 0x115   : > { %v990_v31 = vpop.f32.mrf.mxu0  ;;  %v783_v34 = vadd.f32 %v782_v13, %v4516_v63 }
 0x116   : > { %v4686_v16 = vadd.f32 %v990_v31, %v767_v14  ;;  %v3575_v37 = vpop.f32.mrf.mxu1 }
 0x117   : > { %v3601_v21 = vpop.f32.mrf.mxu0  ;;  %v794_v25 = vadd.f32 %v3575_v37, %v4521_v3 }
 0x118   : > { %v4689_v41 = vadd.f32 %v3601_v21, %v778_v20  ;;  %v785_v43 = vpop.f32.mrf.mxu1 }
 0x119   : > { %v993_v27 = vpop.f32.mrf.mxu0  ;;  %v786_v51 = vadd.f32 %v785_v43, %v4529_v56 }
 0x11a   : > { %v4692_v8 = vadd.f32 %v993_v27, %v770_v0  ;;  %v3578_v4 = vpop.f32.mrf.mxu1 }
 0x11b   : > { %v3604_v55 = vpop.f32.mrf.mxu0  ;;  %v807_v6 = vadd.f32 %v3578_v4, %v4539_v44 }
 0x11c   : > { %v4695_v40 = vadd.f32 %v3604_v55, %v791_v18  ;;  %v798_v63 = vpop.f32.mrf.mxu1 }
 0x11d   : > { %v1006_v52 = vpop.f32.mrf.mxu0  ;;  %v799_v7 = vadd.f32 %v798_v63, %v4546_v19 }
 0x11e   : > { %v4698_v35 = vadd.f32 %v1006_v52, %v783_v34  ;;  %v3579_v3 = vpop.f32.mrf.mxu1 }
 0x11f   : > { %v3605_v59 = vpop.f32.mrf.mxu0  ;;  %v810_v26 = vadd.f32 %v3579_v3, %v4551_v38 }
 0x120   : > { %v4701_v15 = vadd.f32 %v3605_v59, %v794_v25  ;;  %v801_v56 = vpop.f32.mrf.mxu1 }
 0x121   : > { %v1009_v54 = vpop.f32.mrf.mxu0  ;;  %v802_v24 = vadd.f32 %v801_v56, %v4559_v46 }
 0x122   : > { %v4704_v30 = vadd.f32 %v1009_v54, %v786_v51  ;;  %v3582_v44 = vpop.f32.mrf.mxu1 }
 0x123   : > { %v3608_v39 = vpop.f32.mrf.mxu0  ;;  %v823_v32 = vadd.f32 %v3582_v44, %v4569_v45 }
 0x124   : > { %v4707_v60 = vadd.f32 %v3608_v39, %v807_v6  ;;  %v814_v19 = vpop.f32.mrf.mxu1 }
 0x125   : > { %v1022_v58 = vpop.f32.mrf.mxu0  ;;  %v815_v14 = vadd.f32 %v814_v19, %v4576_v10 }
 0x126   : > { %v4710_v33 = vadd.f32 %v1022_v58, %v799_v7  ;;  %v3583_v38 = vpop.f32.mrf.mxu1 }
 0x127   : > { %v3609_v5 = vpop.f32.mrf.mxu0  ;;  %v826_v20 = vadd.f32 %v3583_v38, %v4581_v57 }
 0x128   : > { %v4713_v36 = vadd.f32 %v3609_v5, %v810_v26  ;;  %v817_v46 = vpop.f32.mrf.mxu1 }
 0x129   : > { %v1025_v50 = vpop.f32.mrf.mxu0  ;;  %v818_v0 = vadd.f32 %v817_v46, %v4589_v48 }
 0x12a   : > { %v4716_v2 = vadd.f32 %v1025_v50, %v802_v24  ;;  %v3618_v45 = vpop.f32.mrf.mxu1 }
 0x12b   : > { %v3612_v22 = vpop.f32.mrf.mxu0  ;;  %v1373_v18 = vadd.f32 %v3618_v45, %v4625_v28 }
 0x12c   : > { %v4719_v12 = vadd.f32 %v3612_v22, %v823_v32  ;;  %v1260_v10 = vpop.f32.mrf.mxu1 }
 0x12d   : > { %v1038_v31 = vpop.f32.mrf.mxu0  ;;  %v1371_v34 = vadd.f32 %v1260_v10, %v4632_v62 }
 0x12e   : > { %v4722_v13 = vadd.f32 %v1038_v31, %v815_v14  ;;  %v3619_v57 = vpop.f32.mrf.mxu1 }
 0x12f   : > { %v3613_v21 = vpop.f32.mrf.mxu0  ;;  %v1374_v25 = vadd.f32 %v3619_v57, %v4636_v11 }
 0x130   : > { %v4725_v37 = vadd.f32 %v3613_v21, %v826_v20  ;;  %v1263_v48 = vpop.f32.mrf.mxu1 }
 0x131   : > { %v1041_v27 = vpop.f32.mrf.mxu0  ;;  %v1372_v51 = vadd.f32 %v1263_v48, %v4641_v23 }
 0x132   : > { %v4728_v43 = vadd.f32 %v1041_v27, %v818_v0  ;;  %v3622_v28 = vpop.f32.mrf.mxu1 }
 0x133   : > { %v3648_v55 = vpop.f32.mrf.mxu0  ;;  %v1377_v6 = vadd.f32 %v3622_v28, %v4647_v42 }
 0x134   : > { %v4731_v4 = vadd.f32 %v3648_v55, %v1373_v18  ;;  %v1276_v62 = vpop.f32.mrf.mxu1 }
 0x135   : > { %v1582_v52 = vpop.f32.mrf.mxu0  ;;  %v1375_v7 = vadd.f32 %v1276_v62, %v4655_v47 }
 0x136   : > { %v4734_v63 = vadd.f32 %v1582_v52, %v1371_v34  ;;  %v3623_v11 = vpop.f32.mrf.mxu1 }
 0x137   : > { %v3649_v59 = vpop.f32.mrf.mxu0  ;;  %v1378_v26 = vadd.f32 %v3623_v11, %v4659_v1 }
 0x138   : > { %v4737_v3 = vadd.f32 %v3649_v59, %v1374_v25  ;;  %v1279_v23 = vpop.f32.mrf.mxu1 }
 0x139   : > { %v1585_v54 = vpop.f32.mrf.mxu0  ;;  %v1376_v24 = vadd.f32 %v1279_v23, %v4664_v49 }
 0x13a   : > { %v4740_v56 = vadd.f32 %v1585_v54, %v1372_v51  ;;  %v3626_v42 = vpop.f32.mrf.mxu1 }
 0x13b   : > { %v3652_v39 = vpop.f32.mrf.mxu0  ;;  %v1381_v32 = vadd.f32 %v3626_v42, %v4668_v53 }
 0x13c   : > { %v4743_v44 = vadd.f32 %v3652_v39, %v1377_v6  ;;  %v1292_v47 = vpop.f32.mrf.mxu1 }
 0x13d   : > { %v1598_v58 = vpop.f32.mrf.mxu0  ;;  %v1379_v14 = vadd.f32 %v1292_v47, %v4673_v61 }
 0x13e   : > { %v4746_v19 = vadd.f32 %v1598_v58, %v1375_v7  ;;  %v3627_v1 = vpop.f32.mrf.mxu1 }
 0x13f   : > { %v3653_v5 = vpop.f32.mrf.mxu0  ;;  %v1382_v20 = vadd.f32 %v3627_v1, %v4676_v9 }
 0x140   : > { %v4749_v38 = vadd.f32 %v3653_v5, %v1378_v26  ;;  %v1295_v49 = vpop.f32.mrf.mxu1 }
 0x141   : > { %v1601_v50 = vpop.f32.mrf.mxu0  ;;  %v1380_v0 = vadd.f32 %v1295_v49, %v4679_v17 }
 0x142   : > { %v4752_v46 = vadd.f32 %v1601_v50, %v1376_v24  ;;  %v3630_v53 = vpop.f32.mrf.mxu1 }
 0x143   : > { %v3656_v22 = vpop.f32.mrf.mxu0  ;;  %v1385_v18 = vadd.f32 %v3630_v53, %v4683_v29 }
 0x144   : > { %v4755_v45 = vadd.f32 %v3656_v22, %v1381_v32  ;;  %v1308_v61 = vpop.f32.mrf.mxu1 }
 0x145   : > { %v1614_v31 = vpop.f32.mrf.mxu0  ;;  %v1383_v34 = vadd.f32 %v1308_v61, %v4686_v16 }
 0x146   : > { %v4758_v10 = vadd.f32 %v1614_v31, %v1379_v14  ;;  %v3631_v9 = vpop.f32.mrf.mxu1 }
 0x147   : > { %v3657_v21 = vpop.f32.mrf.mxu0  ;;  %v1386_v25 = vadd.f32 %v3631_v9, %v4689_v41 }
 0x148   : > { %v4761_v57 = vadd.f32 %v3657_v21, %v1382_v20  ;;  %v1311_v17 = vpop.f32.mrf.mxu1 }
 0x149   : > { %v1617_v27 = vpop.f32.mrf.mxu0  ;;  %v1384_v51 = vadd.f32 %v1311_v17, %v4692_v8 }
 0x14a   : > { %v4764_v48 = vadd.f32 %v1617_v27, %v1380_v0  ;;  %v3634_v29 = vpop.f32.mrf.mxu1 }
 0x14b   : > { %v3660_v55 = vpop.f32.mrf.mxu0  ;;  %v1389_v6 = vadd.f32 %v3634_v29, %v4695_v40 }
 0x14c   : > { %v4767_v28 = vadd.f32 %v3660_v55, %v1385_v18  ;;  %v1324_v16 = vpop.f32.mrf.mxu1 }
 0x14d   : > { %v1630_v52 = vpop.f32.mrf.mxu0  ;;  %v1387_v7 = vadd.f32 %v1324_v16, %v4698_v35 }
 0x14e   : > { %v4770_v62 = vadd.f32 %v1630_v52, %v1383_v34  ;;  %v3635_v41 = vpop.f32.mrf.mxu1 }
 0x14f   : > { %v3661_v59 = vpop.f32.mrf.mxu0  ;;  %v1390_v26 = vadd.f32 %v3635_v41, %v4701_v15 }
 0x150   : > { %v4773_v11 = vadd.f32 %v3661_v59, %v1386_v25  ;;  %v1327_v8 = vpop.f32.mrf.mxu1 }
 0x151   : > { %v1633_v54 = vpop.f32.mrf.mxu0  ;;  %v1388_v24 = vadd.f32 %v1327_v8, %v4704_v30 }
 0x152   : > { %v4776_v23 = vadd.f32 %v1633_v54, %v1384_v51  ;;  %v3638_v40 = vpop.f32.mrf.mxu1 }
 0x153   : > { %v3664_v39 = vpop.f32.mrf.mxu0  ;;  %v1393_v32 = vadd.f32 %v3638_v40, %v4707_v60 }
 0x154   : > { %v4779_v42 = vadd.f32 %v3664_v39, %v1389_v6  ;;  %v1340_v35 = vpop.f32.mrf.mxu1 }
 0x155   : > { %v1646_v58 = vpop.f32.mrf.mxu0  ;;  %v1391_v14 = vadd.f32 %v1340_v35, %v4710_v33 }
 0x156   : > { %v4782_v47 = vadd.f32 %v1646_v58, %v1387_v7  ;;  %v3639_v15 = vpop.f32.mrf.mxu1 }
 0x157   : > { %v3665_v5 = vpop.f32.mrf.mxu0  ;;  %v1394_v20 = vadd.f32 %v3639_v15, %v4713_v36 }
 0x158   : > { %5196 = vst [vmem:[#allocation3_spill] sm:$0xff] %v4782_v47  ;;  %v4785_v1 = vadd.f32 %v3665_v5, %v1390_v26  ;;  %v1343_v30 = vpop.f32.mrf.mxu1 }
 0x159   : > { %v1649_v50 = vpop.f32.mrf.mxu0  ;;  %v1392_v0 = vadd.f32 %v1343_v30, %v4716_v2 }
 0x15a   : > { %5197 = vst [vmem:[#allocation4_spill] sm:$0xff] %v4785_v1  ;;  %v4788_v49 = vadd.f32 %v1649_v50, %v1388_v24  ;;  %v3642_v60 = vpop.f32.mrf.mxu1 }
 0x15b   : > { %v3668_v22 = vpop.f32.mrf.mxu0  ;;  %v1397_v18 = vadd.f32 %v3642_v60, %v4719_v12 }
 0x15c   : > { %5198 = vst [vmem:[#allocation5_spill] sm:$0xff] %v4788_v49  ;;  %v4791_v53 = vadd.f32 %v3668_v22, %v1393_v32  ;;  %v1356_v33 = vpop.f32.mrf.mxu1 }
 0x15d   : > { %v1662_v31 = vpop.f32.mrf.mxu0  ;;  %v1395_v34 = vadd.f32 %v1356_v33, %v4722_v13 }
 0x15e   : > { %5199 = vst [vmem:[#allocation6_spill] sm:$0xff] %v4791_v53  ;;  %v4794_v61 = vadd.f32 %v1662_v31, %v1391_v14  ;;  %v3643_v36 = vpop.f32.mrf.mxu1 }
 0x15f   : > { %v3669_v21 = vpop.f32.mrf.mxu0  ;;  %v1398_v25 = vadd.f32 %v3643_v36, %v4725_v37 }
 0x160   : > { %5200 = vst [vmem:[#allocation7_spill] sm:$0xff] %v4794_v61  ;;  %v4797_v9 = vadd.f32 %v3669_v21, %v1394_v20  ;;  %v1359_v2 = vpop.f32.mrf.mxu1 }
 0x161   : > { %v1665_v27 = vpop.f32.mrf.mxu0  ;;  %v1396_v51 = vadd.f32 %v1359_v2, %v4728_v43 }
 0x162   : > { %5201 = vst [vmem:[#allocation8_spill] sm:$0xff] %v4797_v9  ;;  %v4800_v17 = vadd.f32 %v1665_v27, %v1392_v0  ;;  %v3678_v12 = vpop.f32.mrf.mxu1 }
 0x163   : > { %v3672_v55 = vpop.f32.mrf.mxu0 }
 0x164   : > { %5202 = vst [vmem:[#allocation9_spill] sm:$0xff] %v4800_v17  ;;  %v4803_v29 = vadd.f32 %v3672_v55, %v1397_v18  ;;  %v1833_v16 = vpop.f32.mrf.mxu1 }
 0x165   : > { %v1678_v52 = vpop.f32.mrf.mxu0 }
 0x166   : > { %5203 = vst [vmem:[#allocation10_spill] sm:$0xff] %v4803_v29  ;;  %v4805_v6 = vadd.f32 %v1678_v52, %v1395_v34  ;;  %v3679_v7 = vpop.f32.mrf.mxu1 }
 0x167   : > { %v3673_v13 = vpop.f32.mrf.mxu0 }
 0x168   : > { %5204 = vst [vmem:[#allocation11_spill] sm:$0xff] %v4805_v6  ;;  %v4807_v59 = vadd.f32 %v3673_v13, %v1398_v25  ;;  %v4811_v37 = vpop.f32.mrf.mxu1 }
 0x169   : > { %v1681_v41 = vpop.f32.mrf.mxu0 }
 0x16a   : > { %5205 = vst [vmem:[#allocation12_spill] sm:$0xff] %v4807_v59  ;;  %v4809_v54 = vadd.f32 %v1681_v41, %v1396_v51  ;;  %v4813_v8 = vpop.f32.mrf.mxu1 }
 0x16b   : > { %v3708_v26 = vpop.f32.mrf.mxu0 }
 0x16c   : > { %5206 = vst [vmem:[#allocation13_spill] sm:$0xff] %v4809_v54  ;;  %v4815_v39 = vpop.f32.mrf.mxu1 }
 0x16d   : > { %v2151_v43 = vpop.f32.mrf.mxu0 }
 0x16e   : > { %v4817_v40 = vpop.f32.mrf.mxu1 }
 0x16f   : > { %v3709_v24 = vpop.f32.mrf.mxu0 }
 0x170   : > { %v4821_v32 = vpop.f32.mrf.mxu1 }
 0x171   : > { %v4819_v58 = vpop.f32.mrf.mxu0 }
 0x172   : > { %v4825_v5 = vpop.f32.mrf.mxu1 }
 0x173   : > { %v4823_v35 = vpop.f32.mrf.mxu0 }
 0x174   : > { %v4829_v15 = vpop.f32.mrf.mxu1 }
 0x175   : > { %v4827_v14 = vpop.f32.mrf.mxu0 }
 0x176   : > { %v4833_v20 = vpop.f32.mrf.mxu1 }
 0x177   : > { %v4831_v50 = vpop.f32.mrf.mxu0 }
 0x178   : > { %v4837_v22 = vpop.f32.mrf.mxu1 }
 0x179   : > { %v4835_v30 = vpop.f32.mrf.mxu0 }
 0x17a   : > { %v4841_v60 = vpop.f32.mrf.mxu1 }
 0x17b   : > { %v4839_v0 = vpop.f32.mrf.mxu0 }
 0x17c   : > { %v4845_v18 = vpop.f32.mrf.mxu1 }
 0x17d   : > { %v4843_v31 = vpop.f32.mrf.mxu0 }
 0x17e   : > { %v4849_v21 = vpop.f32.mrf.mxu1 }
 0x17f   : > { %v4847_v33 = vpop.f32.mrf.mxu0 }
 0x180   : > { %v4853_v36 = vpop.f32.mrf.mxu1 }
 0x181   : > { %v4851_v34 = vpop.f32.mrf.mxu0 }
 0x182   : > { %v4857_v25 = vpop.f32.mrf.mxu1 }
 0x183   : > { %v4855_v27 = vpop.f32.mrf.mxu0 }
 0x184   : > { %v4861_v55 = vpop.f32.mrf.mxu1 }
 0x185   : > { %v4859_v2 = vpop.f32.mrf.mxu0  ;;  %5207 = vst [vmem:[#allocation14_spill] sm:$0xff] %v4861_v55 }
 0x186   : > { %v4865_v52 = vpop.f32.mrf.mxu1 }
 0x187   : > { %v4863_v51 = vpop.f32.mrf.mxu0  ;;  %5208 = vst [vmem:[#allocation15_spill] sm:$0xff] %v4865_v52 }
 0x188   : > { %v4869_v41 = vpop.f32.mrf.mxu1 }
 0x189   : > { %v4867_v13 = vpop.f32.mrf.mxu0  ;;  %5209 = vst [vmem:[#allocation16_spill] sm:$0xff] %v4869_v41 }
 0x18a   : > { %v4873_v59 = vpop.f32.mrf.mxu1 }
 0x18b   : > { %v4871_v54 = vpop.f32.mrf.mxu0  ;;  %5211 = vst [vmem:[#allocation18_spill] sm:$0xff] %v4873_v59 }
 0x18c   : > { %5210 = vst [vmem:[#allocation17_spill] sm:$0xff] %v4871_v54  ;;  %v4877_v29 = vpop.f32.mrf.mxu1 }
 0x18d   : > { %v4875_v6 = vpop.f32.mrf.mxu0  ;;  %5213 = vst [vmem:[#allocation20_spill] sm:$0xff] %v4877_v29 }
 0x18e   : > { %5212 = vst [vmem:[#allocation19_spill] sm:$0xff] %v4875_v6  ;;  %v4881_v9 = vpop.f32.mrf.mxu1 }
 0x18f   : > { %v4879_v17 = vpop.f32.mrf.mxu0  ;;  %5215 = vst [vmem:[#allocation22_spill] sm:$0xff] %v4881_v9 }
 0x190   : > { %5214 = vst [vmem:[#allocation21_spill] sm:$0xff] %v4879_v17  ;;  %v4885_v53 = vpop.f32.mrf.mxu1 }
 0x191   : > { %v4883_v61 = vpop.f32.mrf.mxu0  ;;  %5217 = vst [vmem:[#allocation24_spill] sm:$0xff] %v4885_v53 }
 0x192   : > { %5216 = vst [vmem:[#allocation23_spill] sm:$0xff] %v4883_v61  ;;  %v4889_v52 = vpop.f32.mrf.mxu1 }
 0x193   : > { %v4887_v49 = vpop.f32.mrf.mxu0  ;;  %5219 = vst [vmem:[#allocation26_spill] sm:$0xff] %v4889_v52 }
 0x194   : > { %5218 = vst [vmem:[#allocation25_spill] sm:$0xff] %v4887_v49  ;;  %v4893_v1 = vpop.f32.mrf.mxu1  ;;  %v1946_v49 = vadd.f32 %v3678_v12, %v4731_v4  ;;  %v1945_v4 = vadd.f32 %v4811_v37, %v4740_v56 }
 0x195   : > { %v4891_v41 = vpop.f32.mrf.mxu0  ;;  %5221 = vst [vmem:[#allocation28_spill] sm:$0xff] %v4893_v1  ;;  %v1944_v1 = vadd.f32 %v1833_v16, %v4734_v63  ;;  %v1950_v16 = vadd.f32 %v4813_v8, %v4743_v44 }
 0x196   : > { %5220 = vst [vmem:[#allocation27_spill] sm:$0xff] %v4891_v41  ;;  %v4897_v6 = vpop.f32.mrf.mxu1  ;;  %v2264_v41 = vadd.f32 %v3708_v26, %v1946_v49 }
 0x197   : > { %v4895_v59 = vpop.f32.mrf.mxu0  ;;  %5223 = vst [vmem:[#allocation30_spill] sm:$0xff] %v4897_v6  ;;  %v1947_v6 = vadd.f32 %v3679_v7, %v4737_v3  ;;  %v2268_v56 = vadd.f32 %v4823_v35, %v1950_v16 }
 0x198   : > { %5222 = vst [vmem:[#allocation29_spill] sm:$0xff] %v4895_v59  ;;  %v4901_v17 = vpop.f32.mrf.mxu1 }
 0x199   : > { %v4899_v29 = vpop.f32.mrf.mxu0  ;;  %5225 = vst [vmem:[#allocation32_spill] sm:$0xff] %v4901_v17  ;;  %v2265_v12 = vadd.f32 %v3709_v24, %v1947_v6 }
 0x19a   : > { %5224 = vst [vmem:[#allocation31_spill] sm:$0xff] %v4899_v29  ;;  %v3738_v61 = vpop.f32.mrf.mxu1  ;;  %v2262_v29 = vadd.f32 %v2151_v43, %v1944_v1  ;;  %v2263_v1 = vadd.f32 %v4819_v58, %v1945_v4 }
 0x19b   : > { %v4903_v9 = vpop.f32.mrf.mxu0  ;;  %v2586_v17 = vadd.f32 %v3738_v61, %v2264_v41  ;;  %v1948_v41 = vadd.f32 %v4815_v39, %v4746_v19 }
 0x19c   : > { %5226 = vst [vmem:[#allocation33_spill] sm:$0xff] %v4903_v9  ;;  %v2473_v52 = vpop.f32.mrf.mxu1 }
 0x19d   : > { %v4905_v53 = vpop.f32.mrf.mxu0  ;;  %v2584_v63 = vadd.f32 %v2473_v52, %v2262_v29  ;;  %v2266_v37 = vadd.f32 %v4827_v14, %v1948_v41  ;;  %v1954_v14 = vadd.f32 %v4825_v5, %v4755_v45 }
 0x19e   : > { %5227 = vst [vmem:[#allocation34_spill] sm:$0xff] %v4905_v53  ;;  %v3739_v59 = vpop.f32.mrf.mxu1  ;;  %v4917_v53 = vld [vmem:[%s5192_s2] ss:$0 sm:$0xff] }
 0x19f   : > { %v4908_v54 = vpop.f32.mrf.mxu0  ;;  %v2587_v61 = vadd.f32 %v3739_v59, %v2265_v12  ;;  %v2272_v16 = vadd.f32 %v4839_v0, %v1954_v14  ;;  %v1953_v0 = vadd.f32 %v4837_v22, %v4764_v48 }
 0x1a0   : > { %5228 = vst [vmem:[#allocation35_spill] sm:$0xff] %v4908_v54  ;;  %v2476_v47 = vpop.f32.mrf.mxu1 }
 0x1a1   : > { %v4911_v55 = vpop.f32.mrf.mxu0  ;;  %v2585_v29 = vadd.f32 %v2476_v47, %v2263_v1  ;;  %v1949_v47 = vadd.f32 %v4821_v32, %v4752_v46 }
 0x1a2   : > { %5229 = vst [vmem:[#allocation36_spill] sm:$0xff] %v4911_v55  ;;  %v3742_v26 = vpop.f32.mrf.mxu1 }
 0x1a3   : > { %v3768_v9 = vpop.f32.mrf.mxu0  ;;  %v2590_v8 = vadd.f32 %v3742_v26, %v2268_v56  ;;  %v2267_v12 = vadd.f32 %v4835_v30, %v1949_v47  ;;  %v1955_v30 = vadd.f32 %v4833_v20, %v4761_v57 }
 0x1a4   : > { %v2837_v49 = vadd.f32 %v3768_v9, %v2586_v17  ;;  %v2489_v55 = vpop.f32.mrf.mxu1  ;;  %v1951_v17 = vadd.f32 %v4817_v40, %v4749_v38 }
 0x1a5   : > { %v2724_v3 = vpop.f32.mrf.mxu0  ;;  %v2588_v35 = vadd.f32 %v2489_v55, %v2266_v37  ;;  %v2273_v56 = vadd.f32 %v4847_v33, %v1955_v30  ;;  %v1956_v33 = vadd.f32 %v4845_v18, %v4770_v62 }
 0x1a6   : > { %v2872_v7 = vadd.f32 %v4917_v53, %v2837_v49  ;;  %v2835_v43 = vadd.f32 %v2724_v3, %v2584_v63  ;;  %v3743_v6 = vpop.f32.mrf.mxu1 }
 0x1a7   : > { %v3769_v54 = vpop.f32.mrf.mxu0 }
 0x1a8   : > { %2900 = vst.msk [vmem:[#allocation2 + $0x10] sm:$0xff] %vm457_vm2, %v2872_v7  ;;  %v2870_v44 = vadd.f32 %v4917_v53, %v2835_v43  ;;  %v2838_v9 = vadd.f32 %v3769_v54, %v2587_v61  ;;  %v2492_v24 = vpop.f32.mrf.mxu1  ;;  %v2269_v54 = vadd.f32 %v4831_v50, %v1951_v17  ;;  %v1952_v50 = vadd.f32 %v4829_v15, %v4758_v10 }
 0x1a9   : > { %v2727_v59 = vpop.f32.mrf.mxu0  ;;  %v2589_v26 = vadd.f32 %v2492_v24, %v2267_v12  ;;  %v2271_v17 = vadd.f32 %v4851_v34, %v1953_v0  ;;  %v1959_v34 = vadd.f32 %v4849_v21, %v4773_v11  ;;  %v2274_v24 = vadd.f32 %v4859_v2, %v1956_v33  ;;  %v5237_v0 = vld [vmem:[#allocation16_spill] sm:$0xff]  ;;  %v5241_v33 = vld [vmem:[#allocation23_spill] sm:$0xff] }
 0x1aa   : > { %2898 = vst.msk [vmem:[#allocation2] sm:$0xff] %vm457_vm2, %v2870_v44  ;;  %v2873_v19 = vadd.f32 %v4917_v53, %v2838_v9  ;;  %v2836_v39 = vadd.f32 %v2727_v59, %v2585_v29  ;;  %v3746_v52 = vpop.f32.mrf.mxu1  ;;  %v2591_v63 = vadd.f32 %v3743_v6, %v2269_v54  ;;  %v2270_v61 = vadd.f32 %v4843_v31, %v1952_v50 }
 0x1ab   : > { %v3772_v58 = vpop.f32.mrf.mxu0  ;;  %v2594_v7 = vadd.f32 %v3746_v52, %v2272_v16  ;;  %v1958_v31 = vadd.f32 %v4841_v60, %v4767_v28  ;;  %v1962_v2 = vadd.f32 %v4857_v25, %v4779_v42 }
 0x1ac   : > { %2901 = vst.msk [vmem:[#allocation2 + $0x18] sm:$0xff] %vm457_vm2, %v2873_v19  ;;  %v2871_v38 = vadd.f32 %v4917_v53, %v2836_v39  ;;  %v2841_v40 = vadd.f32 %v3772_v58, %v2590_v8  ;;  %v2505_v55 = vpop.f32.mrf.mxu1 }
 0x1ad   : > { %v2740_v4 = vpop.f32.mrf.mxu0  ;;  %v2592_v29 = vadd.f32 %v2505_v55, %v2270_v61  ;;  %v2276_v8 = vadd.f32 %v4855_v27, %v1958_v31  ;;  %v1957_v27 = vadd.f32 %v4853_v36, %v4776_v23  ;;  %v5232_v55 = vld [vmem:[#allocation17_spill] sm:$0xff] }
 0x1ae   : > { %2899 = vst.msk [vmem:[#allocation2 + $0x8] sm:$0xff] %vm457_vm2, %v2871_v38  ;;  %v2876_v46 = vadd.f32 %v4917_v53, %v2841_v40  ;;  %v2839_v32 = vadd.f32 %v2740_v4, %v2588_v35  ;;  %v3747_v3 = vpop.f32.mrf.mxu1  ;;  %v2277_v38 = vadd.f32 %v4863_v51, %v1959_v34  ;;  %v5230_v51 = vld [vmem:[#allocation3_spill] sm:$0xff] }
 0x1af   : > { %v3773_v49 = vpop.f32.mrf.mxu0  ;;  %v2595_v6 = vadd.f32 %v3747_v3, %v2273_v56  ;;  %v2275_v4 = vadd.f32 %v4867_v13, %v1957_v27  ;;  %v5233_v13 = vld [vmem:[#allocation4_spill] sm:$0xff]  ;;  %v5235_v3 = vld [vmem:[#allocation19_spill] sm:$0xff] }
 0x1b0   : > { %2904 = vst.msk [vmem:[#allocation2 + $0x30] sm:$0xff] %vm457_vm2, %v2876_v46  ;;  %v2874_v45 = vadd.f32 %v4917_v53, %v2839_v32  ;;  %v2842_v5 = vadd.f32 %v3773_v49, %v2591_v63  ;;  %v2508_v43 = vpop.f32.mrf.mxu1  ;;  %v5231_v63 = vld [vmem:[#allocation14_spill] sm:$0xff]  ;;  %v2280_v49 = vadd.f32 %v5232_v55, %v1962_v2 }
 0x1b1   : > { %v2743_v1 = vpop.f32.mrf.mxu0  ;;  %v2593_v19 = vadd.f32 %v2508_v43, %v2271_v17  ;;  %v1960_v46 = vadd.f32 %v5231_v63, %v5230_v51  ;;  %v5240_v17 = vld [vmem:[#allocation18_spill] sm:$0xff] }
 0x1b2   : > { %2902 = vst.msk [vmem:[#allocation2 + $0x20] sm:$0xff] %vm457_vm2, %v2874_v45  ;;  %v2877_v10 = vadd.f32 %v4917_v53, %v2842_v5  ;;  %v2840_v15 = vadd.f32 %v2743_v1, %v2589_v26  ;;  %v3750_v44 = vpop.f32.mrf.mxu1  ;;  %v5234_v26 = vld [vmem:[#allocation15_spill] sm:$0xff] }
 0x1b3   : > { %v3776_v41 = vpop.f32.mrf.mxu0  ;;  %v2598_v58 = vadd.f32 %v3750_v44, %v2276_v8  ;;  %v1963_v45 = vadd.f32 %v5234_v26, %v5233_v13  ;;  %v2278_v1 = vadd.f32 %v5235_v3, %v1960_v46  ;;  %v5250_v46 = vld [vmem:[#allocation29_spill] sm:$0xff] }
 0x1b4   : > { %2905 = vst.msk [vmem:[#allocation2 + $0x38] sm:$0xff] %vm457_vm2, %v2877_v10  ;;  %v2875_v57 = vadd.f32 %v4917_v53, %v2840_v15  ;;  %v2845_v20 = vadd.f32 %v3776_v41, %v2594_v7  ;;  %v2521_v59 = vpop.f32.mrf.mxu1  ;;  %v5236_v15 = vld [vmem:[#allocation5_spill] sm:$0xff] }
 0x1b5   : > { %v2756_v9 = vpop.f32.mrf.mxu0  ;;  %v2596_v40 = vadd.f32 %v2521_v59, %v2274_v24  ;;  %v1961_v43 = vadd.f32 %v5237_v0, %v5236_v15  ;;  %v5244_v24 = vld [vmem:[#allocation25_spill] sm:$0xff] }
 0x1b6   : > { %2903 = vst.msk [vmem:[#allocation2 + $0x28] sm:$0xff] %vm457_vm2, %v2875_v57  ;;  %v2880_v48 = vadd.f32 %v4917_v53, %v2845_v20  ;;  %v2843_v22 = vadd.f32 %v2756_v9, %v2592_v29  ;;  %v3751_v39 = vpop.f32.mrf.mxu1  ;;  %v5238_v29 = vld [vmem:[#allocation21_spill] sm:$0xff]  ;;  %v5239_v9 = vld [vmem:[#allocation6_spill] sm:$0xff] }
 0x1b7   : > { %v3777_v37 = vpop.f32.mrf.mxu0  ;;  %v2599_v12 = vadd.f32 %v3751_v39, %v2277_v38  ;;  %v2281_v57 = vadd.f32 %v5238_v29, %v1963_v45  ;;  %v2279_v59 = vadd.f32 %v5241_v33, %v1961_v43  ;;  %v5253_v45 = vld [vmem:[#allocation31_spill] sm:$0xff]  ;;  %v5256_v43 = vld [vmem:[#allocation33_spill] sm:$0xff] }
 0x1b8   : > { %2908 = vst.msk [vmem:[#allocation2 + $0x50] sm:$0xff] %vm457_vm2, %v2880_v48  ;;  %v2878_v28 = vadd.f32 %v4917_v53, %v2843_v22  ;;  %v2846_v60 = vadd.f32 %v3777_v37, %v2595_v6  ;;  %v2524_v54 = vpop.f32.mrf.mxu1  ;;  %v1966_v6 = vadd.f32 %v5240_v17, %v5239_v9 }
 0x1b9   : > { %v2759_v47 = vpop.f32.mrf.mxu0  ;;  %v2597_v16 = vadd.f32 %v2524_v54, %v2275_v4  ;;  %v5245_v54 = vld [vmem:[#allocation8_spill] sm:$0xff] }
 0x1ba   : > { %2906 = vst.msk [vmem:[#allocation2 + $0x40] sm:$0xff] %vm457_vm2, %v2878_v28  ;;  %v2881_v62 = vadd.f32 %v4917_v53, %v2846_v60  ;;  %v2844_v18 = vadd.f32 %v2759_v47, %v2593_v19  ;;  %v3754_v14 = vpop.f32.mrf.mxu1  ;;  %v5242_v28 = vld [vmem:[#allocation7_spill] sm:$0xff]  ;;  %v5243_v60 = vld [vmem:[#allocation20_spill] sm:$0xff] }
 0x1bb   : > { %v3780_v35 = vpop.f32.mrf.mxu0  ;;  %v2602_v61 = vadd.f32 %v3754_v14, %v2280_v49  ;;  %v1964_v34 = vadd.f32 %v5243_v60, %v5242_v28  ;;  %v5262_v60 = vld [vmem:[#allocation35_spill] sm:$0xff] }
 0x1bc   : > { %2909 = vst.msk [vmem:[#allocation2 + $0x58] sm:$0xff] %vm457_vm2, %v2881_v62  ;;  %v2879_v11 = vadd.f32 %v4917_v53, %v2844_v18  ;;  %v2849_v21 = vadd.f32 %v3780_v35, %v2598_v58  ;;  %v2537_v32 = vpop.f32.mrf.mxu1  ;;  %v2284_v58 = vadd.f32 %v5244_v24, %v1966_v6  ;;  %v5246_v35 = vld [vmem:[#allocation22_spill] sm:$0xff] }
 0x1bd   : > { %v2772_v52 = vpop.f32.mrf.mxu0  ;;  %v2600_v20 = vadd.f32 %v2537_v32, %v2278_v1  ;;  %v1967_v38 = vadd.f32 %v5246_v35, %v5245_v54  ;;  %v5259_v6 = vld [vmem:[#allocation34_spill] sm:$0xff] }
 0x1be   : > { %2907 = vst.msk [vmem:[#allocation2 + $0x48] sm:$0xff] %vm457_vm2, %v2879_v11  ;;  %v2884_v23 = vadd.f32 %v4917_v53, %v2849_v21  ;;  %v2847_v36 = vadd.f32 %v2772_v52, %v2596_v40  ;;  %v3755_v5 = vpop.f32.mrf.mxu1  ;;  %v5247_v21 = vld [vmem:[#allocation27_spill] sm:$0xff] }
 0x1bf   : > { %v3781_v50 = vpop.f32.mrf.mxu0  ;;  %v2603_v37 = vadd.f32 %v3755_v5, %v2281_v57  ;;  %v2282_v2 = vadd.f32 %v5247_v21, %v1964_v34  ;;  %v2285_v32 = vadd.f32 %v5250_v46, %v1967_v38 }
 0x1c0   : > { %2912 = vst.msk [vmem:[#allocation2 + $0x70] sm:$0xff] %vm457_vm2, %v2884_v23  ;;  %v2882_v42 = vadd.f32 %v4917_v53, %v2847_v36  ;;  %v2850_v25 = vadd.f32 %v3781_v50, %v2599_v12  ;;  %v2540_v41 = vpop.f32.mrf.mxu1  ;;  %v5248_v12 = vld [vmem:[#allocation9_spill] sm:$0xff]  ;;  %v5249_v23 = vld [vmem:[#allocation24_spill] sm:$0xff] }
 0x1c1   : > { %v2775_v30 = vpop.f32.mrf.mxu0  ;;  %v2601_v62 = vadd.f32 %v2540_v41, %v2279_v59  ;;  %v1965_v36 = vadd.f32 %v5249_v23, %v5248_v12 }
 0x1c2   : > { %2910 = vst.msk [vmem:[#allocation2 + $0x60] sm:$0xff] %vm457_vm2, %v2882_v42  ;;  %v2885_v7 = vadd.f32 %v4917_v53, %v2850_v25  ;;  %v2848_v10 = vadd.f32 %v2775_v30, %v2597_v16  ;;  %v3758_v48 = vpop.f32.mrf.mxu1  ;;  %v5251_v16 = vld [vmem:[#allocation10_spill] sm:$0xff] }
 0x1c3   : > { %v3784_v56 = vpop.f32.mrf.mxu0  ;;  %v2606_v14 = vadd.f32 %v3758_v48, %v2284_v58  ;;  %v5252_v42 = vld [vmem:[#allocation26_spill] sm:$0xff]  ;;  %v2283_v5 = vadd.f32 %v5253_v45, %v1965_v36 }
 0x1c4   : > { %2913 = vst.msk [vmem:[#allocation2 + $0x78] sm:$0xff] %vm457_vm2, %v2885_v7  ;;  %v2883_v31 = vadd.f32 %v4917_v53, %v2848_v10  ;;  %v2853_v44 = vadd.f32 %v3784_v56, %v2602_v61  ;;  %v2553_v39 = vpop.f32.mrf.mxu1  ;;  %v1970_v25 = vadd.f32 %v5252_v42, %v5251_v16  ;;  %v5254_v61 = vld [vmem:[#allocation11_spill] sm:$0xff]  ;;  %v5255_v7 = vld [vmem:[#allocation28_spill] sm:$0xff] }
 0x1c5   : > { %v2788_v22 = vpop.f32.mrf.mxu0  ;;  %v2604_v50 = vadd.f32 %v2553_v39, %v2282_v2  ;;  %v1968_v10 = vadd.f32 %v5255_v7, %v5254_v61 }
 0x1c6   : > { %2911 = vst.msk [vmem:[#allocation2 + $0x68] sm:$0xff] %vm457_vm2, %v2883_v31  ;;  %v2888_v8 = vadd.f32 %v4917_v53, %v2853_v44  ;;  %v2851_v19 = vadd.f32 %v2788_v22, %v2600_v20  ;;  %v3759_v40 = vpop.f32.mrf.mxu1  ;;  %v2288_v41 = vadd.f32 %v5256_v43, %v1970_v25  ;;  %v5257_v20 = vld [vmem:[#allocation12_spill] sm:$0xff]  ;;  %v5258_v31 = vld [vmem:[#allocation30_spill] sm:$0xff] }
 0x1c7   : > { %v3785_v47 = vpop.f32.mrf.mxu0  ;;  %v2607_v30 = vadd.f32 %v3759_v40, %v2285_v32  ;;  %v1971_v44 = vadd.f32 %v5258_v31, %v5257_v20  ;;  %v2286_v48 = vadd.f32 %v5259_v6, %v1968_v10 }
 0x1c8   : > { %2916 = vst.msk [vmem:[#allocation2 + $0x90] sm:$0xff] %vm457_vm2, %v2888_v8  ;;  %v2886_v18 = vadd.f32 %v4917_v53, %v2851_v19  ;;  %v2854_v27 = vadd.f32 %v3785_v47, %v2603_v37  ;;  %v2556_v51 = vpop.f32.mrf.mxu1  ;;  %v5260_v37 = vld [vmem:[#allocation13_spill] sm:$0xff]  ;;  %v5261_v8 = vld [vmem:[#allocation32_spill] sm:$0xff] }
 0x1c9   : > { %v2791_v11 = vpop.f32.mrf.mxu0  ;;  %v2605_v56 = vadd.f32 %v2556_v51, %v2283_v5  ;;  %v1969_v19 = vadd.f32 %v5261_v8, %v5260_v37  ;;  %v2289_v34 = vadd.f32 %v5262_v60, %v1971_v44 }
 0x1ca   : > { %2914 = vst.msk [vmem:[#allocation2 + $0x80] sm:$0xff] %vm457_vm2, %v2886_v18  ;;  %v2889_v52 = vadd.f32 %v4917_v53, %v2854_v27  ;;  %v2852_v4 = vadd.f32 %v2791_v11, %v2601_v62  ;;  %v3762_v13 = vpop.f32.mrf.mxu1  ;;  %v5263_v18 = vld [vmem:[#allocation36_spill] sm:$0xff] }
 0x1cb   : > { %v3788_v63 = vpop.f32.mrf.mxu0  ;;  %v2610_v22 = vadd.f32 %v3762_v13, %v2288_v41  ;;  %v2287_v27 = vadd.f32 %v5263_v18, %v1969_v19 }
 0x1cc   : > { %2917 = vst.msk [vmem:[#allocation2 + $0x98] sm:$0xff] %vm457_vm2, %v2889_v52  ;;  %v2887_v55 = vadd.f32 %v4917_v53, %v2852_v4  ;;  %v2857_v49 = vadd.f32 %v3788_v63, %v2606_v14  ;;  %v2569_v15 = vpop.f32.mrf.mxu1 }
 0x1cd   : > { %v2804_v26 = vpop.f32.mrf.mxu0  ;;  %v2608_v39 = vadd.f32 %v2569_v15, %v2286_v48 }
 0x1ce   : > { %2915 = vst.msk [vmem:[#allocation2 + $0x88] sm:$0xff] %vm457_vm2, %v2887_v55  ;;  %v2892_v3 = vadd.f32 %v4917_v53, %v2857_v49  ;;  %v2855_v1 = vadd.f32 %v2804_v26, %v2604_v50  ;;  %v3763_v9 = vpop.f32.mrf.mxu1 }
 0x1cf   : > { %v3789_v0 = vpop.f32.mrf.mxu0  ;;  %v2611_v54 = vadd.f32 %v3763_v9, %v2289_v34 }
 0x1d0   : > { %2920 = vst.msk [vmem:[#allocation2 + $0xb0] sm:$0xff] %vm457_vm2, %v2892_v3  ;;  %v2890_v29 = vadd.f32 %v4917_v53, %v2855_v1  ;;  %v2858_v57 = vadd.f32 %v3789_v0, %v2607_v30  ;;  %v2572_v58 = vpop.f32.mrf.mxu1 }
 0x1d1   : > { %v2807_v17 = vpop.f32.mrf.mxu0  ;;  %v2609_v11 = vadd.f32 %v2572_v58, %v2287_v27 }
 0x1d2   : > { %2918 = vst.msk [vmem:[#allocation2 + $0xa0] sm:$0xff] %vm457_vm2, %v2890_v29  ;;  %v2893_v33 = vadd.f32 %v4917_v53, %v2858_v57  ;;  %v2856_v59 = vadd.f32 %v2807_v17, %v2605_v56 }
 0x1d3   : > { %v3792_v28 = vpop.f32.mrf.mxu0 }
 0x1d4   : > { %2921 = vst.msk [vmem:[#allocation2 + $0xb8] sm:$0xff] %vm457_vm2, %v2893_v33  ;;  %v2891_v47 = vadd.f32 %v4917_v53, %v2856_v59  ;;  %v2861_v24 = vadd.f32 %v3792_v28, %v2610_v22 }
 0x1d5   : > { %v2820_v62 = vpop.f32.mrf.mxu0 }
 0x1d6   : > { %2919 = vst.msk [vmem:[#allocation2 + $0xa8] sm:$0xff] %vm457_vm2, %v2891_v47  ;;  %v2896_v35 = vadd.f32 %v4917_v53, %v2861_v24  ;;  %v2859_v38 = vadd.f32 %v2820_v62, %v2608_v39 }
 0x1d7   : > { %v3793_v40 = vpop.f32.mrf.mxu0 }
 0x1d8   : > { %2924 = vst.msk [vmem:[#allocation2 + $0xd0] sm:$0xff] %vm457_vm2, %v2896_v35  ;;  %v2894_v21 = vadd.f32 %v4917_v53, %v2859_v38  ;;  %v2862_v2 = vadd.f32 %v3793_v40, %v2611_v54 }
 0x1d9   : > { %v2823_v14 = vpop.f32.mrf.mxu0 }
 0x1da   : > { %2922 = vst.msk [vmem:[#allocation2 + $0xc0] sm:$0xff] %vm457_vm2, %v2894_v21  ;;  %v2897_v52 = vadd.f32 %v4917_v53, %v2862_v2  ;;  %v2860_v4 = vadd.f32 %v2823_v14, %v2609_v11 }
 0x1dc   : > { %2926 = vst.msk [vmem:[#allocation2 + $0xd8] sm:$0x3f] %vm2925_vm4, %v2897_v52  ;;  %v2895_v12 = vadd.f32 %v4917_v53, %v2860_v4 }
 0x1de   : > { %2923 = vst.msk [vmem:[#allocation2 + $0xc8] sm:$0xff] %vm457_vm2, %v2895_v12 }
 0x1df LB: >> { %s3374_s7 = sshll.u32 %s3920_s6, 4  ;;  %s2932_s6 = sadd.s32 1, %s3920_s6   ;;  %s3920_s6 = sphi %s3918_s6, %s2932_s6  }
 0x1e0   : >> { %s3116_s9 = scalar_lea.vmem %s3998_s8, %s3374_s7  ;;  %s2934_s10 = scalar_lea.vmem [#allocation2], %s3374_s7 }
 0x1e1   : >> { %p2929_p4 = scmp.ge.s32.totalorder %s2932_s6, 14  }
 0x1e2   : > { %vm2969_vm5 = vcmask (%p2929_p4), 24576   ;;  %v3922_v33 = vmov (%p2929_p4), 0.0   ;;  %v3926_v59 = vmov (%p2929_p4), 0.0   ;;  %s5161_s12 = smov (%p2929_p4), 0  }
 0x1e3   : > { %2931 = sbr.rel (!%p2929_p4) target bundleno = 479 (0x1df), region = 114 }
 0x1e5   : >> { %v2935_v23 = vld [vmem:[%s2934_s10] sm:$0xff]  ;;  %v2936_v36 = vld [vmem:[%s2934_s10 + $0x8] sm:$0x3f] }
 0x1e6   : >> { %3376 = vst.msk [vmem:[%s3116_s9 + $0x11] sm:$0xff] %vm457_vm2, %v2935_v23 }
 0x1e7   : >> { %3377 = vst.msk [vmem:[%s3116_s9 + $0x19] sm:$0x3f] %vm2925_vm4, %v2936_v36 }
 0x1ee   : > { %v3378_v53 = vld [vmem:[%s3998_s8 + $0x21] sm:$0xff]  ;;  %v3379_v51 = vld [vmem:[%s3998_s8 + $0x29] sm:$0x3f]  ;;  %v3380_v63 = vld [vmem:[%s3998_s8 + $0xd1] sm:$0xff] }
 0x1ef   : > { %2945 = vst.msk [vmem:[%s3998_s8 + $0x1] sm:$0xff] %vm457_vm2, %v3378_v53  ;;  %3382 = vst.msk [vmem:[%s3998_s8 + $0xf1] sm:$0xff] %vm457_vm2, %v3380_v63  ;;  %v3381_v46 = vld [vmem:[%s3998_s8 + $0xd9] sm:$0x3f]  ;;  %v2954_v32 = vld [vmem:[%s3998_s8 + $0x12] sm:$0x1] }
 0x1f0   : > { %2946 = vst.msk [vmem:[%s3998_s8 + $0x9] sm:$0x3f] %vm2925_vm4, %v3379_v51  ;;  %v2955_v50 = vld [vmem:[%s3998_s8 + $0x22] sm:$0x1]  ;;  %3383 = vst.msk [vmem:[%s3998_s8 + $0xf9] sm:$0x3f] %vm2925_vm4, %v3381_v46 }
 0x1f1   : > { %2971 = vst.msk [vmem:[%s3998_s8 + $0x10] sm:$0x1] %vm2969_vm5, %v2954_v32  ;;  %2972 = vst.msk [vmem:[%s3998_s8 + $0x20] sm:$0x1] %vm2969_vm5, %v2955_v50  ;;  %v2956_v55 = vld [vmem:[%s3998_s8 + $0x32] sm:$0x1] }
 0x1f2   : > { %v2957_v49 = vld [vmem:[%s3998_s8 + $0x42] sm:$0x1]  ;;  %v2958_v16 = vld [vmem:[%s3998_s8 + $0x52] sm:$0x1]  ;;  %2973 = vst.msk [vmem:[%s3998_s8 + $0x30] sm:$0x1] %vm2969_vm5, %v2956_v55 }
 0x1f3   : > { %2974 = vst.msk [vmem:[%s3998_s8 + $0x40] sm:$0x1] %vm2969_vm5, %v2957_v49  ;;  %2975 = vst.msk [vmem:[%s3998_s8 + $0x50] sm:$0x1] %vm2969_vm5, %v2958_v16  ;;  %v2959_v42 = vld [vmem:[%s3998_s8 + $0x62] sm:$0x1] }
 0x1f4   : > { %v2960_v25 = vld [vmem:[%s3998_s8 + $0x72] sm:$0x1]  ;;  %v2961_v13 = vld [vmem:[%s3998_s8 + $0x82] sm:$0x1]  ;;  %2976 = vst.msk [vmem:[%s3998_s8 + $0x60] sm:$0x1] %vm2969_vm5, %v2959_v42 }
 0x1f5   : > { %2977 = vst.msk [vmem:[%s3998_s8 + $0x70] sm:$0x1] %vm2969_vm5, %v2960_v25  ;;  %2978 = vst.msk [vmem:[%s3998_s8 + $0x80] sm:$0x1] %vm2969_vm5, %v2961_v13  ;;  %v2962_v26 = vld [vmem:[%s3998_s8 + $0x92] sm:$0x1] }
 0x1f6   : > { %v2963_v45 = vld [vmem:[%s3998_s8 + $0xa2] sm:$0x1]  ;;  %v2964_v5 = vld [vmem:[%s3998_s8 + $0xb2] sm:$0x1]  ;;  %2979 = vst.msk [vmem:[%s3998_s8 + $0x90] sm:$0x1] %vm2969_vm5, %v2962_v26 }
 0x1f7   : > { %2980 = vst.msk [vmem:[%s3998_s8 + $0xa0] sm:$0x1] %vm2969_vm5, %v2963_v45  ;;  %2981 = vst.msk [vmem:[%s3998_s8 + $0xb0] sm:$0x1] %vm2969_vm5, %v2964_v5  ;;  %v2965_v30 = vld [vmem:[%s3998_s8 + $0xc2] sm:$0x1] }
 0x1f8   : > { %v2966_v3 = vld [vmem:[%s3998_s8 + $0xd2] sm:$0x1]  ;;  %v2967_v1 = vld [vmem:[%s3998_s8 + $0xe2] sm:$0x1]  ;;  %2982 = vst.msk [vmem:[%s3998_s8 + $0xc0] sm:$0x1] %vm2969_vm5, %v2965_v30 }
 0x1f9   : > { %2983 = vst.msk [vmem:[%s3998_s8 + $0xd0] sm:$0x1] %vm2969_vm5, %v2966_v3  ;;  %2984 = vst.msk [vmem:[%s3998_s8 + $0xe0] sm:$0x1] %vm2969_vm5, %v2967_v1  ;;  %v2987_v61 = vld [vmem:[%s3998_s8 + $0x1d] sm:$0x1] }
 0x1fa   : > { %v2988_v7 = vld [vmem:[%s3998_s8 + $0x2d] sm:$0x1]  ;;  %v2989_v10 = vld [vmem:[%s3998_s8 + $0x3d] sm:$0x1]  ;;  %3003 = vst.msk [vmem:[%s3998_s8 + $0x1f] sm:$0x1] %vm2969_vm5, %v2987_v61 }
 0x1fb   : > { %3004 = vst.msk [vmem:[%s3998_s8 + $0x2f] sm:$0x1] %vm2969_vm5, %v2988_v7  ;;  %3005 = vst.msk [vmem:[%s3998_s8 + $0x3f] sm:$0x1] %vm2969_vm5, %v2989_v10  ;;  %v2990_v15 = vld [vmem:[%s3998_s8 + $0x4d] sm:$0x1] }
 0x1fc   : > { %v2991_v0 = vld [vmem:[%s3998_s8 + $0x5d] sm:$0x1]  ;;  %v2992_v43 = vld [vmem:[%s3998_s8 + $0x6d] sm:$0x1]  ;;  %v2953_v41 = vld [vmem:[%s3998_s8 + $0x2] sm:$0x1] }
 0x1fd   : > { %v2968_v56 = vld [vmem:[%s3998_s8 + $0xf2] sm:$0x1]  ;;  %v2986_v29 = vld [vmem:[%s3998_s8 + $0xd] sm:$0x1]  ;;  %3006 = vst.msk [vmem:[%s3998_s8 + $0x4f] sm:$0x1] %vm2969_vm5, %v2990_v15 }
 0x1fe   : > { %3007 = vst.msk [vmem:[%s3998_s8 + $0x5f] sm:$0x1] %vm2969_vm5, %v2991_v0  ;;  %3008 = vst.msk [vmem:[%s3998_s8 + $0x6f] sm:$0x1] %vm2969_vm5, %v2992_v43  ;;  %v2993_v57 = vld [vmem:[%s3998_s8 + $0x7d] sm:$0x1] }
 0x1ff   : > { %2970 = vst.msk [vmem:[%s3998_s8] sm:$0x1] %vm2969_vm5, %v2953_v41  ;;  %2985 = vst.msk [vmem:[%s3998_s8 + $0xf0] sm:$0x1] %vm2969_vm5, %v2968_v56  ;;  %v2994_v20 = vld [vmem:[%s3998_s8 + $0x8d] sm:$0x1] }
 0x200   : > { %3002 = vst.msk [vmem:[%s3998_s8 + $0xf] sm:$0x1] %vm2969_vm5, %v2986_v29  ;;  %v2995_v31 = vld [vmem:[%s3998_s8 + $0x9d] sm:$0x1]  ;;  %3009 = vst.msk [vmem:[%s3998_s8 + $0x7f] sm:$0x1] %vm2969_vm5, %v2993_v57 }
 0x201   : > { %3010 = vst.msk [vmem:[%s3998_s8 + $0x8f] sm:$0x1] %vm2969_vm5, %v2994_v20  ;;  %3011 = vst.msk [vmem:[%s3998_s8 + $0x9f] sm:$0x1] %vm2969_vm5, %v2995_v31  ;;  %v2996_v44 = vld [vmem:[%s3998_s8 + $0xad] sm:$0x1] }
 0x202   : > { %v2997_v9 = vld [vmem:[%s3998_s8 + $0xbd] sm:$0x1]  ;;  %v2998_v17 = vld [vmem:[%s3998_s8 + $0xcd] sm:$0x1]  ;;  %3012 = vst.msk [vmem:[%s3998_s8 + $0xaf] sm:$0x1] %vm2969_vm5, %v2996_v44 }
 0x203   : > { %3013 = vst.msk [vmem:[%s3998_s8 + $0xbf] sm:$0x1] %vm2969_vm5, %v2997_v9  ;;  %3014 = vst.msk [vmem:[%s3998_s8 + $0xcf] sm:$0x1] %vm2969_vm5, %v2998_v17  ;;  %v2999_v6 = vld [vmem:[%s3998_s8 + $0xdd] sm:$0x1] }
 0x204   : > { %v3000_v48 = vld [vmem:[%s3998_s8 + $0xed] sm:$0x1]  ;;  %v3001_v22 = vld [vmem:[%s3998_s8 + $0xfd] sm:$0x1]  ;;  %3015 = vst.msk [vmem:[%s3998_s8 + $0xdf] sm:$0x1] %vm2969_vm5, %v2999_v6 }
 0x205   : > { %3016 = vst.msk [vmem:[%s3998_s8 + $0xef] sm:$0x1] %vm2969_vm5, %v3000_v48  ;;  %3017 = vst.msk [vmem:[%s3998_s8 + $0xff] sm:$0x1] %vm2969_vm5, %v3001_v22 }
 0x206 LB: >> { %s3384_s13 = sshll.u32 %s3932_s12, 4  ;;  %s3023_s12 = sadd.s32 1, %s3932_s12   ;;  %s3932_s12 = sphi %s5161_s12, %s3023_s12   ;;  %v3928_v59 = vphi %v3926_v59, %v3927_v59   ;;  %v3924_v33 = vphi %v3922_v33, %v3923_v33  }
 0x207   : >> { %s3027_s15 = scalar_lea.vmem %s3998_s8, %s3384_s13  ;;  %p3020_p5 = scmp.ge.s32.totalorder %s3023_s12, 16  }
 0x20c   : >> { %v3028_v37 = vld [vmem:[%s3027_s15] sm:$0xff]  ;;  %v3029_v8 = vld [vmem:[%s3027_s15 + $0x8] sm:$0xff] }
 0x20d   : >> { %v3030_v19 = vsel %vm457_vm2, %v3028_v37, 0.0  ;;  %v3031_v28 = vsel %vm457_vm2, %v3029_v8, 0.0  ;;  %v3040_v60 = vmul.f32 %v3028_v37, %v3028_v37  ;;  %v3041_v34 = vmul.f32 %v3029_v8, %v3029_v8 }
 0x20e   : >> { %v3032_v39 = vadd.f32 %v3031_v28, %v3030_v19 }
 0x20f   : >> { %v3042_v47 = vsel %vm457_vm2, %v3040_v60, 0.0  ;;  %v3043_v24 = vsel %vm457_vm2, %v3041_v34, 0.0 }
 0x210   : >> { %v3033_v58 = vrot.slane %v3032_v39, 4  ;;  %v3044_v62 = vadd.f32 %v3043_v24, %v3042_v47 }
 0x212   : >> { %v3034_v18 = vadd.f32 %v3033_v58, %v3032_v39  ;;  %v3045_v27 = vrot.slane %v3044_v62, 4 }
 0x214   : >> { %v3035_v54 = vrot.slane %v3034_v18, 2  ;;  %v3046_v35 = vadd.f32 %v3045_v27, %v3044_v62 }
 0x216   : >> { %v3036_v38 = vadd.f32 %v3035_v54, %v3034_v18  ;;  %v3047_v40 = vrot.slane %v3046_v35, 2 }
 0x218   : >> { %v3037_v11 = vrot.slane %v3036_v38, 1  ;;  %v3048_v21 = vadd.f32 %v3047_v40, %v3046_v35 }
 0x21a   : >> { %v3038_v2 = vadd.f32 %v3037_v11, %v3036_v38  ;;  %v3049_v14 = vrot.slane %v3048_v21, 1 }
 0x21c   : >> { %v3039_v52 = vadd.f32 %v3928_v59, %v3038_v2   ;;  %v3050_v4 = vadd.f32 %v3049_v14, %v3048_v21  ;;  %3022 = sbr.rel (!%p3020_p5) target bundleno = 518 (0x206), region = 125 }
 0x21e   : >> { %v3051_v12 = vadd.f32 %v3924_v33, %v3050_v4   ;;  %v3927_v59 = vmov %v3039_v52   ;;  %3052 = vst.msk [vmem:[%s238_s11] sm:$0x1] (%p3020_p5), %vm2969_vm5, %v3039_v52 }
 0x220   : >> { %v3923_v33 = vmov %v3051_v12   ;;  %3053 = vst.msk [vmem:[%s241_s14] sm:$0x1] (%p3020_p5), %vm2969_vm5, %v3051_v12 }
 0x221 PF: > { %s16_s18 = sadd.s32 1, %s3916_s18  }
 0x222   : > { %p13_p6 = scmp.ge.s32.totalorder %s16_s18, 4  }
 0x224   :  { %15 = sbr.rel (!%p13_p6) target bundleno = 1 (0x1), region = 136 }

</bundles_post_ra>
